<compile_context>
chip_gen: v7x
topology: tpu7x:2x2x1
jax: 0.10.0
libtpu: 0.0.40
codegen_flags: <defaults>
</compile_context>

<pallas_src>
import math
from functools import partial

import jax
import jax.numpy as jnp
from jax import lax
from jax.experimental import pallas as pl
from jax.experimental.pallas import tpu as pltpu


# ----------------------------- per-generation defaults -----------------------------

def _tpu_defaults():
    try:
        vmem = int(pltpu.get_tpu_info().vmem_capacity_bytes)
    except Exception:
        vmem = 64 * 1024 * 1024
    limit = (vmem * 3) // 4                     # leave double-buffer / compiler headroom
    if vmem >= (100 << 20):                     # v5e / v6e: 128 MiB VMEM -> bigger tiles
        return int(limit), 512, 1024, 512
    return int(limit), 256, 512, 512            # v7x: 64 MiB per TC


_VMEM_LIMIT, _TM, _TN, _TK = _tpu_defaults()


def _round_up(x, m):
    return ((x + m - 1) // m) * m


def _pick_tile(dim, target, align):
    """Largest tile <= target that divides `dim` and is `align`-aligned; else full dim."""
    if dim <= target:
        return dim
    t = (target // align) * align
    while t >= align:
        if dim % t == 0:
            return t
        t -= align
    return dim


def _tile_m(M, target):
    """Row tile and padded row count.  Pads M instead of degenerating to tiny tiles."""
    if M <= target:
        bm = _round_up(M, 8)
        return bm, bm
    t = (target // 8) * 8
    while t >= 128:
        if M % t == 0:
            return t, M
        t -= 8
    bm = (target // 8) * 8
    return bm, _round_up(M, bm)


# ------------------ fused (LayerNorm +) matmul (+ act, + residual) ------------------

def _matmul_kernel(act, fuse_ln, has_res, res_factor, single_k,
                   x_ref, w_ref, b_ref, *rest):
    idx = 0
    if fuse_ln:
        g_ref, beta_ref = rest[0], rest[1]
        idx = 2
    if has_res:
        res_ref = rest[idx]
        idx += 1
    o_ref = rest[idx]
    acc_ref = None if single_k else rest[idx + 1]

    x = x_ref[...]
    if fuse_ln:                                 # LayerNorm fused on the loaded x tile
        x = x.astype(jnp.float32)
        mu = jnp.mean(x, axis=-1, keepdims=True)
        xc = x - mu
        var = jnp.mean(xc * xc, axis=-1, keepdims=True)
        x = xc * lax.rsqrt(var + 1e-5) * g_ref[...] + beta_ref[...]
    part = jnp.dot(x.astype(jnp.bfloat16), w_ref[...].astype(jnp.bfloat16),
                   preferred_element_type=jnp.float32)

    def _finalize(acc):
        y = acc + b_ref[...]
        if act == "relu":
            y = jnp.maximum(y, 0.0)
        elif act == "swish":
            y = y * jax.nn.sigmoid(y)
        if has_res:
            y = res_ref[...].astype(jnp.float32) + res_factor * y
        o_ref[...] = y.astype(o_ref.dtype)

    if single_k:                                # no accumulator round-trip needed
        _finalize(part)
    else:
        kk = pl.program_id(2)

        @pl.when(kk == 0)
        def _init():
            acc_ref[...] = jnp.zeros_like(acc_ref)

        acc_ref[...] += part

        @pl.when(kk == pl.num_programs(2) - 1)
        def _done():
            _finalize(acc_ref[...])


def matmul(x, w, b, *, act="none", ln=None, residual=None, res_factor=1.0,
           out_dtype=jnp.bfloat16, tm=None, tn=None, tk=None):
    """o = [res + res_factor *] act( LN?(x) @ w + b ), tiled over (M, N, K)."""
    tm = tm or _TM
    tn = tn or _TN
    tk = tk or _TK
    lead = x.shape[:-1]
    K = x.shape[-1]
    N = w.shape[-1]
    x2 = x.reshape(-1, K)
    M = x2.shape[0]

    bm, Mp = _tile_m(M, tm)
    bn = _pick_tile(N, tn, 128)
    fuse_ln = ln is not None
    bk = K if fuse_ln else _pick_tile(K, tk, 128)   # LN needs the full row
    if Mp != M:
        x2 = jnp.pad(x2, ((0, Mp - M), (0, 0)))

    grid = (Mp // bm, N // bn, K // bk)
    single_k = grid[2] == 1

    in_specs = [pl.BlockSpec((bm, bk), lambda i, j, kk: (i, kk)),
                pl.BlockSpec((bk, bn), lambda i, j, kk: (kk, j)),
                pl.BlockSpec((1, bn), lambda i, j, kk: (0, j))]
    args = [x2, w, b.reshape(1, N)]
    if fuse_ln:
        g, beta = ln
        in_specs += [pl.BlockSpec((1, bk), lambda i, j, kk: (0, kk)),
                     pl.BlockSpec((1, bk), lambda i, j, kk: (0, kk))]
        args += [g.reshape(1, K), beta.reshape(1, K)]
    has_res = residual is not None
    if has_res:
        res2 = residual.reshape(-1, N)
        if Mp != M:
            res2 = jnp.pad(res2, ((0, Mp - M), (0, 0)))
        in_specs += [pl.BlockSpec((bm, bn), lambda i, j, kk: (i, j))]
        args += [res2]

    out = pl.pallas_call(
        partial(_matmul_kernel, act, fuse_ln, has_res, res_factor, single_k),
        grid=grid,
        in_specs=in_specs,
        out_specs=pl.BlockSpec((bm, bn), lambda i, j, kk: (i, j)),
        out_shape=jax.ShapeDtypeStruct((Mp, N), out_dtype),
        scratch_shapes=([] if single_k else [pltpu.VMEM((bm, bn), jnp.float32)]),
        compiler_params=pltpu.CompilerParams(
            dimension_semantics=("parallel", "parallel", "arbitrary"),
            vmem_limit_bytes=_VMEM_LIMIT),
    )(*args)
    if Mp != M:
        out = out[:M]
    return out.reshape(*lead, N)


# ------------------------------- LayerNorm kernel -------------------------------

def _ln_kernel(x_ref, g_ref, b_ref, o_ref):
    x = x_ref[...].astype(jnp.float32)
    mu = jnp.mean(x, axis=-1, keepdims=True)
    xc = x - mu
    var = jnp.mean(xc * xc, axis=-1, keepdims=True)
    o_ref[...] = (xc * lax.rsqrt(var + 1e-5) * g_ref[...] + b_ref[...]).astype(o_ref.dtype)


def layernorm(x, g, b, out_dtype=jnp.bfloat16):
    D = x.shape[-1]
    lead = x.shape[:-1]
    x2 = x.reshape(-1, D)
    M = x2.shape[0]
    bm, Mp = _tile_m(M, _TM)
    if Mp != M:
        x2 = jnp.pad(x2, ((0, Mp - M), (0, 0)))
    out = pl.pallas_call(
        _ln_kernel,
        grid=(Mp // bm,),
        in_specs=[pl.BlockSpec((bm, D), lambda i: (i, 0)),
                  pl.BlockSpec((1, D), lambda i: (0, 0)),
                  pl.BlockSpec((1, D), lambda i: (0, 0))],
        out_specs=pl.BlockSpec((bm, D), lambda i: (i, 0)),
        out_shape=jax.ShapeDtypeStruct((Mp, D), out_dtype),
        compiler_params=pltpu.CompilerParams(
            dimension_semantics=("parallel",), vmem_limit_bytes=_VMEM_LIMIT),
    )(x2, g.reshape(1, D), b.reshape(1, D))
    if Mp != M:
        out = out[:M]
    return out.reshape(*lead, D)


# ------------------------- LayerNorm + pointwise conv + GLU -------------------------

def _ln_glu_kernel(x_ref, w_ref, b_ref, g_ref, beta_ref, o_ref):
    x = x_ref[...].astype(jnp.float32)
    mu = jnp.mean(x, axis=-1, keepdims=True)
    xc = x - mu
    var = jnp.mean(xc * xc, axis=-1, keepdims=True)
    x = xc * lax.rsqrt(var + 1e-5) * g_ref[...] + beta_ref[...]
    y = jnp.dot(x.astype(jnp.bfloat16), w_ref[...].astype(jnp.bfloat16),
                preferred_element_type=jnp.float32) + b_ref[...]
    half = o_ref.shape[-1]
    o_ref[...] = (y[:, :half] * jax.nn.sigmoid(y[:, half:])).astype(o_ref.dtype)


def ln_glu(x, w, b, g, beta):
    lead = x.shape[:-1]
    K = x.shape[-1]
    N2 = w.shape[-1]
    half = N2 // 2
    x2 = x.reshape(-1, K)
    M = x2.shape[0]
    bm, Mp = _tile_m(M, 256)
    if Mp != M:
        x2 = jnp.pad(x2, ((0, Mp - M), (0, 0)))
    out = pl.pallas_call(
        _ln_glu_kernel,
        grid=(Mp // bm,),
        in_specs=[pl.BlockSpec((bm, K), lambda i: (i, 0)),
                  pl.BlockSpec((K, N2), lambda i: (0, 0)),
                  pl.BlockSpec((1, N2), lambda i: (0, 0)),
                  pl.BlockSpec((1, K), lambda i: (0, 0)),
                  pl.BlockSpec((1, K), lambda i: (0, 0))],
        out_specs=pl.BlockSpec((bm, half), lambda i: (i, 0)),
        out_shape=jax.ShapeDtypeStruct((Mp, half), jnp.bfloat16),
        compiler_params=pltpu.CompilerParams(
            dimension_semantics=("parallel",), vmem_limit_bytes=_VMEM_LIMIT),
    )(x2, w, b.reshape(1, N2), g.reshape(1, K), beta.reshape(1, K))
    if Mp != M:
        out = out[:M]
    return out.reshape(*lead, half)


# --------------------- depthwise conv + BatchNorm(eval) + Swish ---------------------

def _dwconv_bn_swish_kernel(ksize, x_ref, w_ref, s_ref, sh_ref, o_ref):
    x = x_ref[0].astype(jnp.float32)                     # (T, D)
    T = x.shape[0]
    pad = (ksize - 1) // 2
    t_idx = lax.broadcasted_iota(jnp.int32, (T, 1), 0)
    w = w_ref[...]
    acc = jnp.zeros_like(x)
    for k in range(ksize):                               # static unroll over taps
        shift = pad - k                                  # out[t] += x[t - shift] * w[k]
        xk = x if (shift % T) == 0 else pltpu.roll(x, shift % T, axis=0)
        lo = max(0, shift)
        hi = T + min(0, shift)
        valid = (t_idx >= lo) & (t_idx < hi)             # 'same' padding edge mask
        acc = acc + jnp.where(valid, xk, 0.0) * w[k:k + 1, :]
    y = acc * s_ref[...] + sh_ref[...]                   # folded BatchNorm (eval)
    o_ref[0] = (y * jax.nn.sigmoid(y)).astype(o_ref.dtype)


def dwconv_bn_swish(x, w, bn_scale, bn_shift, kernel_size):
    B, T, D = x.shape
    return pl.pallas_call(
        partial(_dwconv_bn_swish_kernel, kernel_size),
        grid=(B,),
        in_specs=[pl.BlockSpec((1, T, D), lambda b: (b, 0, 0)),
                  pl.BlockSpec((kernel_size, D), lambda b: (0, 0)),
                  pl.BlockSpec((1, D), lambda b: (0, 0)),
                  pl.BlockSpec((1, D), lambda b: (0, 0))],
        out_specs=pl.BlockSpec((1, T, D), lambda b: (b, 0, 0)),
        out_shape=jax.ShapeDtypeStruct((B, T, D), jnp.bfloat16),
        compiler_params=pltpu.CompilerParams(
            dimension_semantics=("parallel",), vmem_limit_bytes=_VMEM_LIMIT),
    )(x, w, bn_scale.reshape(1, D), bn_shift.reshape(1, D))


# ----------------------------- fused self-attention -----------------------------

def _rel_shift(pos_s, row, col):
    """Exact reproduction of the torch pad/view relative-shift trick using only
    static rolls + masks (robust lowering for any T)."""
    T = pos_s.shape[0]
    z = pos_s
    b = 1
    while b < T:                      # per-row right-roll by the row index x
        z = jnp.where((row & b) != 0, jnp.roll(z, b, axis=1), z)
        b *= 2
    a = jnp.roll(z, 1, axis=1)        # a[x, y]  = S[x,   (y - x - 1) mod T]
    bb = jnp.roll(a, -1, axis=0)      # bb[x, y] = S[x+1, (y - x - 2) mod T]
    return jnp.where(col <= row, a, jnp.where(col == row + 1, 0.0, bb))


def _mhsa_kernel(scale, qu_ref, qv_ref, k_ref, v_ref, p_ref, o_ref):
    qu = qu_ref[0, 0]                                    # (T, Dh) bf16
    qv = qv_ref[0, 0]
    k = k_ref[0, 0]
    v = v_ref[0, 0]
    p = p_ref[0]
    T = qu.shape[0]
    content = lax.dot_general(qu, k, (((1,), (1,)), ((), ())),
                              preferred_element_type=jnp.float32)
    pos_s = lax.dot_general(qv, p, (((1,), (1,)), ((), ())),
                            preferred_element_type=jnp.float32)
    row = lax.broadcasted_iota(jnp.int32, (T, T), 0)
    col = lax.broadcasted_iota(jnp.int32, (T, T), 1)
    pos_s = _rel_shift(pos_s, row, col)
    s = (content + pos_s) * scale
    m = jnp.max(s, axis=-1, keepdims=True)
    e = jnp.exp(s - m)
    denom = jnp.sum(e, axis=-1, keepdims=True)
    probs = e * pl.reciprocal(denom, approx=True)
    ctx = jnp.dot(probs.astype(jnp.bfloat16), v, preferred_element_type=jnp.float32)
    o_ref[0, 0] = ctx.astype(o_ref.dtype)


def mhsa_attention(qu, qv, k, v, pos_h, scale):
    B, H, T, Dh = qu.shape
    spec4 = pl.BlockSpec((1, 1, T, Dh), lambda b, h: (b, h, 0, 0))
    return pl.pallas_call(
        partial(_mhsa_kernel, scale),
        grid=(B, H),
        in_specs=[spec4, spec4, spec4, spec4,
                  pl.BlockSpec((1, T, Dh), lambda b, h: (h, 0, 0))],
        out_specs=spec4,
        out_shape=jax.ShapeDtypeStruct((B, H, T, Dh), jnp.bfloat16),
        compiler_params=pltpu.CompilerParams(
            dimension_semantics=("parallel", "parallel"),
            vmem_limit_bytes=_VMEM_LIMIT),
    )(qu, qv, k, v, pos_h)


# --------------------------------- conformer modules ---------------------------------

def sinusoidal_pe(length, d_model):
    pos = jnp.arange(length, dtype=jnp.float32)[:, None]
    i = jnp.arange(0, d_model, 2, dtype=jnp.float32)
    div = jnp.exp(-(math.log(10000.0)) * i / d_model)
    pe = jnp.zeros((length, d_model), jnp.float32)
    pe = pe.at[:, 0::2].set(jnp.sin(pos * div))
    pe = pe.at[:, 1::2].set(jnp.cos(pos * div))
    return pe


def feed_forward_residual(x, p, factor):
    # x + factor * ( Linear2( Swish( Linear1( LN(x) ) ) ) ), dropout = identity
    h = matmul(x, p["w1"], p["b1"], act="swish", ln=(p["ln_g"], p["ln_b"]))
    return matmul(h, p["w2"], p["b2"], residual=x, res_factor=factor)


def mhsa_residual(x, p, num_heads, pe):
    B, T, D = x.shape
    H = num_heads
    Dh = D // H
    # fused LN + q/k/v projection in a single (D, 3D) matmul
    qkv = matmul(x, p["wqkv"], p["bqkv"], ln=(p["ln_g"], p["ln_b"]))     # (B,T,3D) bf16
    # positional projection is batch-independent: compute once on (T, D)
    pos = matmul(pe, p["wp"], p["bp"])                                   # (T, D) bf16
    qkv4 = qkv.reshape(B, T, 3, H, Dh)
    q = qkv4[:, :, 0].transpose(0, 2, 1, 3)                              # (B,H,T,Dh)
    k = qkv4[:, :, 1].transpose(0, 2, 1, 3).astype(jnp.bfloat16)
    v = qkv4[:, :, 2].transpose(0, 2, 1, 3).astype(jnp.bfloat16)
    qu = (q.astype(jnp.float32) + p["u_bias"][None, :, None, :]).astype(jnp.bfloat16)
    qv = (q.astype(jnp.float32) + p["v_bias"][None, :, None, :]).astype(jnp.bfloat16)
    pos_h = pos.reshape(T, H, Dh).transpose(1, 0, 2).astype(jnp.bfloat16)
    ctx = mhsa_attention(qu, qv, k, v, pos_h, 1.0 / math.sqrt(D))        # (B,H,T,Dh)
    ctx = ctx.transpose(0, 2, 1, 3).reshape(B, T, D)
    return matmul(ctx, p["wo"], p["bo"], residual=x, res_factor=1.0)


def conv_module_residual(x, p, kernel_size):
    glu = ln_glu(x, p["pw1_w"], p["pw1_b"], p["ln_g"], p["ln_b"])        # (B,T,D) bf16
    y = dwconv_bn_swish(glu, p["dw_w"], p["bn_scale"], p["bn_shift"], kernel_size)
    return matmul(y, p["pw2_w"], p["pw2_b"], residual=x, res_factor=1.0)


def conformer_block(x, p, num_heads, conv_kernel_size, pe, out_dtype=jnp.bfloat16):
    x = feed_forward_residual(x, p["ff1"], 0.5)
    x = mhsa_residual(x, p["att"], num_heads, pe)
    x = conv_module_residual(x, p["conv"], conv_kernel_size)
    x = feed_forward_residual(x, p["ff2"], 0.5)
    return layernorm(x, p["ln_g"], p["ln_b"], out_dtype=out_dtype)


# ------------------------- Conv2d subsampling front-end -------------------------

def _im2col_nhwc(x, k, stride):
    """x: (B, H, W, C) -> (B, Ho, Wo, k*k*C) patches with (kh, kw, C) ordering."""
    B, H, W, C = x.shape
    Ho = (H - k) // stride + 1
    Wo = (W - k) // stride + 1
    cols = []
    for i in range(k):
        for j in range(k):
            cols.append(x[:, i:i + stride * Ho:stride, j:j + stride * Wo:stride, :])
    return jnp.concatenate(cols, axis=-1), Ho, Wo


def conv2d_subsampling(x, lengths, p, d_model):
    B, T, F = x.shape
    x4 = x[..., None]                                    # NHWC, C = 1 (no transposes)
    p1, H1, W1 = _im2col_nhwc(x4, 3, 2)
    y1 = matmul(p1, p["w1"], p["b1"], act="relu")        # conv1 + ReLU as matmul
    p2, H2, W2 = _im2col_nhwc(y1, 3, 2)
    y2 = matmul(p2, p["w2"], p["b2"], act="relu")        # (B, H2, W2, d_model)
    # torch: (B, C, T', F') -> permute(0, 2, 1, 3) -> view(B, T', C * F')
    out = y2.transpose(0, 1, 3, 2).reshape(B, H2, d_model * W2)
    out_lengths = (lengths >> 2) - 1                     # matches the reference formula
    return out, out_lengths


def conformer_encoder(x, lengths, params, num_heads, conv_kernel_size):
    d_model = params["proj_w"].shape[-1]
    y, out_lengths = conv2d_subsampling(x, lengths, params["subsample"], d_model)
    y = matmul(y, params["proj_w"], params["proj_b"])    # input projection (bf16)
    B, T, D = y.shape
    pe = sinusoidal_pe(T, D)
    n_layers = len(params["layers"])
    for li, lp in enumerate(params["layers"]):
        odt = jnp.float32 if li == n_layers - 1 else jnp.bfloat16
        y = conformer_block(y, lp, num_heads, conv_kernel_size, pe, out_dtype=odt)
    return y, out_lengths


# ------------------------------------ parameters ------------------------------------

def init_params(key, input_dim, d_model, num_layers, num_heads, ff_exp, conv_exp, conv_k):
    keys = iter(jax.random.split(key, 4096))

    def w(shape, scale=0.02):           # matmul weights kept in bf16 for the MXU
        return (scale * jax.random.normal(next(keys), shape)).astype(jnp.bfloat16)

    def wf32(shape, scale=0.02):
        return (scale * jax.random.normal(next(keys), shape)).astype(jnp.float32)

    def zeros(shape):
        return jnp.zeros(shape, jnp.float32)

    def ones(shape):
        return jnp.ones(shape, jnp.float32)

    fsub = ((input_dim - 1) // 2 - 1) // 2

    params = {
        "subsample": {
            "w1": w((3 * 3 * 1, d_model)), "b1": zeros((d_model,)),
            "w2": w((3 * 3 * d_model, d_model)), "b2": zeros((d_model,)),
        },
        "proj_w": w((d_model * fsub, d_model)),
        "proj_b": zeros((d_model,)),
    }

    def ff_params():
        return {"ln_g": ones((d_model,)), "ln_b": zeros((d_model,)),
                "w1": w((d_model, d_model * ff_exp)), "b1": zeros((d_model * ff_exp,)),
                "w2": w((d_model * ff_exp, d_model)), "b2": zeros((d_model,))}

    def att_params():
        dh = d_model // num_heads
        return {"ln_g": ones((d_model,)), "ln_b": zeros((d_model,)),
                "wqkv": w((d_model, 3 * d_model)), "bqkv": zeros((3 * d_model,)),
                "wp": w((d_model, d_model)), "bp": zeros((d_model,)),  # pos proj: no bias in ref
                "u_bias": wf32((num_heads, dh)), "v_bias": wf32((num_heads, dh)),
                "wo": w((d_model, d_model)), "bo": zeros((d_model,))}

    def conv_params():
        eps = 1e-5
        bn_gamma, bn_beta = ones((d_model,)), zeros((d_model,))
        run_mean, run_var = zeros((d_model,)), ones((d_model,))
        scale = bn_gamma / jnp.sqrt(run_var + eps)
        shift = bn_beta - run_mean * scale
        dexp = d_model * conv_exp                        # GLU halves dexp -> d_model
        return {"ln_g": ones((d_model,)), "ln_b": zeros((d_model,)),
                "pw1_w": w((d_model, dexp)), "pw1_b": zeros((dexp,)),
                "dw_w": wf32((conv_k, d_model)),
                "bn_scale": scale, "bn_shift": shift,
                "pw2_w": w((d_model, d_model)), "pw2_b": zeros((d_model,))}

    params["layers"] = [
        {"ff1": ff_params(), "att": att_params(), "conv": conv_params(),
         "ff2": ff_params(), "ln_g": ones((d_model,)), "ln_b": zeros((d_model,))}
        for _ in range(num_layers)
    ]
    return params


# ------------------------------------------ main ------------------------------------------

if __name__ == "__main__":
    B, T, F = 2, 67, 16          # batch, time frames, feature dim (input_dim)
    d_model = 32
    num_heads = 4
    num_layers = 2
    ff_exp = 4
    conv_exp = 2
    conv_k = 7                   # odd kernel, 'same' padding like the module

    key = jax.random.PRNGKey(0)
    kx, kp = jax.random.split(key)
    x = jax.random.normal(kx, (B, T, F), jnp.float32)
    input_lengths = jnp.array([T, T - 4], dtype=jnp.int32)

    params = init_params(kp, F, d_model, num_layers, num_heads, ff_exp, conv_exp, conv_k)

    fwd = jax.jit(partial(conformer_encoder, num_heads=num_heads,
                          conv_kernel_size=conv_k))
    out, out_lengths = fwd(x, input_lengths, params)
    jax.block_until_ready(out)
    jax.block_until_ready(out_lengths)

    t1 = (T - 3) // 2 + 1
    t_out = (t1 - 3) // 2 + 1
    assert out.shape == (B, t_out, d_model), out.shape
    assert out.dtype == jnp.float32
    assert out_lengths.shape == (B,)
    assert bool(jnp.all(jnp.isfinite(out)))
    print("KERNEL_OK")
</pallas_src>

<mosaic_0001>
module attributes {stable_mosaic.version = 11 : i64} {
  func.func @_matmul_kernel(%arg0: i32, %arg1: i32, %arg2: i32, %arg3: memref<256x9xf32, #tpu.memory_space<vmem>>, %arg4: memref<9x32xbf16, #tpu.memory_space<vmem>>, %arg5: memref<1x32xf32, #tpu.memory_space<vmem>>, %arg6: memref<256x32xbf16, #tpu.memory_space<vmem>>) attributes {dimension_semantics = [#tpu.dimension_semantics<parallel>, #tpu.dimension_semantics<parallel>, #tpu.dimension_semantics<arbitrary>], iteration_bounds = array<i64: 2, 1, 1>, scalar_prefetch = 0 : i64, scratch_operands = 0 : i64, tpu.core_type = #tpu.core_type<tc>, window_params = [{transform_indices = @transform_0, window_bounds = array<i64: 256, 9>}, {transform_indices = @transform_1, window_bounds = array<i64: 9, 32>}, {transform_indices = @transform_2, window_bounds = array<i64: 1, 32>}, {transform_indices = @transform_3, window_bounds = array<i64: 256, 32>}]} {
    %c0 = arith.constant 0 : index
    %c0_0 = arith.constant 0 : index
    %0 = vector.load %arg3[%c0, %c0_0] : memref<256x9xf32, #tpu.memory_space<vmem>>, vector<256x9xf32>
    %1 = arith.truncf %0 : vector<256x9xf32> to vector<256x9xbf16>
    %c0_1 = arith.constant 0 : index
    %c0_2 = arith.constant 0 : index
    %2 = vector.load %arg4[%c0_1, %c0_2] : memref<9x32xbf16, #tpu.memory_space<vmem>>, vector<9x32xbf16>
    %cst = arith.constant dense<0.000000e+00> : vector<256x32xf32>
    %3 = tpu.matmul %1, %2, %cst {dimension_numbers = #tpu.dot_dimension_numbers<[1], [0], [0], [1], [0, 0, 1, 1], [], []>} : vector<256x9xbf16>, vector<9x32xbf16>, vector<256x32xf32> -> vector<256x32xf32>
    %c0_3 = arith.constant 0 : index
    %c0_4 = arith.constant 0 : index
    %4 = vector.load %arg5[%c0_3, %c0_4] : memref<1x32xf32, #tpu.memory_space<vmem>>, vector<1x32xf32>
    %5 = vector.broadcast %4 : vector<1x32xf32> to vector<256x32xf32>
    %6 = arith.addf %3, %5 : vector<256x32xf32>
    %cst_5 = arith.constant 0.000000e+00 : f32
    %7 = vector.broadcast %cst_5 : f32 to vector<256x32xf32>
    %8 = arith.maximumf %6, %7 : vector<256x32xf32>
    %9 = arith.truncf %8 : vector<256x32xf32> to vector<256x32xbf16>
    %c0_6 = arith.constant 0 : index
    %c0_7 = arith.constant 0 : index
    %10 = vector.load %arg6[%c0_6, %c0_7] : memref<256x32xbf16, #tpu.memory_space<vmem>>, vector<256x32xbf16>
    tpu.vector_store %arg6[%c0_6, %c0_7], %9 {strides = array<i32>} : memref<256x32xbf16, #tpu.memory_space<vmem>>, vector<256x32xbf16>,
    return
  }
  func.func @transform_0(%arg0: i32, %arg1: i32, %arg2: i32) -> (i32, i32) {
    %c0_i32 = arith.constant 0 : i32
    return %arg0, %arg2 : i32, i32
  }
  func.func @transform_1(%arg0: i32, %arg1: i32, %arg2: i32) -> (i32, i32) {
    %c0_i32 = arith.constant 0 : i32
    return %arg2, %arg1 : i32, i32
  }
  func.func @transform_2(%arg0: i32, %arg1: i32, %arg2: i32) -> (i32, i32) {
    %c0_i32 = arith.constant 0 : i32
    %c0_i32_0 = arith.constant 0 : i32
    return %c0_i32, %arg1 : i32, i32
  }
  func.func @transform_3(%arg0: i32, %arg1: i32, %arg2: i32) -> (i32, i32) {
    %c0_i32 = arith.constant 0 : i32
    return %arg0, %arg1 : i32, i32
  }
}

module attributes {stable_mosaic.version = 11 : i64} {
  func.func @_matmul_kernel(%arg0: i32, %arg1: i32, %arg2: i32, %arg3: memref<96x288xbf16, #tpu.memory_space<vmem>>, %arg4: memref<288x32xbf16, #tpu.memory_space<vmem>>, %arg5: memref<1x32xf32, #tpu.memory_space<vmem>>, %arg6: memref<96x32xbf16, #tpu.memory_space<vmem>>) attributes {dimension_semantics = [#tpu.dimension_semantics<parallel>, #tpu.dimension_semantics<parallel>, #tpu.dimension_semantics<arbitrary>], iteration_bounds = array<i64: 1, 1, 1>, scalar_prefetch = 0 : i64, scratch_operands = 0 : i64, tpu.core_type = #tpu.core_type<tc>, window_params = [{transform_indices = @transform_0, window_bounds = array<i64: 96, 288>}, {transform_indices = @transform_1, window_bounds = array<i64: 288, 32>}, {transform_indices = @transform_2, window_bounds = array<i64: 1, 32>}, {transform_indices = @transform_3, window_bounds = array<i64: 96, 32>}]} {
    %c0 = arith.constant 0 : index
    %c0_0 = arith.constant 0 : index
    %0 = vector.load %arg3[%c0, %c0_0] : memref<96x288xbf16, #tpu.memory_space<vmem>>, vector<96x288xbf16>
    %c0_1 = arith.constant 0 : index
    %c0_2 = arith.constant 0 : index
    %1 = vector.load %arg4[%c0_1, %c0_2] : memref<288x32xbf16, #tpu.memory_space<vmem>>, vector<288x32xbf16>
    %cst = arith.constant dense<0.000000e+00> : vector<96x32xf32>
    %2 = tpu.matmul %0, %1, %cst {dimension_numbers = #tpu.dot_dimension_numbers<[1], [0], [0], [1], [0, 0, 1, 1], [], []>} : vector<96x288xbf16>, vector<288x32xbf16>, vector<96x32xf32> -> vector<96x32xf32>
    %c0_3 = arith.constant 0 : index
    %c0_4 = arith.constant 0 : index
    %3 = vector.load %arg5[%c0_3, %c0_4] : memref<1x32xf32, #tpu.memory_space<vmem>>, vector<1x32xf32>
    %4 = vector.broadcast %3 : vector<1x32xf32> to vector<96x32xf32>
    %5 = arith.addf %2, %4 : vector<96x32xf32>
    %cst_5 = arith.constant 0.000000e+00 : f32
    %6 = vector.broadcast %cst_5 : f32 to vector<96x32xf32>
    %7 = arith.maximumf %5, %6 : vector<96x32xf32>
    %8 = arith.truncf %7 : vector<96x32xf32> to vector<96x32xbf16>
    %c0_6 = arith.constant 0 : index
    %c0_7 = arith.constant 0 : index
    %9 = vector.load %arg6[%c0_6, %c0_7] : memref<96x32xbf16, #tpu.memory_space<vmem>>, vector<96x32xbf16>
    tpu.vector_store %arg6[%c0_6, %c0_7], %8 {strides = array<i32>} : memref<96x32xbf16, #tpu.memory_space<vmem>>, vector<96x32xbf16>,
    return
  }
  func.func @transform_0(%arg0: i32, %arg1: i32, %arg2: i32) -> (i32, i32) {
    %c0_i32 = arith.constant 0 : i32
    return %arg0, %arg2 : i32, i32
  }
  func.func @transform_1(%arg0: i32, %arg1: i32, %arg2: i32) -> (i32, i32) {
    %c0_i32 = arith.constant 0 : i32
    return %arg2, %arg1 : i32, i32
  }
  func.func @transform_2(%arg0: i32, %arg1: i32, %arg2: i32) -> (i32, i32) {
    %c0_i32 = arith.constant 0 : i32
    %c0_i32_0 = arith.constant 0 : i32
    return %c0_i32, %arg1 : i32, i32
  }
  func.func @transform_3(%arg0: i32, %arg1: i32, %arg2: i32) -> (i32, i32) {
    %c0_i32 = arith.constant 0 : i32
    return %arg0, %arg1 : i32, i32
  }
}

module attributes {stable_mosaic.version = 11 : i64} {
  func.func @_matmul_kernel(%arg0: i32, %arg1: i32, %arg2: i32, %arg3: memref<32x96xbf16, #tpu.memory_space<vmem>>, %arg4: memref<96x32xbf16, #tpu.memory_space<vmem>>, %arg5: memref<1x32xf32, #tpu.memory_space<vmem>>, %arg6: memref<32x32xbf16, #tpu.memory_space<vmem>>) attributes {dimension_semantics = [#tpu.dimension_semantics<parallel>, #tpu.dimension_semantics<parallel>, #tpu.dimension_semantics<arbitrary>], iteration_bounds = array<i64: 1, 1, 1>, scalar_prefetch = 0 : i64, scratch_operands = 0 : i64, tpu.core_type = #tpu.core_type<tc>, window_params = [{transform_indices = @transform_0, window_bounds = array<i64: 32, 96>}, {transform_indices = @transform_1, window_bounds = array<i64: 96, 32>}, {transform_indices = @transform_2, window_bounds = array<i64: 1, 32>}, {transform_indices = @transform_3, window_bounds = array<i64: 32, 32>}]} {
    %c0 = arith.constant 0 : index
    %c0_0 = arith.constant 0 : index
    %0 = vector.load %arg3[%c0, %c0_0] : memref<32x96xbf16, #tpu.memory_space<vmem>>, vector<32x96xbf16>
    %c0_1 = arith.constant 0 : index
    %c0_2 = arith.constant 0 : index
    %1 = vector.load %arg4[%c0_1, %c0_2] : memref<96x32xbf16, #tpu.memory_space<vmem>>, vector<96x32xbf16>
    %cst = arith.constant dense<0.000000e+00> : vector<32x32xf32>
    %2 = tpu.matmul %0, %1, %cst {dimension_numbers = #tpu.dot_dimension_numbers<[1], [0], [0], [1], [0, 0, 1, 1], [], []>} : vector<32x96xbf16>, vector<96x32xbf16>, vector<32x32xf32> -> vector<32x32xf32>
    %c0_3 = arith.constant 0 : index
    %c0_4 = arith.constant 0 : index
    %3 = vector.load %arg5[%c0_3, %c0_4] : memref<1x32xf32, #tpu.memory_space<vmem>>, vector<1x32xf32>
    %4 = vector.broadcast %3 : vector<1x32xf32> to vector<32x32xf32>
    %5 = arith.addf %2, %4 : vector<32x32xf32>
    %6 = arith.truncf %5 : vector<32x32xf32> to vector<32x32xbf16>
    %c0_5 = arith.constant 0 : index
    %c0_6 = arith.constant 0 : index
    %7 = vector.load %arg6[%c0_5, %c0_6] : memref<32x32xbf16, #tpu.memory_space<vmem>>, vector<32x32xbf16>
    tpu.vector_store %arg6[%c0_5, %c0_6], %6 {strides = array<i32>} : memref<32x32xbf16, #tpu.memory_space<vmem>>, vector<32x32xbf16>,
    return
  }
  func.func @transform_0(%arg0: i32, %arg1: i32, %arg2: i32) -> (i32, i32) {
    %c0_i32 = arith.constant 0 : i32
    return %arg0, %arg2 : i32, i32
  }
  func.func @transform_1(%arg0: i32, %arg1: i32, %arg2: i32) -> (i32, i32) {
    %c0_i32 = arith.constant 0 : i32
    return %arg2, %arg1 : i32, i32
  }
  func.func @transform_2(%arg0: i32, %arg1: i32, %arg2: i32) -> (i32, i32) {
    %c0_i32 = arith.constant 0 : i32
    %c0_i32_0 = arith.constant 0 : i32
    return %c0_i32, %arg1 : i32, i32
  }
  func.func @transform_3(%arg0: i32, %arg1: i32, %arg2: i32) -> (i32, i32) {
    %c0_i32 = arith.constant 0 : i32
    return %arg0, %arg1 : i32, i32
  }
}

module attributes {stable_mosaic.version = 11 : i64} {
  func.func @_matmul_kernel(%arg0: i32, %arg1: i32, %arg2: i32, %arg3: memref<32x32xbf16, #tpu.memory_space<vmem>>, %arg4: memref<32x128xbf16, #tpu.memory_space<vmem>>, %arg5: memref<1x128xf32, #tpu.memory_space<vmem>>, %arg6: memref<1x32xf32, #tpu.memory_space<vmem>>, %arg7: memref<1x32xf32, #tpu.memory_space<vmem>>, %arg8: memref<32x128xbf16, #tpu.memory_space<vmem>>) attributes {dimension_semantics = [#tpu.dimension_semantics<parallel>, #tpu.dimension_semantics<parallel>, #tpu.dimension_semantics<arbitrary>], iteration_bounds = array<i64: 1, 1, 1>, scalar_prefetch = 0 : i64, scratch_operands = 0 : i64, tpu.core_type = #tpu.core_type<tc>, window_params = [{transform_indices = @transform_0, window_bounds = array<i64: 32, 32>}, {transform_indices = @transform_1, window_bounds = array<i64: 32, 128>}, {transform_indices = @transform_2, window_bounds = array<i64: 1, 128>}, {transform_indices = @transform_3, window_bounds = array<i64: 1, 32>}, {transform_indices = @transform_4, window_bounds = array<i64: 1, 32>}, {transform_indices = @transform_5, window_bounds = array<i64: 32, 128>}]} {
    %c0 = arith.constant 0 : index
    %c0_0 = arith.constant 0 : index
    %0 = vector.load %arg3[%c0, %c0_0] : memref<32x32xbf16, #tpu.memory_space<vmem>>, vector<32x32xbf16>
    %1 = arith.extf %0 : vector<32x32xbf16> to vector<32x32xf32>
    %cst = arith.constant dense<0.000000e+00> : vector<32xf32>
    %2 = vector.multi_reduction <add>, %1, %cst [1] : vector<32x32xf32> to vector<32xf32>
    %3 = vector.shape_cast %2 : vector<32xf32> to vector<32x1xf32>
    %cst_1 = arith.constant 3.200000e+01 : f32
    %4 = vector.broadcast %cst_1 : f32 to vector<32x1xf32>
    %5 = arith.divf %3, %4 : vector<32x1xf32>
    %6 = vector.broadcast %5 : vector<32x1xf32> to vector<32x32xf32>
    %7 = arith.subf %1, %6 : vector<32x32xf32>
    %8 = arith.mulf %7, %7 : vector<32x32xf32>
    %cst_2 = arith.constant dense<0.000000e+00> : vector<32xf32>
    %9 = vector.multi_reduction <add>, %8, %cst_2 [1] : vector<32x32xf32> to vector<32xf32>
    %10 = vector.shape_cast %9 : vector<32xf32> to vector<32x1xf32>
    %cst_3 = arith.constant 3.200000e+01 : f32
    %11 = vector.broadcast %cst_3 : f32 to vector<32x1xf32>
    %12 = arith.divf %10, %11 : vector<32x1xf32>
    %cst_4 = arith.constant 9.99999974E-6 : f32
    %13 = vector.broadcast %cst_4 : f32 to vector<32x1xf32>
    %14 = arith.addf %12, %13 : vector<32x1xf32>
    %15 = math.rsqrt %14 : vector<32x1xf32>
    %16 = vector.broadcast %15 : vector<32x1xf32> to vector<32x32xf32>
    %17 = arith.mulf %7, %16 : vector<32x32xf32>
    %c0_5 = arith.constant 0 : index
    %c0_6 = arith.constant 0 : index
    %18 = vector.load %arg6[%c0_5, %c0_6] : memref<1x32xf32, #tpu.memory_space<vmem>>, vector<1x32xf32>
    %19 = vector.broadcast %18 : vector<1x32xf32> to vector<32x32xf32>
    %20 = arith.mulf %17, %19 : vector<32x32xf32>
    %c0_7 = arith.constant 0 : index
    %c0_8 = arith.constant 0 : index
    %21 = vector.load %arg7[%c0_7, %c0_8] : memref<1x32xf32, #tpu.memory_space<vmem>>, vector<1x32xf32>
    %22 = vector.broadcast %21 : vector<1x32xf32> to vector<32x32xf32>
    %23 = arith.addf %20, %22 : vector<32x32xf32>
    %24 = arith.truncf %23 : vector<32x32xf32> to vector<32x32xbf16>
    %c0_9 = arith.constant 0 : index
    %c0_10 = arith.constant 0 : index
    %25 = vector.load %arg4[%c0_9, %c0_10] : memref<32x128xbf16, #tpu.memory_space<vmem>>, vector<32x128xbf16>
    %cst_11 = arith.constant dense<0.000000e+00> : vector<32x128xf32>
    %26 = tpu.matmul %24, %25, %cst_11 {dimension_numbers = #tpu.dot_dimension_numbers<[1], [0], [0], [1], [0, 0, 1, 1], [], []>} : vector<32x32xbf16>, vector<32x128xbf16>, vector<32x128xf32> -> vector<32x128xf32>
    %c0_12 = arith.constant 0 : index
    %c0_13 = arith.constant 0 : index
    %27 = vector.load %arg5[%c0_12, %c0_13] : memref<1x128xf32, #tpu.memory_space<vmem>>, vector<1x128xf32>
    %28 = vector.broadcast %27 : vector<1x128xf32> to vector<32x128xf32>
    %29 = arith.addf %26, %28 : vector<32x128xf32>
    %30 = arith.negf %29 : vector<32x128xf32>
    %31 = math.exp %30 : vector<32x128xf32>
    %cst_14 = arith.constant 1.000000e+00 : f32
    %32 = vector.broadcast %cst_14 : f32 to vector<32x128xf32>
    %33 = arith.addf %32, %31 : vector<32x128xf32>
    %34 = arith.divf %32, %33 : vector<32x128xf32>
    %35 = arith.mulf %29, %34 : vector<32x128xf32>
    %36 = arith.truncf %35 : vector<32x128xf32> to vector<32x128xbf16>
    %c0_15 = arith.constant 0 : index
    %c0_16 = arith.constant 0 : index
    %37 = vector.load %arg8[%c0_15, %c0_16] : memref<32x128xbf16, #tpu.memory_space<vmem>>, vector<32x128xbf16>
    tpu.vector_store %arg8[%c0_15, %c0_16], %36 {strides = array<i32>} : memref<32x128xbf16, #tpu.memory_space<vmem>>, vector<32x128xbf16>,
    return
  }
  func.func @transform_0(%arg0: i32, %arg1: i32, %arg2: i32) -> (i32, i32) {
    %c0_i32 = arith.constant 0 : i32
    return %arg0, %arg2 : i32, i32
  }
  func.func @transform_1(%arg0: i32, %arg1: i32, %arg2: i32) -> (i32, i32) {
    %c0_i32 = arith.constant 0 : i32
    return %arg2, %arg1 : i32, i32
  }
  func.func @transform_2(%arg0: i32, %arg1: i32, %arg2: i32) -> (i32, i32) {
    %c0_i32 = arith.constant 0 : i32
    %c0_i32_0 = arith.constant 0 : i32
    return %c0_i32, %arg1 : i32, i32
  }
  func.func @transform_3(%arg0: i32, %arg1: i32, %arg2: i32) -> (i32, i32) {
    %c0_i32 = arith.constant 0 : i32
    %c0_i32_0 = arith.constant 0 : i32
    return %c0_i32, %arg2 : i32, i32
  }
  func.func @transform_4(%arg0: i32, %arg1: i32, %arg2: i32) -> (i32, i32) {
    %c0_i32 = arith.constant 0 : i32
    %c0_i32_0 = arith.constant 0 : i32
    return %c0_i32, %arg2 : i32, i32
  }
  func.func @transform_5(%arg0: i32, %arg1: i32, %arg2: i32) -> (i32, i32) {
    %c0_i32 = arith.constant 0 : i32
    return %arg0, %arg1 : i32, i32
  }
}

module attributes {stable_mosaic.version = 11 : i64} {
  func.func @_matmul_kernel(%arg0: i32, %arg1: i32, %arg2: i32, %arg3: memref<32x128xbf16, #tpu.memory_space<vmem>>, %arg4: memref<128x32xbf16, #tpu.memory_space<vmem>>, %arg5: memref<1x32xf32, #tpu.memory_space<vmem>>, %arg6: memref<32x32xbf16, #tpu.memory_space<vmem>>, %arg7: memref<32x32xbf16, #tpu.memory_space<vmem>>) attributes {dimension_semantics = [#tpu.dimension_semantics<parallel>, #tpu.dimension_semantics<parallel>, #tpu.dimension_semantics<arbitrary>], iteration_bounds = array<i64: 1, 1, 1>, scalar_prefetch = 0 : i64, scratch_operands = 0 : i64, tpu.core_type = #tpu.core_type<tc>, window_params = [{transform_indices = @transform_0, window_bounds = array<i64: 32, 128>}, {transform_indices = @transform_1, window_bounds = array<i64: 128, 32>}, {transform_indices = @transform_2, window_bounds = array<i64: 1, 32>}, {transform_indices = @transform_3, window_bounds = array<i64: 32, 32>}, {transform_indices = @transform_4, window_bounds = array<i64: 32, 32>}]} {
    %c0 = arith.constant 0 : index
    %c0_0 = arith.constant 0 : index
    %0 = vector.load %arg3[%c0, %c0_0] : memref<32x128xbf16, #tpu.memory_space<vmem>>, vector<32x128xbf16>
    %c0_1 = arith.constant 0 : index
    %c0_2 = arith.constant 0 : index
    %1 = vector.load %arg4[%c0_1, %c0_2] : memref<128x32xbf16, #tpu.memory_space<vmem>>, vector<128x32xbf16>
    %cst = arith.constant dense<0.000000e+00> : vector<32x32xf32>
    %2 = tpu.matmul %0, %1, %cst {dimension_numbers = #tpu.dot_dimension_numbers<[1], [0], [0], [1], [0, 0, 1, 1], [], []>} : vector<32x128xbf16>, vector<128x32xbf16>, vector<32x32xf32> -> vector<32x32xf32>
    %c0_3 = arith.constant 0 : index
    %c0_4 = arith.constant 0 : index
    %3 = vector.load %arg5[%c0_3, %c0_4] : memref<1x32xf32, #tpu.memory_space<vmem>>, vector<1x32xf32>
    %4 = vector.broadcast %3 : vector<1x32xf32> to vector<32x32xf32>
    %5 = arith.addf %2, %4 : vector<32x32xf32>
    %c0_5 = arith.constant 0 : index
    %c0_6 = arith.constant 0 : index
    %6 = vector.load %arg6[%c0_5, %c0_6] : memref<32x32xbf16, #tpu.memory_space<vmem>>, vector<32x32xbf16>
    %7 = arith.extf %6 : vector<32x32xbf16> to vector<32x32xf32>
    %cst_7 = arith.constant 5.000000e-01 : f32
    %8 = vector.broadcast %cst_7 : f32 to vector<32x32xf32>
    %9 = arith.mulf %8, %5 : vector<32x32xf32>
    %10 = arith.addf %7, %9 : vector<32x32xf32>
    %11 = arith.truncf %10 : vector<32x32xf32> to vector<32x32xbf16>
    %c0_8 = arith.constant 0 : index
    %c0_9 = arith.constant 0 : index
    %12 = vector.load %arg7[%c0_8, %c0_9] : memref<32x32xbf16, #tpu.memory_space<vmem>>, vector<32x32xbf16>
    tpu.vector_store %arg7[%c0_8, %c0_9], %11 {strides = array<i32>} : memref<32x32xbf16, #tpu.memory_space<vmem>>, vector<32x32xbf16>,
    return
  }
  func.func @transform_0(%arg0: i32, %arg1: i32, %arg2: i32) -> (i32, i32) {
    %c0_i32 = arith.constant 0 : i32
    return %arg0, %arg2 : i32, i32
  }
  func.func @transform_1(%arg0: i32, %arg1: i32, %arg2: i32) -> (i32, i32) {
    %c0_i32 = arith.constant 0 : i32
    return %arg2, %arg1 : i32, i32
  }
  func.func @transform_2(%arg0: i32, %arg1: i32, %arg2: i32) -> (i32, i32) {
    %c0_i32 = arith.constant 0 : i32
    %c0_i32_0 = arith.constant 0 : i32
    return %c0_i32, %arg1 : i32, i32
  }
  func.func @transform_3(%arg0: i32, %arg1: i32, %arg2: i32) -> (i32, i32) {
    %c0_i32 = arith.constant 0 : i32
    return %arg0, %arg1 : i32, i32
  }
  func.func @transform_4(%arg0: i32, %arg1: i32, %arg2: i32) -> (i32, i32) {
    %c0_i32 = arith.constant 0 : i32
    return %arg0, %arg1 : i32, i32
  }
}

module attributes {stable_mosaic.version = 11 : i64} {
  func.func @_matmul_kernel(%arg0: i32, %arg1: i32, %arg2: i32, %arg3: memref<32x32xbf16, #tpu.memory_space<vmem>>, %arg4: memref<32x96xbf16, #tpu.memory_space<vmem>>, %arg5: memref<1x96xf32, #tpu.memory_space<vmem>>, %arg6: memref<1x32xf32, #tpu.memory_space<vmem>>, %arg7: memref<1x32xf32, #tpu.memory_space<vmem>>, %arg8: memref<32x96xbf16, #tpu.memory_space<vmem>>) attributes {dimension_semantics = [#tpu.dimension_semantics<parallel>, #tpu.dimension_semantics<parallel>, #tpu.dimension_semantics<arbitrary>], iteration_bounds = array<i64: 1, 1, 1>, scalar_prefetch = 0 : i64, scratch_operands = 0 : i64, tpu.core_type = #tpu.core_type<tc>, window_params = [{transform_indices = @transform_0, window_bounds = array<i64: 32, 32>}, {transform_indices = @transform_1, window_bounds = array<i64: 32, 96>}, {transform_indices = @transform_2, window_bounds = array<i64: 1, 96>}, {transform_indices = @transform_3, window_bounds = array<i64: 1, 32>}, {transform_indices = @transform_4, window_bounds = array<i64: 1, 32>}, {transform_indices = @transform_5, window_bounds = array<i64: 32, 96>}]} {
    %c0 = arith.constant 0 : index
    %c0_0 = arith.constant 0 : index
    %0 = vector.load %arg3[%c0, %c0_0] : memref<32x32xbf16, #tpu.memory_space<vmem>>, vector<32x32xbf16>
    %1 = arith.extf %0 : vector<32x32xbf16> to vector<32x32xf32>
    %cst = arith.constant dense<0.000000e+00> : vector<32xf32>
    %2 = vector.multi_reduction <add>, %1, %cst [1] : vector<32x32xf32> to vector<32xf32>
    %3 = vector.shape_cast %2 : vector<32xf32> to vector<32x1xf32>
    %cst_1 = arith.constant 3.200000e+01 : f32
    %4 = vector.broadcast %cst_1 : f32 to vector<32x1xf32>
    %5 = arith.divf %3, %4 : vector<32x1xf32>
    %6 = vector.broadcast %5 : vector<32x1xf32> to vector<32x32xf32>
    %7 = arith.subf %1, %6 : vector<32x32xf32>
    %8 = arith.mulf %7, %7 : vector<32x32xf32>
    %cst_2 = arith.constant dense<0.000000e+00> : vector<32xf32>
    %9 = vector.multi_reduction <add>, %8, %cst_2 [1] : vector<32x32xf32> to vector<32xf32>
    %10 = vector.shape_cast %9 : vector<32xf32> to vector<32x1xf32>
    %cst_3 = arith.constant 3.200000e+01 : f32
    %11 = vector.broadcast %cst_3 : f32 to vector<32x1xf32>
    %12 = arith.divf %10, %11 : vector<32x1xf32>
    %cst_4 = arith.constant 9.99999974E-6 : f32
    %13 = vector.broadcast %cst_4 : f32 to vector<32x1xf32>
    %14 = arith.addf %12, %13 : vector<32x1xf32>
    %15 = math.rsqrt %14 : vector<32x1xf32>
    %16 = vector.broadcast %15 : vector<32x1xf32> to vector<32x32xf32>
    %17 = arith.mulf %7, %16 : vector<32x32xf32>
    %c0_5 = arith.constant 0 : index
    %c0_6 = arith.constant 0 : index
    %18 = vector.load %arg6[%c0_5, %c0_6] : memref<1x32xf32, #tpu.memory_space<vmem>>, vector<1x32xf32>
    %19 = vector.broadcast %18 : vector<1x32xf32> to vector<32x32xf32>
    %20 = arith.mulf %17, %19 : vector<32x32xf32>
    %c0_7 = arith.constant 0 : index
    %c0_8 = arith.constant 0 : index
    %21 = vector.load %arg7[%c0_7, %c0_8] : memref<1x32xf32, #tpu.memory_space<vmem>>, vector<1x32xf32>
    %22 = vector.broadcast %21 : vector<1x32xf32> to vector<32x32xf32>
    %23 = arith.addf %20, %22 : vector<32x32xf32>
    %24 = arith.truncf %23 : vector<32x32xf32> to vector<32x32xbf16>
    %c0_9 = arith.constant 0 : index
    %c0_10 = arith.constant 0 : index
    %25 = vector.load %arg4[%c0_9, %c0_10] : memref<32x96xbf16, #tpu.memory_space<vmem>>, vector<32x96xbf16>
    %cst_11 = arith.constant dense<0.000000e+00> : vector<32x96xf32>
    %26 = tpu.matmul %24, %25, %cst_11 {dimension_numbers = #tpu.dot_dimension_numbers<[1], [0], [0], [1], [0, 0, 1, 1], [], []>} : vector<32x32xbf16>, vector<32x96xbf16>, vector<32x96xf32> -> vector<32x96xf32>
    %c0_12 = arith.constant 0 : index
    %c0_13 = arith.constant 0 : index
    %27 = vector.load %arg5[%c0_12, %c0_13] : memref<1x96xf32, #tpu.memory_space<vmem>>, vector<1x96xf32>
    %28 = vector.broadcast %27 : vector<1x96xf32> to vector<32x96xf32>
    %29 = arith.addf %26, %28 : vector<32x96xf32>
    %30 = arith.truncf %29 : vector<32x96xf32> to vector<32x96xbf16>
    %c0_14 = arith.constant 0 : index
    %c0_15 = arith.constant 0 : index
    %31 = vector.load %arg8[%c0_14, %c0_15] : memref<32x96xbf16, #tpu.memory_space<vmem>>, vector<32x96xbf16>
    tpu.vector_store %arg8[%c0_14, %c0_15], %30 {strides = array<i32>} : memref<32x96xbf16, #tpu.memory_space<vmem>>, vector<32x96xbf16>,
    return
  }
  func.func @transform_0(%arg0: i32, %arg1: i32, %arg2: i32) -> (i32, i32) {
    %c0_i32 = arith.constant 0 : i32
    return %arg0, %arg2 : i32, i32
  }
  func.func @transform_1(%arg0: i32, %arg1: i32, %arg2: i32) -> (i32, i32) {
    %c0_i32 = arith.constant 0 : i32
    return %arg2, %arg1 : i32, i32
  }
  func.func @transform_2(%arg0: i32, %arg1: i32, %arg2: i32) -> (i32, i32) {
    %c0_i32 = arith.constant 0 : i32
    %c0_i32_0 = arith.constant 0 : i32
    return %c0_i32, %arg1 : i32, i32
  }
  func.func @transform_3(%arg0: i32, %arg1: i32, %arg2: i32) -> (i32, i32) {
    %c0_i32 = arith.constant 0 : i32
    %c0_i32_0 = arith.constant 0 : i32
    return %c0_i32, %arg2 : i32, i32
  }
  func.func @transform_4(%arg0: i32, %arg1: i32, %arg2: i32) -> (i32, i32) {
    %c0_i32 = arith.constant 0 : i32
    %c0_i32_0 = arith.constant 0 : i32
    return %c0_i32, %arg2 : i32, i32
  }
  func.func @transform_5(%arg0: i32, %arg1: i32, %arg2: i32) -> (i32, i32) {
    %c0_i32 = arith.constant 0 : i32
    return %arg0, %arg1 : i32, i32
  }
}

module attributes {stable_mosaic.version = 11 : i64} {
  func.func @_matmul_kernel(%arg0: i32, %arg1: i32, %arg2: i32, %arg3: memref<16x32xf32, #tpu.memory_space<vmem>>, %arg4: memref<32x32xbf16, #tpu.memory_space<vmem>>, %arg5: memref<1x32xf32, #tpu.memory_space<vmem>>, %arg6: memref<16x32xbf16, #tpu.memory_space<vmem>>) attributes {dimension_semantics = [#tpu.dimension_semantics<parallel>, #tpu.dimension_semantics<parallel>, #tpu.dimension_semantics<arbitrary>], iteration_bounds = array<i64: 1, 1, 1>, scalar_prefetch = 0 : i64, scratch_operands = 0 : i64, tpu.core_type = #tpu.core_type<tc>, window_params = [{transform_indices = @transform_0, window_bounds = array<i64: 16, 32>}, {transform_indices = @transform_1, window_bounds = array<i64: 32, 32>}, {transform_indices = @transform_2, window_bounds = array<i64: 1, 32>}, {transform_indices = @transform_3, window_bounds = array<i64: 16, 32>}]} {
    %c0 = arith.constant 0 : index
    %c0_0 = arith.constant 0 : index
    %0 = vector.load %arg3[%c0, %c0_0] : memref<16x32xf32, #tpu.memory_space<vmem>>, vector<16x32xf32>
    %1 = arith.truncf %0 : vector<16x32xf32> to vector<16x32xbf16>
    %c0_1 = arith.constant 0 : index
    %c0_2 = arith.constant 0 : index
    %2 = vector.load %arg4[%c0_1, %c0_2] : memref<32x32xbf16, #tpu.memory_space<vmem>>, vector<32x32xbf16>
    %cst = arith.constant dense<0.000000e+00> : vector<16x32xf32>
    %3 = tpu.matmul %1, %2, %cst {dimension_numbers = #tpu.dot_dimension_numbers<[1], [0], [0], [1], [0, 0, 1, 1], [], []>} : vector<16x32xbf16>, vector<32x32xbf16>, vector<16x32xf32> -> vector<16x32xf32>
    %c0_3 = arith.constant 0 : index
    %c0_4 = arith.constant 0 : index
    %4 = vector.load %arg5[%c0_3, %c0_4] : memref<1x32xf32, #tpu.memory_space<vmem>>, vector<1x32xf32>
    %5 = vector.broadcast %4 : vector<1x32xf32> to vector<16x32xf32>
    %6 = arith.addf %3, %5 : vector<16x32xf32>
    %7 = arith.truncf %6 : vector<16x32xf32> to vector<16x32xbf16>
    %c0_5 = arith.constant 0 : index
    %c0_6 = arith.constant 0 : index
    %8 = vector.load %arg6[%c0_5, %c0_6] : memref<16x32xbf16, #tpu.memory_space<vmem>>, vector<16x32xbf16>
    tpu.vector_store %arg6[%c0_5, %c0_6], %7 {strides = array<i32>} : memref<16x32xbf16, #tpu.memory_space<vmem>>, vector<16x32xbf16>,
    return
  }
  func.func @transform_0(%arg0: i32, %arg1: i32, %arg2: i32) -> (i32, i32) {
    %c0_i32 = arith.constant 0 : i32
    return %arg0, %arg2 : i32, i32
  }
  func.func @transform_1(%arg0: i32, %arg1: i32, %arg2: i32) -> (i32, i32) {
    %c0_i32 = arith.constant 0 : i32
    return %arg2, %arg1 : i32, i32
  }
  func.func @transform_2(%arg0: i32, %arg1: i32, %arg2: i32) -> (i32, i32) {
    %c0_i32 = arith.constant 0 : i32
    %c0_i32_0 = arith.constant 0 : i32
    return %c0_i32, %arg1 : i32, i32
  }
  func.func @transform_3(%arg0: i32, %arg1: i32, %arg2: i32) -> (i32, i32) {
    %c0_i32 = arith.constant 0 : i32
    return %arg0, %arg1 : i32, i32
  }
}

module attributes {stable_mosaic.version = 11 : i64} {
  func.func @_mhsa_kernel(%arg0: i32, %arg1: i32, %arg2: memref<1x1x16x8xbf16, #tpu.memory_space<vmem>>, %arg3: memref<1x1x16x8xbf16, #tpu.memory_space<vmem>>, %arg4: memref<1x1x16x8xbf16, #tpu.memory_space<vmem>>, %arg5: memref<1x1x16x8xbf16, #tpu.memory_space<vmem>>, %arg6: memref<1x16x8xbf16, #tpu.memory_space<vmem>>, %arg7: memref<1x1x16x8xbf16, #tpu.memory_space<vmem>>) attributes {dimension_semantics = [#tpu.dimension_semantics<parallel>, #tpu.dimension_semantics<parallel>], iteration_bounds = array<i64: 2, 4>, scalar_prefetch = 0 : i64, scratch_operands = 0 : i64, tpu.core_type = #tpu.core_type<tc>, window_params = [{transform_indices = @transform_0, window_bounds = array<i64: 1, 1, 16, 8>}, {transform_indices = @transform_1, window_bounds = array<i64: 1, 1, 16, 8>}, {transform_indices = @transform_2, window_bounds = array<i64: 1, 1, 16, 8>}, {transform_indices = @transform_3, window_bounds = array<i64: 1, 1, 16, 8>}, {transform_indices = @transform_4, window_bounds = array<i64: 1, 16, 8>}, {transform_indices = @transform_5, window_bounds = array<i64: 1, 1, 16, 8>}]} {
    %c0 = arith.constant 0 : index
    %c0_0 = arith.constant 0 : index
    %c0_1 = arith.constant 0 : index
    %c0_2 = arith.constant 0 : index
    %0 = vector.load %arg2[%c0, %c0_0, %c0_1, %c0_2] : memref<1x1x16x8xbf16, #tpu.memory_space<vmem>>, vector<1x1x16x8xbf16>
    %1 = vector.shape_cast %0 : vector<1x1x16x8xbf16> to vector<16x8xbf16>
    %c0_3 = arith.constant 0 : index
    %c0_4 = arith.constant 0 : index
    %c0_5 = arith.constant 0 : index
    %c0_6 = arith.constant 0 : index
    %2 = vector.load %arg3[%c0_3, %c0_4, %c0_5, %c0_6] : memref<1x1x16x8xbf16, #tpu.memory_space<vmem>>, vector<1x1x16x8xbf16>
    %3 = vector.shape_cast %2 : vector<1x1x16x8xbf16> to vector<16x8xbf16>
    %c0_7 = arith.constant 0 : index
    %c0_8 = arith.constant 0 : index
    %c0_9 = arith.constant 0 : index
    %c0_10 = arith.constant 0 : index
    %4 = vector.load %arg4[%c0_7, %c0_8, %c0_9, %c0_10] : memref<1x1x16x8xbf16, #tpu.memory_space<vmem>>, vector<1x1x16x8xbf16>
    %5 = vector.shape_cast %4 : vector<1x1x16x8xbf16> to vector<16x8xbf16>
    %c0_11 = arith.constant 0 : index
    %c0_12 = arith.constant 0 : index
    %c0_13 = arith.constant 0 : index
    %c0_14 = arith.constant 0 : index
    %6 = vector.load %arg5[%c0_11, %c0_12, %c0_13, %c0_14] : memref<1x1x16x8xbf16, #tpu.memory_space<vmem>>, vector<1x1x16x8xbf16>
    %7 = vector.shape_cast %6 : vector<1x1x16x8xbf16> to vector<16x8xbf16>
    %c0_15 = arith.constant 0 : index
    %c0_16 = arith.constant 0 : index
    %c0_17 = arith.constant 0 : index
    %8 = vector.load %arg6[%c0_15, %c0_16, %c0_17] : memref<1x16x8xbf16, #tpu.memory_space<vmem>>, vector<1x16x8xbf16>
    %9 = vector.shape_cast %8 : vector<1x16x8xbf16> to vector<16x8xbf16>
    %cst = arith.constant dense<0.000000e+00> : vector<16x16xf32>
    %10 = tpu.matmul %1, %5, %cst {dimension_numbers = #tpu.dot_dimension_numbers<[1], [1], [0], [0], [0, 0, 1, 0], [], []>} : vector<16x8xbf16>, vector<16x8xbf16>, vector<16x16xf32> -> vector<16x16xf32>
    %cst_18 = arith.constant dense<0.000000e+00> : vector<16x16xf32>
    %11 = tpu.matmul %3, %9, %cst_18 {dimension_numbers = #tpu.dot_dimension_numbers<[1], [1], [0], [0], [0, 0, 1, 0], [], []>} : vector<16x8xbf16>, vector<16x8xbf16>, vector<16x16xf32> -> vector<16x16xf32>
    %12 = tpu.iota {dimensions = array<i32: 0>} : vector<16x16xi32>
    %13 = tpu.iota {dimensions = array<i32: 1>} : vector<16x16xi32>
    %c1_i32 = arith.constant 1 : i32
    %14 = vector.broadcast %c1_i32 : i32 to vector<16x16xi32>
    %15 = arith.andi %12, %14 : vector<16x16xi32>
    %c0_i32 = arith.constant 0 : i32
    %16 = vector.broadcast %c0_i32 : i32 to vector<16x16xi32>
    %17 = arith.cmpi ne, %15, %16 : vector<16x16xi32>
    %18 = vector.extract_strided_slice %11 {offsets = [0, 15], sizes = [16, 1], strides = [1, 1]} : vector<16x16xf32> to vector<16x1xf32>
    %19 = vector.extract_strided_slice %11 {offsets = [0, 0], sizes = [16, 15], strides = [1, 1]} : vector<16x16xf32> to vector<16x15xf32>
    %20 = tpu.concatenate %18, %19 in 1 : vector<16x1xf32>, vector<16x15xf32> -> vector<16x16xf32>
    %21 = arith.select %17, %20, %11 : vector<16x16xi1>, vector<16x16xf32>
    %c2_i32 = arith.constant 2 : i32
    %22 = vector.broadcast %c2_i32 : i32 to vector<16x16xi32>
    %23 = arith.andi %12, %22 : vector<16x16xi32>
    %c0_i32_19 = arith.constant 0 : i32
    %24 = vector.broadcast %c0_i32_19 : i32 to vector<16x16xi32>
    %25 = arith.cmpi ne, %23, %24 : vector<16x16xi32>
    %26 = vector.extract_strided_slice %21 {offsets = [0, 14], sizes = [16, 2], strides = [1, 1]} : vector<16x16xf32> to vector<16x2xf32>
    %27 = vector.extract_strided_slice %21 {offsets = [0, 0], sizes = [16, 14], strides = [1, 1]} : vector<16x16xf32> to vector<16x14xf32>
    %28 = tpu.concatenate %26, %27 in 1 : vector<16x2xf32>, vector<16x14xf32> -> vector<16x16xf32>
    %29 = arith.select %25, %28, %21 : vector<16x16xi1>, vector<16x16xf32>
    %c4_i32 = arith.constant 4 : i32
    %30 = vector.broadcast %c4_i32 : i32 to vector<16x16xi32>
    %31 = arith.andi %12, %30 : vector<16x16xi32>
    %c0_i32_20 = arith.constant 0 : i32
    %32 = vector.broadcast %c0_i32_20 : i32 to vector<16x16xi32>
    %33 = arith.cmpi ne, %31, %32 : vector<16x16xi32>
    %34 = vector.extract_strided_slice %29 {offsets = [0, 12], sizes = [16, 4], strides = [1, 1]} : vector<16x16xf32> to vector<16x4xf32>
    %35 = vector.extract_strided_slice %29 {offsets = [0, 0], sizes = [16, 12], strides = [1, 1]} : vector<16x16xf32> to vector<16x12xf32>
    %36 = tpu.concatenate %34, %35 in 1 : vector<16x4xf32>, vector<16x12xf32> -> vector<16x16xf32>
    %37 = arith.select %33, %36, %29 : vector<16x16xi1>, vector<16x16xf32>
    %c8_i32 = arith.constant 8 : i32
    %38 = vector.broadcast %c8_i32 : i32 to vector<16x16xi32>
    %39 = arith.andi %12, %38 : vector<16x16xi32>
    %c0_i32_21 = arith.constant 0 : i32
    %40 = vector.broadcast %c0_i32_21 : i32 to vector<16x16xi32>
    %41 = arith.cmpi ne, %39, %40 : vector<16x16xi32>
    %42 = vector.extract_strided_slice %37 {offsets = [0, 8], sizes = [16, 8], strides = [1, 1]} : vector<16x16xf32> to vector<16x8xf32>
    %43 = vector.extract_strided_slice %37 {offsets = [0, 0], sizes = [16, 8], strides = [1, 1]} : vector<16x16xf32> to vector<16x8xf32>
    %44 = tpu.concatenate %42, %43 in 1 : vector<16x8xf32>, vector<16x8xf32> -> vector<16x16xf32>
    %45 = arith.select %41, %44, %37 : vector<16x16xi1>, vector<16x16xf32>
    %46 = vector.extract_strided_slice %45 {offsets = [0, 15], sizes = [16, 1], strides = [1, 1]} : vector<16x16xf32> to vector<16x1xf32>
    %47 = vector.extract_strided_slice %45 {offsets = [0, 0], sizes = [16, 15], strides = [1, 1]} : vector<16x16xf32> to vector<16x15xf32>
    %48 = tpu.concatenate %46, %47 in 1 : vector<16x1xf32>, vector<16x15xf32> -> vector<16x16xf32>
    %49 = vector.extract_strided_slice %48 {offsets = [1, 0], sizes = [15, 16], strides = [1, 1]} : vector<16x16xf32> to vector<15x16xf32>
    %50 = vector.extract_strided_slice %48 {offsets = [0, 0], sizes = [1, 16], strides = [1, 1]} : vector<16x16xf32> to vector<1x16xf32>
    %51 = tpu.concatenate %49, %50 in 0 : vector<15x16xf32>, vector<1x16xf32> -> vector<16x16xf32>
    %52 = arith.cmpi sle, %13, %12 : vector<16x16xi32>
    %c1_i32_22 = arith.constant 1 : i32
    %53 = vector.broadcast %c1_i32_22 : i32 to vector<16x16xi32>
    %54 = arith.addi %12, %53 : vector<16x16xi32>
    %55 = arith.cmpi eq, %13, %54 : vector<16x16xi32>
    %cst_23 = arith.constant 0.000000e+00 : f32
    %56 = vector.broadcast %cst_23 : f32 to vector<16x16xf32>
    %57 = arith.select %55, %56, %51 : vector<16x16xi1>, vector<16x16xf32>
    %58 = arith.select %52, %48, %57 : vector<16x16xi1>, vector<16x16xf32>
    %59 = arith.addf %10, %58 : vector<16x16xf32>
    %cst_24 = arith.constant 0.176776692 : f32
    %60 = vector.broadcast %cst_24 : f32 to vector<16x16xf32>
    %61 = arith.mulf %59, %60 : vector<16x16xf32>
    %cst_25 = arith.constant dense<0xFF800000> : vector<16xf32>
    %62 = vector.multi_reduction <maximumf>, %61, %cst_25 [1] : vector<16x16xf32> to vector<16xf32>
    %63 = vector.shape_cast %62 : vector<16xf32> to vector<16x1xf32>
    %64 = vector.broadcast %63 : vector<16x1xf32> to vector<16x16xf32>
    %65 = arith.subf %61, %64 : vector<16x16xf32>
    %66 = math.exp %65 : vector<16x16xf32>
    %cst_26 = arith.constant dense<0.000000e+00> : vector<16xf32>
    %67 = vector.multi_reduction <add>, %66, %cst_26 [1] : vector<16x16xf32> to vector<16xf32>
    %68 = vector.shape_cast %67 : vector<16xf32> to vector<16x1xf32>
    %69 = tpu.reciprocal %68 {approx = true} : vector<16x1xf32> -> vector<16x1xf32>
    %70 = vector.broadcast %69 : vector<16x1xf32> to vector<16x16xf32>
    %71 = arith.mulf %66, %70 : vector<16x16xf32>
    %72 = arith.truncf %71 : vector<16x16xf32> to vector<16x16xbf16>
    %cst_27 = arith.constant dense<0.000000e+00> : vector<16x8xf32>
    %73 = tpu.matmul %72, %7, %cst_27 {dimension_numbers = #tpu.dot_dimension_numbers<[1], [0], [0], [1], [0, 0, 1, 1], [], []>} : vector<16x16xbf16>, vector<16x8xbf16>, vector<16x8xf32> -> vector<16x8xf32>
    %74 = arith.truncf %73 : vector<16x8xf32> to vector<16x8xbf16>
    %c0_28 = arith.constant 0 : index
    %c0_29 = arith.constant 0 : index
    %c0_30 = arith.constant 0 : index
    %c0_31 = arith.constant 0 : index
    %75 = vector.load %arg7[%c0_28, %c0_29, %c0_30, %c0_31] : memref<1x1x16x8xbf16, #tpu.memory_space<vmem>>, vector<1x1x16x8xbf16>
    %76 = vector.shape_cast %75 : vector<1x1x16x8xbf16> to vector<16x8xbf16>
    %77 = vector.shape_cast %74 : vector<16x8xbf16> to vector<1x1x16x8xbf16>
    tpu.vector_store %arg7[%c0_28, %c0_29, %c0_30, %c0_31], %77 {strides = array<i32>} : memref<1x1x16x8xbf16, #tpu.memory_space<vmem>>, vector<1x1x16x8xbf16>,
    return
  }
  func.func @transform_0(%arg0: i32, %arg1: i32) -> (i32, i32, i32, i32) {
    %c0_i32 = arith.constant 0 : i32
    %c0_i32_0 = arith.constant 0 : i32
    %c0_i32_1 = arith.constant 0 : i32
    return %arg0, %arg1, %c0_i32, %c0_i32_0 : i32, i32, i32, i32
  }
  func.func @transform_1(%arg0: i32, %arg1: i32) -> (i32, i32, i32, i32) {
    %c0_i32 = arith.constant 0 : i32
    %c0_i32_0 = arith.constant 0 : i32
    %c0_i32_1 = arith.constant 0 : i32
    return %arg0, %arg1, %c0_i32, %c0_i32_0 : i32, i32, i32, i32
  }
  func.func @transform_2(%arg0: i32, %arg1: i32) -> (i32, i32, i32, i32) {
    %c0_i32 = arith.constant 0 : i32
    %c0_i32_0 = arith.constant 0 : i32
    %c0_i32_1 = arith.constant 0 : i32
    return %arg0, %arg1, %c0_i32, %c0_i32_0 : i32, i32, i32, i32
  }
  func.func @transform_3(%arg0: i32, %arg1: i32) -> (i32, i32, i32, i32) {
    %c0_i32 = arith.constant 0 : i32
    %c0_i32_0 = arith.constant 0 : i32
    %c0_i32_1 = arith.constant 0 : i32
    return %arg0, %arg1, %c0_i32, %c0_i32_0 : i32, i32, i32, i32
  }
  func.func @transform_4(%arg0: i32, %arg1: i32) -> (i32, i32, i32) {
    %c0_i32 = arith.constant 0 : i32
    %c0_i32_0 = arith.constant 0 : i32
    %c0_i32_1 = arith.constant 0 : i32
    return %arg1, %c0_i32, %c0_i32_0 : i32, i32, i32
  }
  func.func @transform_5(%arg0: i32, %arg1: i32) -> (i32, i32, i32, i32) {
    %c0_i32 = arith.constant 0 : i32
    %c0_i32_0 = arith.constant 0 : i32
    %c0_i32_1 = arith.constant 0 : i32
    return %arg0, %arg1, %c0_i32, %c0_i32_0 : i32, i32, i32, i32
  }
}

module attributes {stable_mosaic.version = 11 : i64} {
  func.func @_matmul_kernel(%arg0: i32, %arg1: i32, %arg2: i32, %arg3: memref<32x32xbf16, #tpu.memory_space<vmem>>, %arg4: memref<32x32xbf16, #tpu.memory_space<vmem>>, %arg5: memref<1x32xf32, #tpu.memory_space<vmem>>, %arg6: memref<32x32xbf16, #tpu.memory_space<vmem>>, %arg7: memref<32x32xbf16, #tpu.memory_space<vmem>>) attributes {dimension_semantics = [#tpu.dimension_semantics<parallel>, #tpu.dimension_semantics<parallel>, #tpu.dimension_semantics<arbitrary>], iteration_bounds = array<i64: 1, 1, 1>, scalar_prefetch = 0 : i64, scratch_operands = 0 : i64, tpu.core_type = #tpu.core_type<tc>, window_params = [{transform_indices = @transform_0, window_bounds = array<i64: 32, 32>}, {transform_indices = @transform_1, window_bounds = array<i64: 32, 32>}, {transform_indices = @transform_2, window_bounds = array<i64: 1, 32>}, {transform_indices = @transform_3, window_bounds = array<i64: 32, 32>}, {transform_indices = @transform_4, window_bounds = array<i64: 32, 32>}]} {
    %c0 = arith.constant 0 : index
    %c0_0 = arith.constant 0 : index
    %0 = vector.load %arg3[%c0, %c0_0] : memref<32x32xbf16, #tpu.memory_space<vmem>>, vector<32x32xbf16>
    %c0_1 = arith.constant 0 : index
    %c0_2 = arith.constant 0 : index
    %1 = vector.load %arg4[%c0_1, %c0_2] : memref<32x32xbf16, #tpu.memory_space<vmem>>, vector<32x32xbf16>
    %cst = arith.constant dense<0.000000e+00> : vector<32x32xf32>
    %2 = tpu.matmul %0, %1, %cst {dimension_numbers = #tpu.dot_dimension_numbers<[1], [0], [0], [1], [0, 0, 1, 1], [], []>} : vector<32x32xbf16>, vector<32x32xbf16>, vector<32x32xf32> -> vector<32x32xf32>
    %c0_3 = arith.constant 0 : index
    %c0_4 = arith.constant 0 : index
    %3 = vector.load %arg5[%c0_3, %c0_4] : memref<1x32xf32, #tpu.memory_space<vmem>>, vector<1x32xf32>
    %4 = vector.broadcast %3 : vector<1x32xf32> to vector<32x32xf32>
    %5 = arith.addf %2, %4 : vector<32x32xf32>
    %c0_5 = arith.constant 0 : index
    %c0_6 = arith.constant 0 : index
    %6 = vector.load %arg6[%c0_5, %c0_6] : memref<32x32xbf16, #tpu.memory_space<vmem>>, vector<32x32xbf16>
    %7 = arith.extf %6 : vector<32x32xbf16> to vector<32x32xf32>
    %cst_7 = arith.constant 1.000000e+00 : f32
    %8 = vector.broadcast %cst_7 : f32 to vector<32x32xf32>
    %9 = arith.mulf %8, %5 : vector<32x32xf32>
    %10 = arith.addf %7, %9 : vector<32x32xf32>
    %11 = arith.truncf %10 : vector<32x32xf32> to vector<32x32xbf16>
    %c0_8 = arith.constant 0 : index
    %c0_9 = arith.constant 0 : index
    %12 = vector.load %arg7[%c0_8, %c0_9] : memref<32x32xbf16, #tpu.memory_space<vmem>>, vector<32x32xbf16>
    tpu.vector_store %arg7[%c0_8, %c0_9], %11 {strides = array<i32>} : memref<32x32xbf16, #tpu.memory_space<vmem>>, vector<32x32xbf16>,
    return
  }
  func.func @transform_0(%arg0: i32, %arg1: i32, %arg2: i32) -> (i32, i32) {
    %c0_i32 = arith.constant 0 : i32
    return %arg0, %arg2 : i32, i32
  }
  func.func @transform_1(%arg0: i32, %arg1: i32, %arg2: i32) -> (i32, i32) {
    %c0_i32 = arith.constant 0 : i32
    return %arg2, %arg1 : i32, i32
  }
  func.func @transform_2(%arg0: i32, %arg1: i32, %arg2: i32) -> (i32, i32) {
    %c0_i32 = arith.constant 0 : i32
    %c0_i32_0 = arith.constant 0 : i32
    return %c0_i32, %arg1 : i32, i32
  }
  func.func @transform_3(%arg0: i32, %arg1: i32, %arg2: i32) -> (i32, i32) {
    %c0_i32 = arith.constant 0 : i32
    return %arg0, %arg1 : i32, i32
  }
  func.func @transform_4(%arg0: i32, %arg1: i32, %arg2: i32) -> (i32, i32) {
    %c0_i32 = arith.constant 0 : i32
    return %arg0, %arg1 : i32, i32
  }
}

module attributes {stable_mosaic.version = 11 : i64} {
  func.func @_ln_glu_kernel(%arg0: i32, %arg1: memref<32x32xbf16, #tpu.memory_space<vmem>>, %arg2: memref<32x64xbf16, #tpu.memory_space<vmem>>, %arg3: memref<1x64xf32, #tpu.memory_space<vmem>>, %arg4: memref<1x32xf32, #tpu.memory_space<vmem>>, %arg5: memref<1x32xf32, #tpu.memory_space<vmem>>, %arg6: memref<32x32xbf16, #tpu.memory_space<vmem>>) attributes {dimension_semantics = [#tpu.dimension_semantics<parallel>], iteration_bounds = array<i64: 1>, scalar_prefetch = 0 : i64, scratch_operands = 0 : i64, tpu.core_type = #tpu.core_type<tc>, window_params = [{transform_indices = @transform_0, window_bounds = array<i64: 32, 32>}, {pipeline_mode = #tpu.pipeline_mode<synchronous>, transform_indices = @transform_1, window_bounds = array<i64: 32, 64>}, {pipeline_mode = #tpu.pipeline_mode<synchronous>, transform_indices = @transform_2, window_bounds = array<i64: 1, 64>}, {pipeline_mode = #tpu.pipeline_mode<synchronous>, transform_indices = @transform_3, window_bounds = array<i64: 1, 32>}, {pipeline_mode = #tpu.pipeline_mode<synchronous>, transform_indices = @transform_4, window_bounds = array<i64: 1, 32>}, {transform_indices = @transform_5, window_bounds = array<i64: 32, 32>}]} {
    %c0 = arith.constant 0 : index
    %c0_0 = arith.constant 0 : index
    %0 = vector.load %arg1[%c0, %c0_0] : memref<32x32xbf16, #tpu.memory_space<vmem>>, vector<32x32xbf16>
    %1 = arith.extf %0 : vector<32x32xbf16> to vector<32x32xf32>
    %cst = arith.constant dense<0.000000e+00> : vector<32xf32>
    %2 = vector.multi_reduction <add>, %1, %cst [1] : vector<32x32xf32> to vector<32xf32>
    %3 = vector.shape_cast %2 : vector<32xf32> to vector<32x1xf32>
    %cst_1 = arith.constant 3.200000e+01 : f32
    %4 = vector.broadcast %cst_1 : f32 to vector<32x1xf32>
    %5 = arith.divf %3, %4 : vector<32x1xf32>
    %6 = vector.broadcast %5 : vector<32x1xf32> to vector<32x32xf32>
    %7 = arith.subf %1, %6 : vector<32x32xf32>
    %8 = arith.mulf %7, %7 : vector<32x32xf32>
    %cst_2 = arith.constant dense<0.000000e+00> : vector<32xf32>
    %9 = vector.multi_reduction <add>, %8, %cst_2 [1] : vector<32x32xf32> to vector<32xf32>
    %10 = vector.shape_cast %9 : vector<32xf32> to vector<32x1xf32>
    %cst_3 = arith.constant 3.200000e+01 : f32
    %11 = vector.broadcast %cst_3 : f32 to vector<32x1xf32>
    %12 = arith.divf %10, %11 : vector<32x1xf32>
    %cst_4 = arith.constant 9.99999974E-6 : f32
    %13 = vector.broadcast %cst_4 : f32 to vector<32x1xf32>
    %14 = arith.addf %12, %13 : vector<32x1xf32>
    %15 = math.rsqrt %14 : vector<32x1xf32>
    %16 = vector.broadcast %15 : vector<32x1xf32> to vector<32x32xf32>
    %17 = arith.mulf %7, %16 : vector<32x32xf32>
    %c0_5 = arith.constant 0 : index
    %c0_6 = arith.constant 0 : index
    %18 = vector.load %arg4[%c0_5, %c0_6] : memref<1x32xf32, #tpu.memory_space<vmem>>, vector<1x32xf32>
    %19 = vector.broadcast %18 : vector<1x32xf32> to vector<32x32xf32>
    %20 = arith.mulf %17, %19 : vector<32x32xf32>
    %c0_7 = arith.constant 0 : index
    %c0_8 = arith.constant 0 : index
    %21 = vector.load %arg5[%c0_7, %c0_8] : memref<1x32xf32, #tpu.memory_space<vmem>>, vector<1x32xf32>
    %22 = vector.broadcast %21 : vector<1x32xf32> to vector<32x32xf32>
    %23 = arith.addf %20, %22 : vector<32x32xf32>
    %24 = arith.truncf %23 : vector<32x32xf32> to vector<32x32xbf16>
    %c0_9 = arith.constant 0 : index
    %c0_10 = arith.constant 0 : index
    %25 = vector.load %arg2[%c0_9, %c0_10] : memref<32x64xbf16, #tpu.memory_space<vmem>>, vector<32x64xbf16>
    %cst_11 = arith.constant dense<0.000000e+00> : vector<32x64xf32>
    %26 = tpu.matmul %24, %25, %cst_11 {dimension_numbers = #tpu.dot_dimension_numbers<[1], [0], [0], [1], [0, 0, 1, 1], [], []>} : vector<32x32xbf16>, vector<32x64xbf16>, vector<32x64xf32> -> vector<32x64xf32>
    %c0_12 = arith.constant 0 : index
    %c0_13 = arith.constant 0 : index
    %27 = vector.load %arg3[%c0_12, %c0_13] : memref<1x64xf32, #tpu.memory_space<vmem>>, vector<1x64xf32>
    %28 = vector.broadcast %27 : vector<1x64xf32> to vector<32x64xf32>
    %29 = arith.addf %26, %28 : vector<32x64xf32>
    %30 = vector.extract_strided_slice %29 {offsets = [0, 0], sizes = [32, 32], strides = [1, 1]} : vector<32x64xf32> to vector<32x32xf32>
    %31 = vector.extract_strided_slice %29 {offsets = [0, 32], sizes = [32, 32], strides = [1, 1]} : vector<32x64xf32> to vector<32x32xf32>
    %32 = arith.negf %31 : vector<32x32xf32>
    %33 = math.exp %32 : vector<32x32xf32>
    %cst_14 = arith.constant 1.000000e+00 : f32
    %34 = vector.broadcast %cst_14 : f32 to vector<32x32xf32>
    %35 = arith.addf %34, %33 : vector<32x32xf32>
    %36 = arith.divf %34, %35 : vector<32x32xf32>
    %37 = arith.mulf %30, %36 : vector<32x32xf32>
    %38 = arith.truncf %37 : vector<32x32xf32> to vector<32x32xbf16>
    %c0_15 = arith.constant 0 : index
    %c0_16 = arith.constant 0 : index
    %39 = vector.load %arg6[%c0_15, %c0_16] : memref<32x32xbf16, #tpu.memory_space<vmem>>, vector<32x32xbf16>
    tpu.vector_store %arg6[%c0_15, %c0_16], %38 {strides = array<i32>} : memref<32x32xbf16, #tpu.memory_space<vmem>>, vector<32x32xbf16>,
    return
  }
  func.func @transform_0(%arg0: i32) -> (i32, i32) {
    %c0_i32 = arith.constant 0 : i32
    %c0_i32_0 = arith.constant 0 : i32
    return %arg0, %c0_i32 : i32, i32
  }
  func.func @transform_1(%arg0: i32) -> (i32, i32) {
    %c0_i32 = arith.constant 0 : i32
    %c0_i32_0 = arith.constant 0 : i32
    %c0_i32_1 = arith.constant 0 : i32
    return %c0_i32, %c0_i32_0 : i32, i32
  }
  func.func @transform_2(%arg0: i32) -> (i32, i32) {
    %c0_i32 = arith.constant 0 : i32
    %c0_i32_0 = arith.constant 0 : i32
    %c0_i32_1 = arith.constant 0 : i32
    return %c0_i32, %c0_i32_0 : i32, i32
  }
  func.func @transform_3(%arg0: i32) -> (i32, i32) {
    %c0_i32 = arith.constant 0 : i32
    %c0_i32_0 = arith.constant 0 : i32
    %c0_i32_1 = arith.constant 0 : i32
    return %c0_i32, %c0_i32_0 : i32, i32
  }
  func.func @transform_4(%arg0: i32) -> (i32, i32) {
    %c0_i32 = arith.constant 0 : i32
    %c0_i32_0 = arith.constant 0 : i32
    %c0_i32_1 = arith.constant 0 : i32
    return %c0_i32, %c0_i32_0 : i32, i32
  }
  func.func @transform_5(%arg0: i32) -> (i32, i32) {
    %c0_i32 = arith.constant 0 : i32
    %c0_i32_0 = arith.constant 0 : i32
    return %arg0, %c0_i32 : i32, i32
  }
}

module attributes {stable_mosaic.version = 11 : i64} {
  func.func @_dwconv_bn_swish_kernel(%arg0: i32, %arg1: memref<1x16x32xbf16, #tpu.memory_space<vmem>>, %arg2: memref<7x32xf32, #tpu.memory_space<vmem>>, %arg3: memref<1x32xf32, #tpu.memory_space<vmem>>, %arg4: memref<1x32xf32, #tpu.memory_space<vmem>>, %arg5: memref<1x16x32xbf16, #tpu.memory_space<vmem>>) attributes {dimension_semantics = [#tpu.dimension_semantics<parallel>], iteration_bounds = array<i64: 2>, scalar_prefetch = 0 : i64, scratch_operands = 0 : i64, tpu.core_type = #tpu.core_type<tc>, window_params = [{transform_indices = @transform_0, window_bounds = array<i64: 1, 16, 32>}, {pipeline_mode = #tpu.pipeline_mode<synchronous>, transform_indices = @transform_1, window_bounds = array<i64: 7, 32>}, {pipeline_mode = #tpu.pipeline_mode<synchronous>, transform_indices = @transform_2, window_bounds = array<i64: 1, 32>}, {pipeline_mode = #tpu.pipeline_mode<synchronous>, transform_indices = @transform_3, window_bounds = array<i64: 1, 32>}, {transform_indices = @transform_4, window_bounds = array<i64: 1, 16, 32>}]} {
    %c0 = arith.constant 0 : index
    %c0_0 = arith.constant 0 : index
    %c0_1 = arith.constant 0 : index
    %0 = vector.load %arg1[%c0, %c0_0, %c0_1] : memref<1x16x32xbf16, #tpu.memory_space<vmem>>, vector<1x16x32xbf16>
    %1 = vector.shape_cast %0 : vector<1x16x32xbf16> to vector<16x32xbf16>
    %2 = arith.extf %1 : vector<16x32xbf16> to vector<16x32xf32>
    %3 = tpu.iota {dimensions = array<i32: 0>} : vector<16x1xi32>
    %c0_2 = arith.constant 0 : index
    %c0_3 = arith.constant 0 : index
    %4 = vector.load %arg2[%c0_2, %c0_3] : memref<7x32xf32, #tpu.memory_space<vmem>>, vector<7x32xf32>
    %cst = arith.constant 0.000000e+00 : f32
    %5 = vector.broadcast %cst : f32 to vector<16x32xf32>
    %c3_i32 = arith.constant 3 : i32
    %6 = tpu.dynamic_rotate %2 by %c3_i32 dim 0 : vector<16x32xf32>, i32 -> vector<16x32xf32>
    %c3_i32_4 = arith.constant 3 : i32
    %7 = vector.broadcast %c3_i32_4 : i32 to vector<16x1xi32>
    %8 = arith.cmpi sge, %3, %7 : vector<16x1xi32>
    %c16_i32 = arith.constant 16 : i32
    %9 = vector.broadcast %c16_i32 : i32 to vector<16x1xi32>
    %10 = arith.cmpi slt, %3, %9 : vector<16x1xi32>
    %11 = arith.andi %8, %10 : vector<16x1xi1>
    %cst_5 = arith.constant 0.000000e+00 : f32
    %12 = vector.shape_cast %11 : vector<16x1xi1> to vector<16x1xi1>
    %13 = vector.broadcast %12 : vector<16x1xi1> to vector<16x32xi1>
    %14 = vector.broadcast %cst_5 : f32 to vector<16x32xf32>
    %15 = arith.select %13, %6, %14 : vector<16x32xi1>, vector<16x32xf32>
    %16 = vector.extract_strided_slice %4 {offsets = [0, 0], sizes = [1, 32], strides = [1, 1]} : vector<7x32xf32> to vector<1x32xf32>
    %17 = vector.broadcast %16 : vector<1x32xf32> to vector<16x32xf32>
    %18 = arith.mulf %15, %17 : vector<16x32xf32>
    %19 = arith.addf %5, %18 : vector<16x32xf32>
    %c2_i32 = arith.constant 2 : i32
    %20 = tpu.dynamic_rotate %2 by %c2_i32 dim 0 : vector<16x32xf32>, i32 -> vector<16x32xf32>
    %c2_i32_6 = arith.constant 2 : i32
    %21 = vector.broadcast %c2_i32_6 : i32 to vector<16x1xi32>
    %22 = arith.cmpi sge, %3, %21 : vector<16x1xi32>
    %c16_i32_7 = arith.constant 16 : i32
    %23 = vector.broadcast %c16_i32_7 : i32 to vector<16x1xi32>
    %24 = arith.cmpi slt, %3, %23 : vector<16x1xi32>
    %25 = arith.andi %22, %24 : vector<16x1xi1>
    %cst_8 = arith.constant 0.000000e+00 : f32
    %26 = vector.shape_cast %25 : vector<16x1xi1> to vector<16x1xi1>
    %27 = vector.broadcast %26 : vector<16x1xi1> to vector<16x32xi1>
    %28 = vector.broadcast %cst_8 : f32 to vector<16x32xf32>
    %29 = arith.select %27, %20, %28 : vector<16x32xi1>, vector<16x32xf32>
    %30 = vector.extract_strided_slice %4 {offsets = [1, 0], sizes = [1, 32], strides = [1, 1]} : vector<7x32xf32> to vector<1x32xf32>
    %31 = vector.broadcast %30 : vector<1x32xf32> to vector<16x32xf32>
    %32 = arith.mulf %29, %31 : vector<16x32xf32>
    %33 = arith.addf %19, %32 : vector<16x32xf32>
    %c1_i32 = arith.constant 1 : i32
    %34 = tpu.dynamic_rotate %2 by %c1_i32 dim 0 : vector<16x32xf32>, i32 -> vector<16x32xf32>
    %c1_i32_9 = arith.constant 1 : i32
    %35 = vector.broadcast %c1_i32_9 : i32 to vector<16x1xi32>
    %36 = arith.cmpi sge, %3, %35 : vector<16x1xi32>
    %c16_i32_10 = arith.constant 16 : i32
    %37 = vector.broadcast %c16_i32_10 : i32 to vector<16x1xi32>
    %38 = arith.cmpi slt, %3, %37 : vector<16x1xi32>
    %39 = arith.andi %36, %38 : vector<16x1xi1>
    %cst_11 = arith.constant 0.000000e+00 : f32
    %40 = vector.shape_cast %39 : vector<16x1xi1> to vector<16x1xi1>
    %41 = vector.broadcast %40 : vector<16x1xi1> to vector<16x32xi1>
    %42 = vector.broadcast %cst_11 : f32 to vector<16x32xf32>
    %43 = arith.select %41, %34, %42 : vector<16x32xi1>, vector<16x32xf32>
    %44 = vector.extract_strided_slice %4 {offsets = [2, 0], sizes = [1, 32], strides = [1, 1]} : vector<7x32xf32> to vector<1x32xf32>
    %45 = vector.broadcast %44 : vector<1x32xf32> to vector<16x32xf32>
    %46 = arith.mulf %43, %45 : vector<16x32xf32>
    %47 = arith.addf %33, %46 : vector<16x32xf32>
    %c0_i32 = arith.constant 0 : i32
    %48 = vector.broadcast %c0_i32 : i32 to vector<16x1xi32>
    %49 = arith.cmpi sge, %3, %48 : vector<16x1xi32>
    %c16_i32_12 = arith.constant 16 : i32
    %50 = vector.broadcast %c16_i32_12 : i32 to vector<16x1xi32>
    %51 = arith.cmpi slt, %3, %50 : vector<16x1xi32>
    %52 = arith.andi %49, %51 : vector<16x1xi1>
    %cst_13 = arith.constant 0.000000e+00 : f32
    %53 = vector.shape_cast %52 : vector<16x1xi1> to vector<16x1xi1>
    %54 = vector.broadcast %53 : vector<16x1xi1> to vector<16x32xi1>
    %55 = vector.broadcast %cst_13 : f32 to vector<16x32xf32>
    %56 = arith.select %54, %2, %55 : vector<16x32xi1>, vector<16x32xf32>
    %57 = vector.extract_strided_slice %4 {offsets = [3, 0], sizes = [1, 32], strides = [1, 1]} : vector<7x32xf32> to vector<1x32xf32>
    %58 = vector.broadcast %57 : vector<1x32xf32> to vector<16x32xf32>
    %59 = arith.mulf %56, %58 : vector<16x32xf32>
    %60 = arith.addf %47, %59 : vector<16x32xf32>
    %c15_i32 = arith.constant 15 : i32
    %61 = tpu.dynamic_rotate %2 by %c15_i32 dim 0 : vector<16x32xf32>, i32 -> vector<16x32xf32>
    %c0_i32_14 = arith.constant 0 : i32
    %62 = vector.broadcast %c0_i32_14 : i32 to vector<16x1xi32>
    %63 = arith.cmpi sge, %3, %62 : vector<16x1xi32>
    %c15_i32_15 = arith.constant 15 : i32
    %64 = vector.broadcast %c15_i32_15 : i32 to vector<16x1xi32>
    %65 = arith.cmpi slt, %3, %64 : vector<16x1xi32>
    %66 = arith.andi %63, %65 : vector<16x1xi1>
    %cst_16 = arith.constant 0.000000e+00 : f32
    %67 = vector.shape_cast %66 : vector<16x1xi1> to vector<16x1xi1>
    %68 = vector.broadcast %67 : vector<16x1xi1> to vector<16x32xi1>
    %69 = vector.broadcast %cst_16 : f32 to vector<16x32xf32>
    %70 = arith.select %68, %61, %69 : vector<16x32xi1>, vector<16x32xf32>
    %71 = vector.extract_strided_slice %4 {offsets = [4, 0], sizes = [1, 32], strides = [1, 1]} : vector<7x32xf32> to vector<1x32xf32>
    %72 = vector.broadcast %71 : vector<1x32xf32> to vector<16x32xf32>
    %73 = arith.mulf %70, %72 : vector<16x32xf32>
    %74 = arith.addf %60, %73 : vector<16x32xf32>
    %c14_i32 = arith.constant 14 : i32
    %75 = tpu.dynamic_rotate %2 by %c14_i32 dim 0 : vector<16x32xf32>, i32 -> vector<16x32xf32>
    %c0_i32_17 = arith.constant 0 : i32
    %76 = vector.broadcast %c0_i32_17 : i32 to vector<16x1xi32>
    %77 = arith.cmpi sge, %3, %76 : vector<16x1xi32>
    %c14_i32_18 = arith.constant 14 : i32
    %78 = vector.broadcast %c14_i32_18 : i32 to vector<16x1xi32>
    %79 = arith.cmpi slt, %3, %78 : vector<16x1xi32>
    %80 = arith.andi %77, %79 : vector<16x1xi1>
    %cst_19 = arith.constant 0.000000e+00 : f32
    %81 = vector.shape_cast %80 : vector<16x1xi1> to vector<16x1xi1>
    %82 = vector.broadcast %81 : vector<16x1xi1> to vector<16x32xi1>
    %83 = vector.broadcast %cst_19 : f32 to vector<16x32xf32>
    %84 = arith.select %82, %75, %83 : vector<16x32xi1>, vector<16x32xf32>
    %85 = vector.extract_strided_slice %4 {offsets = [5, 0], sizes = [1, 32], strides = [1, 1]} : vector<7x32xf32> to vector<1x32xf32>
    %86 = vector.broadcast %85 : vector<1x32xf32> to vector<16x32xf32>
    %87 = arith.mulf %84, %86 : vector<16x32xf32>
    %88 = arith.addf %74, %87 : vector<16x32xf32>
    %c13_i32 = arith.constant 13 : i32
    %89 = tpu.dynamic_rotate %2 by %c13_i32 dim 0 : vector<16x32xf32>, i32 -> vector<16x32xf32>
    %c0_i32_20 = arith.constant 0 : i32
    %90 = vector.broadcast %c0_i32_20 : i32 to vector<16x1xi32>
    %91 = arith.cmpi sge, %3, %90 : vector<16x1xi32>
    %c13_i32_21 = arith.constant 13 : i32
    %92 = vector.broadcast %c13_i32_21 : i32 to vector<16x1xi32>
    %93 = arith.cmpi slt, %3, %92 : vector<16x1xi32>
    %94 = arith.andi %91, %93 : vector<16x1xi1>
    %cst_22 = arith.constant 0.000000e+00 : f32
    %95 = vector.shape_cast %94 : vector<16x1xi1> to vector<16x1xi1>
    %96 = vector.broadcast %95 : vector<16x1xi1> to vector<16x32xi1>
    %97 = vector.broadcast %cst_22 : f32 to vector<16x32xf32>
    %98 = arith.select %96, %89, %97 : vector<16x32xi1>, vector<16x32xf32>
    %99 = vector.extract_strided_slice %4 {offsets = [6, 0], sizes = [1, 32], strides = [1, 1]} : vector<7x32xf32> to vector<1x32xf32>
    %100 = vector.broadcast %99 : vector<1x32xf32> to vector<16x32xf32>
    %101 = arith.mulf %98, %100 : vector<16x32xf32>
    %102 = arith.addf %88, %101 : vector<16x32xf32>
    %c0_23 = arith.constant 0 : index
    %c0_24 = arith.constant 0 : index
    %103 = vector.load %arg3[%c0_23, %c0_24] : memref<1x32xf32, #tpu.memory_space<vmem>>, vector<1x32xf32>
    %104 = vector.broadcast %103 : vector<1x32xf32> to vector<16x32xf32>
    %105 = arith.mulf %102, %104 : vector<16x32xf32>
    %c0_25 = arith.constant 0 : index
    %c0_26 = arith.constant 0 : index
    %106 = vector.load %arg4[%c0_25, %c0_26] : memref<1x32xf32, #tpu.memory_space<vmem>>, vector<1x32xf32>
    %107 = vector.broadcast %106 : vector<1x32xf32> to vector<16x32xf32>
    %108 = arith.addf %105, %107 : vector<16x32xf32>
    %109 = arith.negf %108 : vector<16x32xf32>
    %110 = math.exp %109 : vector<16x32xf32>
    %cst_27 = arith.constant 1.000000e+00 : f32
    %111 = vector.broadcast %cst_27 : f32 to vector<16x32xf32>
    %112 = arith.addf %111, %110 : vector<16x32xf32>
    %113 = arith.divf %111, %112 : vector<16x32xf32>
    %114 = arith.mulf %108, %113 : vector<16x32xf32>
    %115 = arith.truncf %114 : vector<16x32xf32> to vector<16x32xbf16>
    %c0_28 = arith.constant 0 : index
    %c0_29 = arith.constant 0 : index
    %c0_30 = arith.constant 0 : index
    %116 = vector.load %arg5[%c0_28, %c0_29, %c0_30] : memref<1x16x32xbf16, #tpu.memory_space<vmem>>, vector<1x16x32xbf16>
    %117 = vector.shape_cast %116 : vector<1x16x32xbf16> to vector<16x32xbf16>
    %118 = vector.shape_cast %115 : vector<16x32xbf16> to vector<1x16x32xbf16>
    tpu.vector_store %arg5[%c0_28, %c0_29, %c0_30], %118 {strides = array<i32>} : memref<1x16x32xbf16, #tpu.memory_space<vmem>>, vector<1x16x32xbf16>,
    return
  }
  func.func @transform_0(%arg0: i32) -> (i32, i32, i32) {
    %c0_i32 = arith.constant 0 : i32
    %c0_i32_0 = arith.constant 0 : i32
    %c0_i32_1 = arith.constant 0 : i32
    return %arg0, %c0_i32, %c0_i32_0 : i32, i32, i32
  }
  func.func @transform_1(%arg0: i32) -> (i32, i32) {
    %c0_i32 = arith.constant 0 : i32
    %c0_i32_0 = arith.constant 0 : i32
    %c0_i32_1 = arith.constant 0 : i32
    return %c0_i32, %c0_i32_0 : i32, i32
  }
  func.func @transform_2(%arg0: i32) -> (i32, i32) {
    %c0_i32 = arith.constant 0 : i32
    %c0_i32_0 = arith.constant 0 : i32
    %c0_i32_1 = arith.constant 0 : i32
    return %c0_i32, %c0_i32_0 : i32, i32
  }
  func.func @transform_3(%arg0: i32) -> (i32, i32) {
    %c0_i32 = arith.constant 0 : i32
    %c0_i32_0 = arith.constant 0 : i32
    %c0_i32_1 = arith.constant 0 : i32
    return %c0_i32, %c0_i32_0 : i32, i32
  }
  func.func @transform_4(%arg0: i32) -> (i32, i32, i32) {
    %c0_i32 = arith.constant 0 : i32
    %c0_i32_0 = arith.constant 0 : i32
    %c0_i32_1 = arith.constant 0 : i32
    return %arg0, %c0_i32, %c0_i32_0 : i32, i32, i32
  }
}

module attributes {stable_mosaic.version = 11 : i64} {
  func.func @_ln_kernel(%arg0: i32, %arg1: memref<32x32xbf16, #tpu.memory_space<vmem>>, %arg2: memref<1x32xf32, #tpu.memory_space<vmem>>, %arg3: memref<1x32xf32, #tpu.memory_space<vmem>>, %arg4: memref<32x32xbf16, #tpu.memory_space<vmem>>) attributes {dimension_semantics = [#tpu.dimension_semantics<parallel>], iteration_bounds = array<i64: 1>, scalar_prefetch = 0 : i64, scratch_operands = 0 : i64, tpu.core_type = #tpu.core_type<tc>, window_params = [{transform_indices = @transform_0, window_bounds = array<i64: 32, 32>}, {pipeline_mode = #tpu.pipeline_mode<synchronous>, transform_indices = @transform_1, window_bounds = array<i64: 1, 32>}, {pipeline_mode = #tpu.pipeline_mode<synchronous>, transform_indices = @transform_2, window_bounds = array<i64: 1, 32>}, {transform_indices = @transform_3, window_bounds = array<i64: 32, 32>}]} {
    %c0 = arith.constant 0 : index
    %c0_0 = arith.constant 0 : index
    %0 = vector.load %arg1[%c0, %c0_0] : memref<32x32xbf16, #tpu.memory_space<vmem>>, vector<32x32xbf16>
    %1 = arith.extf %0 : vector<32x32xbf16> to vector<32x32xf32>
    %cst = arith.constant dense<0.000000e+00> : vector<32xf32>
    %2 = vector.multi_reduction <add>, %1, %cst [1] : vector<32x32xf32> to vector<32xf32>
    %3 = vector.shape_cast %2 : vector<32xf32> to vector<32x1xf32>
    %cst_1 = arith.constant 3.200000e+01 : f32
    %4 = vector.broadcast %cst_1 : f32 to vector<32x1xf32>
    %5 = arith.divf %3, %4 : vector<32x1xf32>
    %6 = vector.broadcast %5 : vector<32x1xf32> to vector<32x32xf32>
    %7 = arith.subf %1, %6 : vector<32x32xf32>
    %8 = arith.mulf %7, %7 : vector<32x32xf32>
    %cst_2 = arith.constant dense<0.000000e+00> : vector<32xf32>
    %9 = vector.multi_reduction <add>, %8, %cst_2 [1] : vector<32x32xf32> to vector<32xf32>
    %10 = vector.shape_cast %9 : vector<32xf32> to vector<32x1xf32>
    %cst_3 = arith.constant 3.200000e+01 : f32
    %11 = vector.broadcast %cst_3 : f32 to vector<32x1xf32>
    %12 = arith.divf %10, %11 : vector<32x1xf32>
    %cst_4 = arith.constant 9.99999974E-6 : f32
    %13 = vector.broadcast %cst_4 : f32 to vector<32x1xf32>
    %14 = arith.addf %12, %13 : vector<32x1xf32>
    %15 = math.rsqrt %14 : vector<32x1xf32>
    %16 = vector.broadcast %15 : vector<32x1xf32> to vector<32x32xf32>
    %17 = arith.mulf %7, %16 : vector<32x32xf32>
    %c0_5 = arith.constant 0 : index
    %c0_6 = arith.constant 0 : index
    %18 = vector.load %arg2[%c0_5, %c0_6] : memref<1x32xf32, #tpu.memory_space<vmem>>, vector<1x32xf32>
    %19 = vector.broadcast %18 : vector<1x32xf32> to vector<32x32xf32>
    %20 = arith.mulf %17, %19 : vector<32x32xf32>
    %c0_7 = arith.constant 0 : index
    %c0_8 = arith.constant 0 : index
    %21 = vector.load %arg3[%c0_7, %c0_8] : memref<1x32xf32, #tpu.memory_space<vmem>>, vector<1x32xf32>
    %22 = vector.broadcast %21 : vector<1x32xf32> to vector<32x32xf32>
    %23 = arith.addf %20, %22 : vector<32x32xf32>
    %24 = arith.truncf %23 : vector<32x32xf32> to vector<32x32xbf16>
    %c0_9 = arith.constant 0 : index
    %c0_10 = arith.constant 0 : index
    %25 = vector.load %arg4[%c0_9, %c0_10] : memref<32x32xbf16, #tpu.memory_space<vmem>>, vector<32x32xbf16>
    tpu.vector_store %arg4[%c0_9, %c0_10], %24 {strides = array<i32>} : memref<32x32xbf16, #tpu.memory_space<vmem>>, vector<32x32xbf16>,
    return
  }
  func.func @transform_0(%arg0: i32) -> (i32, i32) {
    %c0_i32 = arith.constant 0 : i32
    %c0_i32_0 = arith.constant 0 : i32
    return %arg0, %c0_i32 : i32, i32
  }
  func.func @transform_1(%arg0: i32) -> (i32, i32) {
    %c0_i32 = arith.constant 0 : i32
    %c0_i32_0 = arith.constant 0 : i32
    %c0_i32_1 = arith.constant 0 : i32
    return %c0_i32, %c0_i32_0 : i32, i32
  }
  func.func @transform_2(%arg0: i32) -> (i32, i32) {
    %c0_i32 = arith.constant 0 : i32
    %c0_i32_0 = arith.constant 0 : i32
    %c0_i32_1 = arith.constant 0 : i32
    return %c0_i32, %c0_i32_0 : i32, i32
  }
  func.func @transform_3(%arg0: i32) -> (i32, i32) {
    %c0_i32 = arith.constant 0 : i32
    %c0_i32_0 = arith.constant 0 : i32
    return %arg0, %c0_i32 : i32, i32
  }
}

module attributes {stable_mosaic.version = 11 : i64} {
  func.func @_ln_kernel(%arg0: i32, %arg1: memref<32x32xbf16, #tpu.memory_space<vmem>>, %arg2: memref<1x32xf32, #tpu.memory_space<vmem>>, %arg3: memref<1x32xf32, #tpu.memory_space<vmem>>, %arg4: memref<32x32xf32, #tpu.memory_space<vmem>>) attributes {dimension_semantics = [#tpu.dimension_semantics<parallel>], iteration_bounds = array<i64: 1>, scalar_prefetch = 0 : i64, scratch_operands = 0 : i64, tpu.core_type = #tpu.core_type<tc>, window_params = [{transform_indices = @transform_0, window_bounds = array<i64: 32, 32>}, {pipeline_mode = #tpu.pipeline_mode<synchronous>, transform_indices = @transform_1, window_bounds = array<i64: 1, 32>}, {pipeline_mode = #tpu.pipeline_mode<synchronous>, transform_indices = @transform_2, window_bounds = array<i64: 1, 32>}, {transform_indices = @transform_3, window_bounds = array<i64: 32, 32>}]} {
    %c0 = arith.constant 0 : index
    %c0_0 = arith.constant 0 : index
    %0 = vector.load %arg1[%c0, %c0_0] : memref<32x32xbf16, #tpu.memory_space<vmem>>, vector<32x32xbf16>
    %1 = arith.extf %0 : vector<32x32xbf16> to vector<32x32xf32>
    %cst = arith.constant dense<0.000000e+00> : vector<32xf32>
    %2 = vector.multi_reduction <add>, %1, %cst [1] : vector<32x32xf32> to vector<32xf32>
    %3 = vector.shape_cast %2 : vector<32xf32> to vector<32x1xf32>
    %cst_1 = arith.constant 3.200000e+01 : f32
    %4 = vector.broadcast %cst_1 : f32 to vector<32x1xf32>
    %5 = arith.divf %3, %4 : vector<32x1xf32>
    %6 = vector.broadcast %5 : vector<32x1xf32> to vector<32x32xf32>
    %7 = arith.subf %1, %6 : vector<32x32xf32>
    %8 = arith.mulf %7, %7 : vector<32x32xf32>
    %cst_2 = arith.constant dense<0.000000e+00> : vector<32xf32>
    %9 = vector.multi_reduction <add>, %8, %cst_2 [1] : vector<32x32xf32> to vector<32xf32>
    %10 = vector.shape_cast %9 : vector<32xf32> to vector<32x1xf32>
    %cst_3 = arith.constant 3.200000e+01 : f32
    %11 = vector.broadcast %cst_3 : f32 to vector<32x1xf32>
    %12 = arith.divf %10, %11 : vector<32x1xf32>
    %cst_4 = arith.constant 9.99999974E-6 : f32
    %13 = vector.broadcast %cst_4 : f32 to vector<32x1xf32>
    %14 = arith.addf %12, %13 : vector<32x1xf32>
    %15 = math.rsqrt %14 : vector<32x1xf32>
    %16 = vector.broadcast %15 : vector<32x1xf32> to vector<32x32xf32>
    %17 = arith.mulf %7, %16 : vector<32x32xf32>
    %c0_5 = arith.constant 0 : index
    %c0_6 = arith.constant 0 : index
    %18 = vector.load %arg2[%c0_5, %c0_6] : memref<1x32xf32, #tpu.memory_space<vmem>>, vector<1x32xf32>
    %19 = vector.broadcast %18 : vector<1x32xf32> to vector<32x32xf32>
    %20 = arith.mulf %17, %19 : vector<32x32xf32>
    %c0_7 = arith.constant 0 : index
    %c0_8 = arith.constant 0 : index
    %21 = vector.load %arg3[%c0_7, %c0_8] : memref<1x32xf32, #tpu.memory_space<vmem>>, vector<1x32xf32>
    %22 = vector.broadcast %21 : vector<1x32xf32> to vector<32x32xf32>
    %23 = arith.addf %20, %22 : vector<32x32xf32>
    %c0_9 = arith.constant 0 : index
    %c0_10 = arith.constant 0 : index
    %24 = vector.load %arg4[%c0_9, %c0_10] : memref<32x32xf32, #tpu.memory_space<vmem>>, vector<32x32xf32>
    tpu.vector_store %arg4[%c0_9, %c0_10], %23 {strides = array<i32>} : memref<32x32xf32, #tpu.memory_space<vmem>>, vector<32x32xf32>,
    return
  }
  func.func @transform_0(%arg0: i32) -> (i32, i32) {
    %c0_i32 = arith.constant 0 : i32
    %c0_i32_0 = arith.constant 0 : i32
    return %arg0, %c0_i32 : i32, i32
  }
  func.func @transform_1(%arg0: i32) -> (i32, i32) {
    %c0_i32 = arith.constant 0 : i32
    %c0_i32_0 = arith.constant 0 : i32
    %c0_i32_1 = arith.constant 0 : i32
    return %c0_i32, %c0_i32_0 : i32, i32
  }
  func.func @transform_2(%arg0: i32) -> (i32, i32) {
    %c0_i32 = arith.constant 0 : i32
    %c0_i32_0 = arith.constant 0 : i32
    %c0_i32_1 = arith.constant 0 : i32
    return %c0_i32, %c0_i32_0 : i32, i32
  }
  func.func @transform_3(%arg0: i32) -> (i32, i32) {
    %c0_i32 = arith.constant 0 : i32
    %c0_i32_0 = arith.constant 0 : i32
    return %arg0, %c0_i32 : i32, i32
  }
}

</mosaic_0001>

<bundles_post_ra>
// kernel: conformer_encoder.27
= control target key start
LH: loop header
LB: loop body
LE: loop exit
PB: predicated region body
PF: predicated region fallthrough
CT: control target
= control target key end

     0   :  { %s1062_s12 = smov 0   ;;  %s1064_s13 = smov 0   ;;  %s1255_s0 = inlined_call_operand.vmem [shape: f32[512,9], index: 0, kind: input, shape index: {}]   ;;  %s1256_s1 = inlined_call_operand.vmem [shape: bf16[9,32], index: 1, kind: input, shape index: {}]   ;;  %s1257_s2 = inlined_call_operand.vmem [shape: f32[1,32], index: 2, kind: input, shape index: {}]   ;;  %s1258_s3 = inlined_call_operand.vmem [shape: bf16[512,32], index: 3, kind: output, shape index: {}]  }
   0x1   :  { %s1066_s14 = smov 0  }
   0x2 LB: > { %s32_s15 = sadd.s32 1, %s1035_s13  ;;  %p849_p0 = scmp.ge.s32.totalorder %s1039_s14, 1  ;;  %s1039_s14 = sphi %s1066_s14, %s13_s14   ;;  %s1035_s13 = sphi %s1064_s13, %s1260_s13   ;;  %s1031_s12 = sphi %s1062_s12, %s1259_s12  }
   0x3   : > { %p34_p1 = scmp.ge.s32.totalorder %s32_s15, 2  ;;  %p188_p2 = scmp.lt.s32.totalorder %s1039_s14, 3 }
   0x5   : > { %s1262_s15 = smov (%p34_p1, %s32_s15), 0  ;;  %p189_p3 = pnand %p849_p0, %p188_p2 }
   0x6   : > { %v1016_v0 = vld [vmem:[%s1256_s1] sm:$0x1f] (!%p189_p3)   ;;  %vm371_vm0 = vcmask (!%p189_p3), 1043456   ;;  %vm372_vm1 = vcmask (!%p189_p3), 1044480   ;;  %s850_s18 = sshll.u32 (!%p189_p3), %s1031_s12, 5  ;;  %v1041_v1 = vmov (!%p189_p3), 65535  }
   0x7   : > { %192 = sbr.rel (%p189_p3) target bundleno = 268 (0x10c), region = 32  ;;  %v373_v2 = vsel (!%p189_p3), %vm371_vm0, 4294967295, %v1041_v1  ;;  %p230_p4 = scmp.lt.s32.totalorder (!%p189_p3), %s850_s18, 63  ;;  %vm322_vm2 = vcmask (!%p189_p3), 72704   ;;  %v1142_v53 = vld [vmem:[%s1257_s2] ss:$0 sm:$0xff] (!%p189_p3) }
   0x8   : > { %v374_v3 = vsel (!%p189_p3), %vm372_vm1, %v373_v2, 0  ;;  %vm699_vm3 = vcmask (!%p189_p3), 257024  }
   0x9   : > { %v376_v4 = vand.u32 (!%p189_p3), %v1016_v0, %v374_v3 }
   0xb   : > { %955 = vmatprep.subr.bf16.mxu0 (!%p189_p3), %v376_v4  ;;  %989 = vmatprep.subr.bf16.mxu1 (!%p189_p3), %v376_v4 }
   0xc   : > { %956 = vmatpush3.bf16.msra.mxu0 (!%p189_p3), %v376_v4  ;;  %990 = vmatpush3.bf16.msra.mxu1 (!%p189_p3), %v376_v4 }
   0xe   : > { %s1264_s18 = smov (!%p230_p4, %s850_s18), 63 }
   0xf   : > { %s851_s19 = sshll.u32 %s1264_s18, 3  ;;  %s853_s25 = sshll.u32 %s1264_s18, 2 }
  0x10   : > { %s1089_s22 = scalar_lea.vmem %s1255_s0, %s851_s19  ;;  %s1153_s28 = scalar_lea.vmem %s1258_s3, %s853_s25 }
  0x11   : > { %v260_v5 = vld [vmem:[%s1089_s22] sm:$0xff]  ;;  %v261_v6 = vld [vmem:[%s1089_s22 + $0x8] sm:$0xff]  ;;  %v262_v10 = vld [vmem:[%s1089_s22 + $0x10] sm:$0xff] }
  0x12   : > { %v276_v7 = vld [vmem:[%s1089_s22 + $0x80] sm:$0xff]  ;;  %v292_v8 = vpack.c.bf16 %v261_v6, %v260_v5  ;;  %v277_v9 = vld [vmem:[%s1089_s22 + $0x88] sm:$0xff]  ;;  %v263_v11 = vld [vmem:[%s1089_s22 + $0x18] sm:$0xff] }
  0x13   : > { %v300_v12 = vpack.c.bf16 %v277_v9, %v276_v7  ;;  %v293_v13 = vpack.c.bf16 %v263_v11, %v262_v10  ;;  %v278_v14 = vld [vmem:[%s1089_s22 + $0x90] sm:$0xff]  ;;  %v279_v15 = vld [vmem:[%s1089_s22 + $0x98] sm:$0xff]  ;;  %v264_v16 = vld [vmem:[%s1089_s22 + $0x20] sm:$0xff] }
  0x14   : > { %957 = vmatprep.mubr.msk.bf16.mxu0 %vm322_vm2, %v292_v8  ;;  %v301_v17 = vpack.c.bf16 %v279_v15, %v278_v14  ;;  %v265_v18 = vld [vmem:[%s1089_s22 + $0x28] sm:$0xff]  ;;  %v280_v19 = vld [vmem:[%s1089_s22 + $0xa0] sm:$0xff]  ;;  %v266_v23 = vld [vmem:[%s1089_s22 + $0x30] sm:$0xff] }
  0x15   : > { %v281_v20 = vld [vmem:[%s1089_s22 + $0xa8] sm:$0xff]  ;;  %973 = vmatprep.mubr.msk.bf16.mxu1 %vm322_vm2, %v300_v12  ;;  %958 = vmatmul.mubr.msk.bf16.vlgmr.msra.gmra.mrb[0].mxu0 %vm322_vm2, %v293_v13  ;;  %v294_v21 = vpack.c.bf16 %v265_v18, %v264_v16  ;;  %v267_v24 = vld [vmem:[%s1089_s22 + $0x38] sm:$0xff]  ;;  %v282_v25 = vld [vmem:[%s1089_s22 + $0xb0] sm:$0xff] }
  0x16   : > { %v302_v22 = vpack.c.bf16 %v281_v20, %v280_v19  ;;  %974 = vmatmul.mubr.msk.bf16.vlgmr.msra.gmra.mrb[0].mxu1 %vm322_vm2, %v301_v17  ;;  %v283_v26 = vld [vmem:[%s1089_s22 + $0xb8] sm:$0xff]  ;;  %v268_v27 = vld [vmem:[%s1089_s22 + $0x40] sm:$0xff]  ;;  %v269_v28 = vld [vmem:[%s1089_s22 + $0x48] sm:$0xff]  ;;  %v295_v31 = vpack.c.bf16 %v267_v24, %v266_v23 }
  0x17   : > { %961 = vmatprep.mubr.msk.bf16.mxu0 %vm322_vm2, %v294_v21  ;;  %v284_v29 = vld [vmem:[%s1089_s22 + $0xc0] sm:$0xff]  ;;  %v285_v30 = vld [vmem:[%s1089_s22 + $0xc8] sm:$0xff]  ;;  %v303_v32 = vpack.c.bf16 %v283_v26, %v282_v25  ;;  %v296_v33 = vpack.c.bf16 %v269_v28, %v268_v27  ;;  %v270_v35 = vld [vmem:[%s1089_s22 + $0x50] sm:$0xff] }
  0x18   : > { %977 = vmatprep.mubr.msk.bf16.mxu1 %vm322_vm2, %v302_v22  ;;  %v304_v34 = vpack.c.bf16 %v285_v30, %v284_v29  ;;  %v271_v36 = vld [vmem:[%s1089_s22 + $0x58] sm:$0xff]  ;;  %v286_v37 = vld [vmem:[%s1089_s22 + $0xd0] sm:$0xff]  ;;  %v272_v39 = vld [vmem:[%s1089_s22 + $0x60] sm:$0xff] }
  0x19   : > { %v287_v38 = vld [vmem:[%s1089_s22 + $0xd8] sm:$0xff]  ;;  %v273_v40 = vld [vmem:[%s1089_s22 + $0x68] sm:$0xff]  ;;  %v288_v41 = vld [vmem:[%s1089_s22 + $0xe0] sm:$0xff]  ;;  %v297_v43 = vpack.c.bf16 %v271_v36, %v270_v35 }
  0x1a   : > { %v289_v42 = vld [vmem:[%s1089_s22 + $0xe8] sm:$0xff]  ;;  %v305_v44 = vpack.c.bf16 %v287_v38, %v286_v37  ;;  %v298_v45 = vpack.c.bf16 %v273_v40, %v272_v39  ;;  %v274_v47 = vld [vmem:[%s1089_s22 + $0x70] sm:$0xff]  ;;  %v275_v48 = vld [vmem:[%s1089_s22 + $0x78] sm:$0xff] }
  0x1b   : > { %v306_v46 = vpack.c.bf16 %v289_v42, %v288_v41  ;;  %v290_v49 = vld [vmem:[%s1089_s22 + $0xf0] sm:$0xff]  ;;  %v291_v50 = vld [vmem:[%s1089_s22 + $0xf8] sm:$0xff]  ;;  %v299_v51 = vpack.c.bf16 %v275_v48, %v274_v47 }
  0x1c   : > { %v307_v52 = vpack.c.bf16 %v291_v50, %v290_v49 }
  0x1d   : > { %962 = vmatmul.mubr.msk.bf16.gmra.mrb[4].mxu0 %vm322_vm2, %v295_v31 }
  0x1e   : > { %978 = vmatmul.mubr.msk.bf16.gmra.mrb[4].mxu1 %vm322_vm2, %v303_v32  ;;  %965 = vmatprep.mubr.msk.bf16.mxu0 %vm322_vm2, %v296_v33 }
  0x1f   : > { %981 = vmatprep.mubr.msk.bf16.mxu1 %vm322_vm2, %v304_v34 }
  0x25   : > { %966 = vmatmul.mubr.msk.bf16.gmra.mrb[8].mxu0 %vm322_vm2, %v297_v43 }
  0x26   : > { %982 = vmatmul.mubr.msk.bf16.gmra.mrb[8].mxu1 %vm322_vm2, %v305_v44  ;;  %969 = vmatprep.mubr.msk.bf16.mxu0 %vm322_vm2, %v298_v45 }
  0x27   : > { %985 = vmatprep.mubr.msk.bf16.mxu1 %vm322_vm2, %v306_v46 }
  0x2d   : > { %970 = vmatmul.mubr.msk.bf16.gmra.mrb[12].mxu0 %vm322_vm2, %v299_v51 }
  0x2e   : > { %986 = vmatmul.mubr.msk.bf16.gmra.mrb[12].mxu1 %vm322_vm2, %v307_v52 }
  0xe8   : > { %v959_v54 = vpop.f32.mrb[0].mxu0 }
  0xe9   : > { %v421_v55 = vadd.f32 %v959_v54, %v1142_v53  ;;  %v975_v56 = vpop.f32.mrb[0].mxu1  ;;  %v412_v57 = vpop.f32.mrb[1].mxu0 }
  0xea   : > { %v485_v58 = vadd.f32 %v975_v56, %v1142_v53  ;;  %v413_v59 = vadd.f32 %v1142_v53, %v412_v57  ;;  %v476_v60 = vpop.f32.mrb[1].mxu1  ;;  %v960_v61 = vpop.f32.mrb[2].mxu0 }
  0xeb   : > { %v541_v62 = vmax.f32 %v421_v55, 0.0  ;;  %v477_v63 = vadd.f32 %v1142_v53, %v476_v60  ;;  %v424_v0 = vadd.f32 %v960_v61, %v1142_v53  ;;  %v976_v1 = vpop.f32.mrb[2].mxu1  ;;  %v415_v2 = vpop.f32.mrb[3].mxu0 }
  0xec   : > { %v557_v3 = vmax.f32 %v485_v58, 0.0  ;;  %v539_v4 = vmax.f32 %v413_v59, 0.0  ;;  %v488_v5 = vadd.f32 %v976_v1, %v1142_v53  ;;  %v416_v6 = vadd.f32 %v1142_v53, %v415_v2  ;;  %v479_v7 = vpop.f32.mrb[3].mxu1 }
  0xed   : > { %v908_v8 = vpack.c.bf16 %v541_v62, %v541_v62  ;;  %v555_v9 = vmax.f32 %v477_v63, 0.0  ;;  %v542_v10 = vmax.f32 %v424_v0, 0.0  ;;  %v480_v11 = vadd.f32 %v1142_v53, %v479_v7 }
  0xee   : > { %v924_v12 = vpack.c.bf16 %v557_v3, %v557_v3  ;;  %v906_v13 = vpack.c.bf16 %v539_v4, %v539_v4  ;;  %v558_v14 = vmax.f32 %v488_v5, 0.0  ;;  %v540_v15 = vmax.f32 %v416_v6, 0.0 }
  0xef   : > { %702 = vst.msk [vmem:[%s1153_s28 + $0x8] sm:$0xf] %vm699_vm3, %v908_v8  ;;  %v922_v16 = vpack.c.bf16 %v555_v9, %v555_v9  ;;  %v909_v17 = vpack.c.bf16 %v542_v10, %v542_v10  ;;  %v556_v18 = vmax.f32 %v480_v11, 0.0 }
  0xf0   : > { %718 = vst.msk [vmem:[%s1153_s28 + $0x48] sm:$0xf] %vm699_vm3, %v924_v12  ;;  %700 = vst.msk [vmem:[%s1153_s28] sm:$0xf] %vm699_vm3, %v906_v13  ;;  %v925_v19 = vpack.c.bf16 %v558_v14, %v558_v14  ;;  %v907_v20 = vpack.c.bf16 %v540_v15, %v540_v15  ;;  %v963_v21 = vpop.f32.mrb[4].mxu0 }
  0xf1   : > { %716 = vst.msk [vmem:[%s1153_s28 + $0x40] sm:$0xf] %vm699_vm3, %v922_v16  ;;  %703 = vst.msk [vmem:[%s1153_s28 + $0xc] sm:$0xf] %vm699_vm3, %v909_v17  ;;  %v923_v22 = vpack.c.bf16 %v556_v18, %v556_v18  ;;  %v437_v23 = vadd.f32 %v963_v21, %v1142_v53  ;;  %v979_v24 = vpop.f32.mrb[4].mxu1  ;;  %v428_v25 = vpop.f32.mrb[5].mxu0 }
  0xf2   : > { %719 = vst.msk [vmem:[%s1153_s28 + $0x4c] sm:$0xf] %vm699_vm3, %v925_v19  ;;  %701 = vst.msk [vmem:[%s1153_s28 + $0x4] sm:$0xf] %vm699_vm3, %v907_v20  ;;  %v501_v26 = vadd.f32 %v979_v24, %v1142_v53  ;;  %v429_v27 = vadd.f32 %v1142_v53, %v428_v25  ;;  %v492_v28 = vpop.f32.mrb[5].mxu1  ;;  %v964_v29 = vpop.f32.mrb[6].mxu0 }
  0xf3   : > { %717 = vst.msk [vmem:[%s1153_s28 + $0x44] sm:$0xf] %vm699_vm3, %v923_v22  ;;  %v545_v30 = vmax.f32 %v437_v23, 0.0  ;;  %v493_v31 = vadd.f32 %v1142_v53, %v492_v28  ;;  %v440_v32 = vadd.f32 %v964_v29, %v1142_v53  ;;  %v980_v33 = vpop.f32.mrb[6].mxu1  ;;  %v431_v34 = vpop.f32.mrb[7].mxu0 }
  0xf4   : > { %v561_v35 = vmax.f32 %v501_v26, 0.0  ;;  %v543_v36 = vmax.f32 %v429_v27, 0.0  ;;  %v504_v37 = vadd.f32 %v980_v33, %v1142_v53  ;;  %v432_v38 = vadd.f32 %v1142_v53, %v431_v34  ;;  %v495_v39 = vpop.f32.mrb[7].mxu1 }
  0xf5   : > { %v912_v40 = vpack.c.bf16 %v545_v30, %v545_v30  ;;  %v559_v41 = vmax.f32 %v493_v31, 0.0  ;;  %v546_v42 = vmax.f32 %v440_v32, 0.0  ;;  %v496_v43 = vadd.f32 %v1142_v53, %v495_v39 }
  0xf6   : > { %v928_v44 = vpack.c.bf16 %v561_v35, %v561_v35  ;;  %v910_v45 = vpack.c.bf16 %v543_v36, %v543_v36  ;;  %v562_v46 = vmax.f32 %v504_v37, 0.0  ;;  %v544_v47 = vmax.f32 %v432_v38, 0.0 }
  0xf7   : > { %706 = vst.msk [vmem:[%s1153_s28 + $0x18] sm:$0xf] %vm699_vm3, %v912_v40  ;;  %v926_v48 = vpack.c.bf16 %v559_v41, %v559_v41  ;;  %v913_v49 = vpack.c.bf16 %v546_v42, %v546_v42  ;;  %v560_v50 = vmax.f32 %v496_v43, 0.0 }
  0xf8   : > { %722 = vst.msk [vmem:[%s1153_s28 + $0x58] sm:$0xf] %vm699_vm3, %v928_v44  ;;  %704 = vst.msk [vmem:[%s1153_s28 + $0x10] sm:$0xf] %vm699_vm3, %v910_v45  ;;  %v929_v51 = vpack.c.bf16 %v562_v46, %v562_v46  ;;  %v911_v52 = vpack.c.bf16 %v544_v47, %v544_v47  ;;  %v967_v54 = vpop.f32.mrb[8].mxu0 }
  0xf9   : > { %720 = vst.msk [vmem:[%s1153_s28 + $0x50] sm:$0xf] %vm699_vm3, %v926_v48  ;;  %707 = vst.msk [vmem:[%s1153_s28 + $0x1c] sm:$0xf] %vm699_vm3, %v913_v49  ;;  %v927_v55 = vpack.c.bf16 %v560_v50, %v560_v50  ;;  %v453_v56 = vadd.f32 %v967_v54, %v1142_v53  ;;  %v983_v57 = vpop.f32.mrb[8].mxu1  ;;  %v444_v58 = vpop.f32.mrb[9].mxu0 }
  0xfa   : > { %723 = vst.msk [vmem:[%s1153_s28 + $0x5c] sm:$0xf] %vm699_vm3, %v929_v51  ;;  %705 = vst.msk [vmem:[%s1153_s28 + $0x14] sm:$0xf] %vm699_vm3, %v911_v52  ;;  %v517_v59 = vadd.f32 %v983_v57, %v1142_v53  ;;  %v445_v60 = vadd.f32 %v1142_v53, %v444_v58  ;;  %v508_v61 = vpop.f32.mrb[9].mxu1  ;;  %v968_v62 = vpop.f32.mrb[10].mxu0 }
  0xfb   : > { %721 = vst.msk [vmem:[%s1153_s28 + $0x54] sm:$0xf] %vm699_vm3, %v927_v55  ;;  %v549_v63 = vmax.f32 %v453_v56, 0.0  ;;  %v509_v0 = vadd.f32 %v1142_v53, %v508_v61  ;;  %v456_v1 = vadd.f32 %v968_v62, %v1142_v53  ;;  %v984_v2 = vpop.f32.mrb[10].mxu1  ;;  %v447_v3 = vpop.f32.mrb[11].mxu0 }
  0xfc   : > { %v565_v4 = vmax.f32 %v517_v59, 0.0  ;;  %v547_v5 = vmax.f32 %v445_v60, 0.0  ;;  %v520_v6 = vadd.f32 %v984_v2, %v1142_v53  ;;  %v448_v7 = vadd.f32 %v1142_v53, %v447_v3  ;;  %v511_v8 = vpop.f32.mrb[11].mxu1 }
  0xfd   : > { %v916_v9 = vpack.c.bf16 %v549_v63, %v549_v63  ;;  %v563_v10 = vmax.f32 %v509_v0, 0.0  ;;  %v550_v11 = vmax.f32 %v456_v1, 0.0  ;;  %v512_v12 = vadd.f32 %v1142_v53, %v511_v8 }
  0xfe   : > { %v932_v13 = vpack.c.bf16 %v565_v4, %v565_v4  ;;  %v914_v14 = vpack.c.bf16 %v547_v5, %v547_v5  ;;  %v566_v15 = vmax.f32 %v520_v6, 0.0  ;;  %v548_v16 = vmax.f32 %v448_v7, 0.0 }
  0xff   : > { %710 = vst.msk [vmem:[%s1153_s28 + $0x28] sm:$0xf] %vm699_vm3, %v916_v9  ;;  %v930_v17 = vpack.c.bf16 %v563_v10, %v563_v10  ;;  %v917_v18 = vpack.c.bf16 %v550_v11, %v550_v11  ;;  %v564_v19 = vmax.f32 %v512_v12, 0.0 }
 0x100   : > { %726 = vst.msk [vmem:[%s1153_s28 + $0x68] sm:$0xf] %vm699_vm3, %v932_v13  ;;  %708 = vst.msk [vmem:[%s1153_s28 + $0x20] sm:$0xf] %vm699_vm3, %v914_v14  ;;  %v933_v20 = vpack.c.bf16 %v566_v15, %v566_v15  ;;  %v915_v21 = vpack.c.bf16 %v548_v16, %v548_v16  ;;  %v971_v22 = vpop.f32.mrb[12].mxu0 }
 0x101   : > { %724 = vst.msk [vmem:[%s1153_s28 + $0x60] sm:$0xf] %vm699_vm3, %v930_v17  ;;  %711 = vst.msk [vmem:[%s1153_s28 + $0x2c] sm:$0xf] %vm699_vm3, %v917_v18  ;;  %v931_v23 = vpack.c.bf16 %v564_v19, %v564_v19  ;;  %v469_v24 = vadd.f32 %v971_v22, %v1142_v53  ;;  %v987_v25 = vpop.f32.mrb[12].mxu1  ;;  %v460_v26 = vpop.f32.mrb[13].mxu0 }
 0x102   : > { %727 = vst.msk [vmem:[%s1153_s28 + $0x6c] sm:$0xf] %vm699_vm3, %v933_v20  ;;  %709 = vst.msk [vmem:[%s1153_s28 + $0x24] sm:$0xf] %vm699_vm3, %v915_v21  ;;  %v533_v27 = vadd.f32 %v987_v25, %v1142_v53  ;;  %v461_v28 = vadd.f32 %v1142_v53, %v460_v26  ;;  %v524_v29 = vpop.f32.mrb[13].mxu1  ;;  %v972_v30 = vpop.f32.mrb[14].mxu0 }
 0x103   : > { %725 = vst.msk [vmem:[%s1153_s28 + $0x64] sm:$0xf] %vm699_vm3, %v931_v23  ;;  %v553_v31 = vmax.f32 %v469_v24, 0.0  ;;  %v525_v32 = vadd.f32 %v1142_v53, %v524_v29  ;;  %v472_v33 = vadd.f32 %v972_v30, %v1142_v53  ;;  %v988_v34 = vpop.f32.mrb[14].mxu1  ;;  %v463_v35 = vpop.f32.mrb[15].mxu0 }
 0x104   : > { %v569_v36 = vmax.f32 %v533_v27, 0.0  ;;  %v551_v37 = vmax.f32 %v461_v28, 0.0  ;;  %v536_v38 = vadd.f32 %v988_v34, %v1142_v53  ;;  %v464_v39 = vadd.f32 %v1142_v53, %v463_v35  ;;  %v527_v40 = vpop.f32.mrb[15].mxu1 }
 0x105   : > { %v920_v41 = vpack.c.bf16 %v553_v31, %v553_v31  ;;  %v567_v42 = vmax.f32 %v525_v32, 0.0  ;;  %v554_v43 = vmax.f32 %v472_v33, 0.0  ;;  %v528_v44 = vadd.f32 %v1142_v53, %v527_v40 }
 0x106   : > { %v936_v45 = vpack.c.bf16 %v569_v36, %v569_v36  ;;  %v918_v46 = vpack.c.bf16 %v551_v37, %v551_v37  ;;  %v570_v47 = vmax.f32 %v536_v38, 0.0  ;;  %v552_v48 = vmax.f32 %v464_v39, 0.0 }
 0x107   : > { %714 = vst.msk [vmem:[%s1153_s28 + $0x38] sm:$0xf] %vm699_vm3, %v920_v41  ;;  %v934_v49 = vpack.c.bf16 %v567_v42, %v567_v42  ;;  %v921_v50 = vpack.c.bf16 %v554_v43, %v554_v43  ;;  %v568_v51 = vmax.f32 %v528_v44, 0.0 }
 0x108   : > { %730 = vst.msk [vmem:[%s1153_s28 + $0x78] sm:$0xf] %vm699_vm3, %v936_v45  ;;  %712 = vst.msk [vmem:[%s1153_s28 + $0x30] sm:$0xf] %vm699_vm3, %v918_v46  ;;  %v937_v52 = vpack.c.bf16 %v570_v47, %v570_v47  ;;  %v919_v54 = vpack.c.bf16 %v552_v48, %v552_v48 }
 0x109   : > { %728 = vst.msk [vmem:[%s1153_s28 + $0x70] sm:$0xf] %vm699_vm3, %v934_v49  ;;  %715 = vst.msk [vmem:[%s1153_s28 + $0x3c] sm:$0xf] %vm699_vm3, %v921_v50  ;;  %v935_v53 = vpack.c.bf16 %v568_v51, %v568_v51 }
 0x10a   : > { %731 = vst.msk [vmem:[%s1153_s28 + $0x7c] sm:$0xf] %vm699_vm3, %v937_v52  ;;  %713 = vst.msk [vmem:[%s1153_s28 + $0x34] sm:$0xf] %vm699_vm3, %v919_v54 }
 0x10b   : > { %729 = vst.msk [vmem:[%s1153_s28 + $0x74] sm:$0xf] %vm699_vm3, %v935_v53 }
 0x10c PF: > { %s13_s14 = sadd.s32 1, %s1039_s14   ;;  %s1259_s12 = smov %s1035_s13 }
 0x10d   : > { %p10_p5 = scmp.ge.s32.totalorder %s13_s14, 4   ;;  %s1260_s13 = smov %s1262_s15 }
 0x10f   :  { %12 = sbr.rel (!%p10_p5) target bundleno = 2 (0x2), region = 68 }

// kernel: conformer_encoder.28
= control target key start
LH: loop header
LB: loop body
LE: loop exit
PB: predicated region body
PF: predicated region fallthrough
CT: control target
= control target key end

     0   :  { %vm280_vm0 = vcmask 261120   ;;  %vm521_vm1 = vcmask 257024   ;;  %s938_s1 = inlined_call_operand.vmem [shape: bf16[288,32], index: 1, kind: input, shape index: {}]   ;;  %s939_s0 = inlined_call_operand.vmem [shape: bf16[96,288], index: 0, kind: input, shape index: {}]   ;;  %s940_s2 = inlined_call_operand.vmem [shape: f32[1,32], index: 2, kind: input, shape index: {}]   ;;  %s941_s3 = inlined_call_operand.vmem [shape: bf16[96,32], index: 3, kind: output, shape index: {}]  }
   0x1   :  { %v697_v0 = vld [vmem:[%s938_s1 + $0x40] sm:$0xff]   ;;  %v699_v2 = vld [vmem:[%s938_s1 + $0x48] sm:$0xff]   ;;  %v701_v4 = vld [vmem:[%s938_s1 + $0x50] sm:$0xff]  }
   0x2   :  { %v698_v1 = vld [vmem:[%s938_s1] sm:$0xff]   ;;  %605 = vmatprep.subr.bf16.mxu0 %v697_v0  ;;  %681 = vmatprep.subr.bf16.mxu1 %v697_v0  ;;  %v700_v3 = vld [vmem:[%s938_s1 + $0x8] sm:$0xff]   ;;  %v702_v5 = vld [vmem:[%s938_s1 + $0x10] sm:$0xff]  }
   0x3   :  { %606 = vmatpush3.bf16.msra.mxu0 %v698_v1  ;;  %689 = vmatpush3.bf16.msra.mxu1 %v698_v1  ;;  %v703_v6 = vld [vmem:[%s938_s1 + $0x58] sm:$0xff]   ;;  %v705_v8 = vld [vmem:[%s938_s1 + $0x60] sm:$0xff]   ;;  %v707_v10 = vld [vmem:[%s938_s1 + $0x68] sm:$0xff]  }
   0x4   :  { %607 = vmatprep.subr.bf16.mxu0 %v699_v2  ;;  %682 = vmatprep.subr.bf16.mxu1 %v699_v2  ;;  %v704_v7 = vld [vmem:[%s938_s1 + $0x18] sm:$0xff]   ;;  %v706_v9 = vld [vmem:[%s938_s1 + $0x20] sm:$0xff]   ;;  %v708_v13 = vld [vmem:[%s938_s1 + $0x28] sm:$0xff]  }
   0x5   :  { %v715_v11 = vld [vmem:[%s939_s0 + $0x4] ss:$12 sps:$4 sm:$0xff]   ;;  %v718_v12 = vld [vmem:[%s939_s0 + $0x7c] ss:$12 sps:$4 sm:$0xff]   ;;  %v713_v19 = vld [vmem:[%s939_s0] ss:$12 sps:$4 sm:$0xff]  }
   0x6   :  { %v709_v14 = vld [vmem:[%s938_s1 + $0x70] sm:$0xff]   ;;  %331 = vmatprep.mubr.bf16.mxu0 %v715_v11  ;;  %371 = vmatprep.mubr.bf16.mxu1 %v718_v12  ;;  %v711_v16 = vld [vmem:[%s938_s1 + $0x78] sm:$0xff]   ;;  %v719_v18 = vld [vmem:[%s938_s1 + $0x80] sm:$0xff]  }
   0x7   :  { %608 = vmatpush3.bf16.msra.mxu0 %v700_v3  ;;  %690 = vmatpush3.bf16.msra.mxu1 %v700_v3  ;;  %v710_v15 = vld [vmem:[%s938_s1 + $0x30] sm:$0xff]   ;;  %v712_v17 = vld [vmem:[%s938_s1 + $0x38] sm:$0xff]   ;;  %v720_v22 = vld [vmem:[%s938_s1 + $0x88] sm:$0xff]  }
   0x8   :  { %609 = vmatprep.subr.bf16.mxu0 %v701_v4  ;;  %683 = vmatprep.subr.bf16.mxu1 %v701_v4  ;;  %v716_v20 = vld [vmem:[%s939_s0 + $0x78] ss:$12 sps:$4 sm:$0xff]   ;;  %v721_v21 = vld [vmem:[%s939_s0 + $0x1c] ss:$12 sps:$4 sm:$0xff]   ;;  %v725_v25 = vld [vmem:[%s939_s0 + $0x20] ss:$12 sps:$4 sm:$0xff]  }
   0x9   :  { %v723_v23 = vld [vmem:[%s939_s0 + $0x8] ss:$12 sps:$4 sm:$0xff]   ;;  %v724_v24 = vld [vmem:[%s939_s0 + $0x18] ss:$12 sps:$4 sm:$0xff]   ;;  %v729_v28 = vld [vmem:[%s939_s0 + $0x30] ss:$12 sps:$4 sm:$0xff]  }
   0xa   :  { %v726_v26 = vld [vmem:[%s939_s0 + $0x34] ss:$12 sps:$4 sm:$0xff]   ;;  %v728_v27 = vld [vmem:[%s939_s0 + $0x38] ss:$12 sps:$4 sm:$0xff]   ;;  %v730_v29 = vld [vmem:[%s939_s0 + $0x50] ss:$12 sps:$4 sm:$0xff]  }
   0xb   :  { %610 = vmatpush3.bf16.msra.mxu0 %v702_v5  ;;  %691 = vmatpush3.bf16.msra.mxu1 %v702_v5  ;;  %v731_v30 = vld [vmem:[%s939_s0 + $0x4c] ss:$12 sps:$4 sm:$0xff]   ;;  %v733_v31 = vld [vmem:[%s939_s0 + $0x68] ss:$12 sps:$4 sm:$0xff]   ;;  %v736_v34 = vld [vmem:[%s939_s0 + $0x64] ss:$12 sps:$4 sm:$0xff]  }
   0xc   :  { %611 = vmatprep.subr.bf16.mxu0 %v703_v6  ;;  %684 = vmatprep.subr.bf16.mxu1 %v703_v6  ;;  %v734_v32 = vld [vmem:[%s939_s0 + $0x48] ss:$12 sps:$4 sm:$0xff]   ;;  %v735_v33 = vld [vmem:[%s939_s0 + $0x80] ss:$12 sps:$4 sm:$0xff]  }
   0xd   :  { %v738_v35 = vld [vmem:[%s939_s0 + $0x60] ss:$12 sps:$4 sm:$0xff]  }
   0xe   :  { %v876_v48 = vld [vmem:[%s940_s2] ss:$0 sm:$0xff] }
   0xf   :  { %612 = vmatpush3.bf16.msra.mxu0 %v704_v7  ;;  %692 = vmatpush3.bf16.msra.mxu1 %v704_v7 }
  0x10   :  { %613 = vmatprep.subr.bf16.mxu0 %v705_v8  ;;  %685 = vmatprep.subr.bf16.mxu1 %v705_v8 }
  0x13   :  { %614 = vmatpush3.bf16.msra.mxu0 %v706_v9  ;;  %693 = vmatpush3.bf16.msra.mxu1 %v706_v9 }
  0x14   :  { %615 = vmatprep.subr.bf16.mxu0 %v707_v10  ;;  %686 = vmatprep.subr.bf16.mxu1 %v707_v10 }
  0x17   :  { %616 = vmatpush3.bf16.msra.mxu0 %v708_v13  ;;  %694 = vmatpush3.bf16.msra.mxu1 %v708_v13 }
  0x18   :  { %617 = vmatprep.subr.bf16.mxu0 %v709_v14  ;;  %687 = vmatprep.subr.bf16.mxu1 %v709_v14 }
  0x1b   :  { %618 = vmatpush3.bf16.msra.mxu0 %v710_v15  ;;  %695 = vmatpush3.bf16.msra.mxu1 %v710_v15 }
  0x1c   :  { %619 = vmatprep.subr.bf16.mxu0 %v711_v16  ;;  %688 = vmatprep.subr.bf16.mxu1 %v711_v16 }
  0x1f   :  { %620 = vmatpush3.bf16.msra.mxu0 %v712_v17  ;;  %696 = vmatpush3.bf16.msra.mxu1 %v712_v17 }
  0x20   :  { %665 = vmatprep.subr.bf16.mxu1 %v719_v18 }
  0x22   :  { %332 = vmatmul.mubr.bf16.vlgmr.msra.gmra.mrb[0].mxu0 %v713_v19  ;;  %372 = vmatmul.mubr.bf16.vlgmr.msra.gmra.mrb[0].mxu1 %v716_v20 }
  0x23   :  { %666 = vmatpush3.bf16.msra.mxu1 %v719_v18  ;;  %339 = vmatprep.mubr.bf16.mxu0 %v721_v21 }
  0x24   :  { %667 = vmatprep.subr.bf16.mxu1 %v720_v22  ;;  %669 = vmatprep.mubr.msk.bf16.mxu1 %vm280_vm0, %v723_v23 }
  0x27   :  { %668 = vmatpush3.bf16.msra.mxu1 %v720_v22 }
  0x2a   :  { %340 = vmatmul.mubr.bf16.gmra.mrb[4].mxu0 %v724_v24  ;;  %670 = vmatmul.mubr.msk.bf16.vlgmr.msra.gmra.mrb[4].mxu1 %vm280_vm0, %v725_v25 }
  0x2b   :  { %347 = vmatprep.mubr.bf16.mxu0 %v726_v26  ;;  %673 = vmatprep.mubr.msk.bf16.mxu1 %vm280_vm0, %v728_v27 }
  0x32   :  { %348 = vmatmul.mubr.bf16.gmra.mrb[8].mxu0 %v729_v28  ;;  %674 = vmatmul.mubr.msk.bf16.gmra.mrb[8].mxu1 %vm280_vm0, %v730_v29 }
  0x33   :  { %355 = vmatprep.mubr.bf16.mxu0 %v731_v30  ;;  %677 = vmatprep.mubr.msk.bf16.mxu1 %vm280_vm0, %v733_v31 }
  0x3a   :  { %356 = vmatmul.mubr.bf16.gmra.mrb[12].mxu0 %v734_v32  ;;  %678 = vmatmul.mubr.msk.bf16.gmra.mrb[12].mxu1 %vm280_vm0, %v735_v33 }
  0x3b   :  { %363 = vmatprep.mubr.bf16.mxu0 %v736_v34 }
  0x42   :  { %364 = vmatmul.mubr.bf16.gmra.mrb[16].mxu0 %v738_v35 }
  0xf5   :  { %v621_v36 = vpop.f32.mrb[0].mxu0  ;;  %v651_v37 = vpop.f32.mrb[0].mxu1 }
  0xf6   :  { %v622_v38 = vpop.f32.mrb[1].mxu0  ;;  %v652_v39 = vpop.f32.mrb[1].mxu1 }
  0xf7   :  { %v623_v40 = vadd.f32 %v622_v38, %v621_v36  ;;  %v624_v41 = vpop.f32.mrb[2].mxu0  ;;  %v653_v42 = vadd.f32 %v652_v39, %v651_v37  ;;  %v654_v43 = vpop.f32.mrb[2].mxu1 }
  0xf8   :  { %v625_v44 = vpop.f32.mrb[3].mxu0  ;;  %v655_v45 = vpop.f32.mrb[3].mxu1 }
  0xf9   :  { %v626_v46 = vadd.f32 %v625_v44, %v624_v41  ;;  %v656_v47 = vadd.f32 %v655_v45, %v654_v43  ;;  %v334_v51 = vadd.f32 %v623_v40, %v876_v48  ;;  %v374_v24 = vadd.f32 %v653_v42, %v876_v48 }
  0xfb   :  { %v337_v58 = vadd.f32 %v626_v46, %v876_v48  ;;  %v377_v32 = vadd.f32 %v656_v47, %v876_v48 }
  0xfd   :  { %v627_v49 = vpop.f32.mrb[4].mxu0  ;;  %v671_v50 = vpop.f32.mrb[4].mxu1 }
  0xfe   :  { %v628_v52 = vpop.f32.mrb[5].mxu0  ;;  %v414_v53 = vpop.f32.mrb[5].mxu1 }
  0xff   :  { %v629_v54 = vadd.f32 %v628_v52, %v627_v49  ;;  %v415_v55 = vadd.f32 %v414_v53, %v334_v51  ;;  %v630_v56 = vpop.f32.mrb[6].mxu0  ;;  %v672_v57 = vpop.f32.mrb[6].mxu1 }
 0x100   :  { %v631_v59 = vpop.f32.mrb[7].mxu0  ;;  %v417_v60 = vpop.f32.mrb[7].mxu1 }
 0x101   :  { %v342_v61 = vadd.f32 %v629_v54, %v876_v48  ;;  %v461_v62 = vmax.f32 %v415_v55, 0.0  ;;  %v632_v63 = vadd.f32 %v631_v59, %v630_v56  ;;  %v418_v0 = vadd.f32 %v417_v60, %v337_v58 }
 0x103   :  { %v423_v1 = vadd.f32 %v671_v50, %v342_v61  ;;  %v593_v2 = vpack.c.bf16 %v461_v62, %v461_v62  ;;  %v345_v3 = vadd.f32 %v632_v63, %v876_v48  ;;  %v462_v4 = vmax.f32 %v418_v0, 0.0 }
 0x105   :  { %v463_v5 = vmax.f32 %v423_v1, 0.0  ;;  %522 = vst.msk [vmem:[%s941_s3] sm:$0xf] %vm521_vm1, %v593_v2  ;;  %v426_v6 = vadd.f32 %v672_v57, %v345_v3  ;;  %v594_v7 = vpack.c.bf16 %v462_v4, %v462_v4  ;;  %v633_v8 = vpop.f32.mrb[8].mxu0  ;;  %v675_v9 = vpop.f32.mrb[8].mxu1 }
 0x106   :  { %v634_v10 = vpop.f32.mrb[9].mxu0  ;;  %v430_v11 = vpop.f32.mrb[9].mxu1 }
 0x107   :  { %v595_v12 = vpack.c.bf16 %v463_v5, %v463_v5  ;;  %v464_v13 = vmax.f32 %v426_v6, 0.0  ;;  %523 = vst.msk [vmem:[%s941_s3 + $0x4] sm:$0xf] %vm521_vm1, %v594_v7  ;;  %v635_v14 = vadd.f32 %v634_v10, %v633_v8  ;;  %v636_v15 = vpop.f32.mrb[10].mxu0  ;;  %v676_v16 = vpop.f32.mrb[10].mxu1 }
 0x108   :  { %v637_v17 = vpop.f32.mrb[11].mxu0  ;;  %v433_v18 = vpop.f32.mrb[11].mxu1 }
 0x109   :  { %524 = vst.msk [vmem:[%s941_s3 + $0x8] sm:$0xf] %vm521_vm1, %v595_v12  ;;  %v596_v19 = vpack.c.bf16 %v464_v13, %v464_v13  ;;  %v638_v20 = vadd.f32 %v637_v17, %v636_v15  ;;  %v350_v21 = vadd.f32 %v635_v14, %v876_v48 }
 0x10b   :  { %525 = vst.msk [vmem:[%s941_s3 + $0xc] sm:$0xf] %vm521_vm1, %v596_v19  ;;  %v431_v22 = vadd.f32 %v430_v11, %v350_v21  ;;  %v353_v23 = vadd.f32 %v638_v20, %v876_v48 }
 0x10d   :  { %v465_v25 = vmax.f32 %v431_v22, 0.0  ;;  %v434_v26 = vadd.f32 %v433_v18, %v353_v23  ;;  %v639_v27 = vpop.f32.mrb[12].mxu0  ;;  %v679_v28 = vpop.f32.mrb[12].mxu1 }
 0x10e   :  { %v455_v29 = vadd.f32 %v679_v28, %v374_v24  ;;  %v640_v30 = vpop.f32.mrb[13].mxu0  ;;  %v446_v31 = vpop.f32.mrb[13].mxu1 }
 0x10f   :  { %v597_v33 = vpack.c.bf16 %v465_v25, %v465_v25  ;;  %v466_v34 = vmax.f32 %v434_v26, 0.0  ;;  %v641_v35 = vadd.f32 %v640_v30, %v639_v27  ;;  %v642_v36 = vpop.f32.mrb[14].mxu0  ;;  %v680_v37 = vpop.f32.mrb[14].mxu1 }
 0x110   :  { %v471_v38 = vmax.f32 %v455_v29, 0.0  ;;  %v458_v39 = vadd.f32 %v680_v37, %v377_v32  ;;  %v643_v40 = vpop.f32.mrb[15].mxu0  ;;  %v449_v41 = vpop.f32.mrb[15].mxu1 }
 0x111   :  { %526 = vst.msk [vmem:[%s941_s3 + $0x10] sm:$0xf] %vm521_vm1, %v597_v33  ;;  %v598_v42 = vpack.c.bf16 %v466_v34, %v466_v34  ;;  %v358_v43 = vadd.f32 %v641_v35, %v876_v48  ;;  %v644_v44 = vadd.f32 %v643_v40, %v642_v36 }
 0x112   :  { %v603_v45 = vpack.c.bf16 %v471_v38, %v471_v38  ;;  %v472_v46 = vmax.f32 %v458_v39, 0.0 }
 0x113   :  { %527 = vst.msk [vmem:[%s941_s3 + $0x14] sm:$0xf] %vm521_vm1, %v598_v42  ;;  %v439_v47 = vadd.f32 %v675_v9, %v358_v43  ;;  %v361_v49 = vadd.f32 %v644_v44, %v876_v48 }
 0x114   :  { %532 = vst.msk [vmem:[%s941_s3 + $0x28] sm:$0xf] %vm521_vm1, %v603_v45  ;;  %v604_v50 = vpack.c.bf16 %v472_v46, %v472_v46 }
 0x115   :  { %v467_v51 = vmax.f32 %v439_v47, 0.0  ;;  %v442_v52 = vadd.f32 %v676_v16, %v361_v49  ;;  %v645_v53 = vpop.f32.mrb[16].mxu0 }
 0x116   :  { %533 = vst.msk [vmem:[%s941_s3 + $0x2c] sm:$0xf] %vm521_vm1, %v604_v50  ;;  %v646_v54 = vpop.f32.mrb[17].mxu0 }
 0x117   :  { %v599_v55 = vpack.c.bf16 %v467_v51, %v467_v51  ;;  %v468_v56 = vmax.f32 %v442_v52, 0.0  ;;  %v647_v57 = vadd.f32 %v646_v54, %v645_v53  ;;  %v648_v58 = vpop.f32.mrb[18].mxu0 }
 0x118   :  { %v649_v59 = vpop.f32.mrb[19].mxu0 }
 0x119   :  { %528 = vst.msk [vmem:[%s941_s3 + $0x18] sm:$0xf] %vm521_vm1, %v599_v55  ;;  %v600_v60 = vpack.c.bf16 %v468_v56, %v468_v56  ;;  %v366_v61 = vadd.f32 %v647_v57, %v876_v48  ;;  %v650_v62 = vadd.f32 %v649_v59, %v648_v58 }
 0x11b   :  { %529 = vst.msk [vmem:[%s941_s3 + $0x1c] sm:$0xf] %vm521_vm1, %v600_v60  ;;  %v447_v63 = vadd.f32 %v446_v31, %v366_v61  ;;  %v369_v0 = vadd.f32 %v650_v62, %v876_v48 }
 0x11d   :  { %v469_v1 = vmax.f32 %v447_v63, 0.0  ;;  %v450_v2 = vadd.f32 %v449_v41, %v369_v0 }
 0x11f   :  { %v601_v3 = vpack.c.bf16 %v469_v1, %v469_v1  ;;  %v470_v4 = vmax.f32 %v450_v2, 0.0 }
 0x121   :  { %530 = vst.msk [vmem:[%s941_s3 + $0x20] sm:$0xf] %vm521_vm1, %v601_v3  ;;  %v602_v5 = vpack.c.bf16 %v470_v4, %v470_v4 }
 0x123   :  { %531 = vst.msk [vmem:[%s941_s3 + $0x24] sm:$0xf] %vm521_vm1, %v602_v5 }

// kernel: conformer_encoder.29
= control target key start
LH: loop header
LB: loop body
LE: loop exit
PB: predicated region body
PF: predicated region fallthrough
CT: control target
= control target key end

     0   :  { %vm84_vm0 = vcmask 785408   ;;  %vm156_vm1 = vcmask 257024   ;;  %s277_s1 = inlined_call_operand.vmem [shape: bf16[96,32], index: 1, kind: input, shape index: {}]   ;;  %s278_s0 = inlined_call_operand.vmem [shape: bf16[32,96], index: 0, kind: input, shape index: {}]   ;;  %s279_s2 = inlined_call_operand.vmem [shape: f32[1,32], index: 2, kind: input, shape index: {}]   ;;  %s280_s3 = inlined_call_operand.vmem [shape: bf16[32,32], index: 3, kind: output, shape index: {}]  }
   0x1   :  { %v208_v0 = vld [vmem:[%s277_s1] sm:$0xff]   ;;  %v209_v1 = vld [vmem:[%s277_s1 + $0x8] sm:$0xff]   ;;  %v210_v2 = vld [vmem:[%s277_s1 + $0x10] sm:$0xff]  }
   0x2   :  { %192 = vmatprep.subr.bf16.mxu0 %v208_v0  ;;  %v214_v3 = vld [vmem:[%s278_s0] sm:$0xff]   ;;  %v211_v4 = vld [vmem:[%s277_s1 + $0x18] sm:$0xff]   ;;  %v213_v6 = vld [vmem:[%s277_s1 + $0x28] sm:$0xff]  }
   0x3   :  { %193 = vmatpush3.bf16.msra.mxu0 %v208_v0  ;;  %204 = vmatprep.mubr.msk.bf16.mxu0 %vm84_vm0, %v214_v3  ;;  %v212_v5 = vld [vmem:[%s277_s1 + $0x20] sm:$0xff]   ;;  %v215_v7 = vld [vmem:[%s278_s0 + $0x8] sm:$0xff]  }
   0x4   :  { %194 = vmatprep.subr.bf16.mxu0 %v209_v1  ;;  %v165_v8 = vld [vmem:[%s279_s2] ss:$0 sm:$0xff] }
   0x7   :  { %195 = vmatpush3.bf16.msra.mxu0 %v209_v1 }
   0x8   :  { %196 = vmatprep.subr.bf16.mxu0 %v210_v2 }
   0xb   :  { %197 = vmatpush3.bf16.msra.mxu0 %v210_v2 }
   0xc   :  { %198 = vmatprep.subr.bf16.mxu0 %v211_v4 }
   0xf   :  { %199 = vmatpush3.bf16.msra.mxu0 %v211_v4 }
  0x10   :  { %200 = vmatprep.subr.bf16.mxu0 %v212_v5 }
  0x13   :  { %201 = vmatpush3.bf16.msra.mxu0 %v212_v5 }
  0x14   :  { %202 = vmatprep.subr.bf16.mxu0 %v213_v6 }
  0x17   :  { %203 = vmatpush3.bf16.msra.mxu0 %v213_v6 }
  0x1a   :  { %205 = vmatmul.mubr.msk.bf16.vlgmr.msra.gmra.mrb[0].mxu0 %vm84_vm0, %v215_v7 }
  0xed   :  { %v206_v9 = vpop.f32.mrb[0].mxu0 }
  0xee   :  { %v134_v10 = vadd.f32 %v206_v9, %v165_v8  ;;  %v125_v11 = vpop.f32.mrb[1].mxu0 }
  0xef   :  { %v126_v12 = vadd.f32 %v165_v8, %v125_v11  ;;  %v207_v13 = vpop.f32.mrb[2].mxu0 }
  0xf0   :  { %v182_v14 = vpack.c.bf16 %v134_v10, %v134_v10  ;;  %v137_v15 = vadd.f32 %v207_v13, %v165_v8  ;;  %v128_v16 = vpop.f32.mrb[3].mxu0 }
  0xf1   :  { %v180_v17 = vpack.c.bf16 %v126_v12, %v126_v12  ;;  %v129_v18 = vadd.f32 %v165_v8, %v128_v16 }
  0xf2   :  { %159 = vst.msk [vmem:[%s280_s3 + $0x8] sm:$0xf] %vm156_vm1, %v182_v14  ;;  %v183_v19 = vpack.c.bf16 %v137_v15, %v137_v15 }
  0xf3   :  { %157 = vst.msk [vmem:[%s280_s3] sm:$0xf] %vm156_vm1, %v180_v17  ;;  %v181_v20 = vpack.c.bf16 %v129_v18, %v129_v18 }
  0xf4   :  { %160 = vst.msk [vmem:[%s280_s3 + $0xc] sm:$0xf] %vm156_vm1, %v183_v19 }
  0xf5   :  { %158 = vst.msk [vmem:[%s280_s3 + $0x4] sm:$0xf] %vm156_vm1, %v181_v20 }

// kernel: conformer_encoder.30
= control target key start
LH: loop header
LB: loop body
LE: loop exit
PB: predicated region body
PF: predicated region fallthrough
CT: control target
= control target key end

     0   :  { %vm29_vm0 = vcmask 261120   ;;  %s381_s0 = inlined_call_operand.vmem [shape: bf16[32,32], index: 0, kind: input, shape index: {}]   ;;  %s382_s1 = inlined_call_operand.vmem [shape: bf16[32,128], index: 1, kind: input, shape index: {}]   ;;  %s383_s3 = inlined_call_operand.vmem [shape: f32[1,32], index: 3, kind: input, shape index: {}]   ;;  %s384_s4 = inlined_call_operand.vmem [shape: f32[1,32], index: 4, kind: input, shape index: {}]   ;;  %s385_s2 = inlined_call_operand.vmem [shape: f32[1,128], index: 2, kind: input, shape index: {}]   ;;  %s386_s5 = inlined_call_operand.vmem [shape: bf16[32,128], index: 5, kind: output, shape index: {}]  }
   0x1   :  { %v257_v0 = vld [vmem:[%s381_s0] sm:$0xff]   ;;  %v274_v1 = vld [vmem:[%s381_s0 + $0x8] sm:$0xff]  }
   0x2   :  { %v258_v2 = vunpack.c.l.bf16 %v257_v0  ;;  %v262_v3 = vunpack.c.l.bf16 %v274_v1  ;;  %v259_v4 = vunpack.c.h.bf16 %v257_v0  ;;  %v263_v5 = vunpack.c.h.bf16 %v274_v1  ;;  %v288_v30 = vld [vmem:[%s382_s1] sm:$0xff]   ;;  %v289_v31 = vld [vmem:[%s382_s1 + $0x8] sm:$0xff]  }
   0x3   :  { %280 = vmatprep.subr.bf16.mxu0 %v288_v30  ;;  %v237_v46 = vld [vmem:[%s383_s3] ss:$0 sm:$0xff] }
   0x4   :  { %v30_v6 = vsel %vm29_vm0, %v258_v2, 0.0  ;;  %v36_v7 = vsel %vm29_vm0, %v262_v3, 0.0  ;;  %v33_v8 = vsel %vm29_vm0, %v259_v4, 0.0  ;;  %v39_v9 = vsel %vm29_vm0, %v263_v5, 0.0  ;;  %281 = vmatpush3.bf16.msra.mxu0 %v288_v30  ;;  %v238_v52 = vld [vmem:[%s384_s4] ss:$0 sm:$0xff] }
   0x5   :  { %31 = vadd.xlane.f32.xlu0 %v30_v6  ;;  %37 = vadd.xlane.f32.xlu1 %v36_v7  ;;  %v239_v0 = vld [vmem:[%s385_s2] ss:$0 sm:$0xff] }
   0x6   :  { %282 = vmatprep.subr.bf16.mxu0 %v289_v31 }
   0x8   :  { %283 = vmatpush3.bf16.msra.mxu0 %v289_v31 }
   0x9   :  { %34 = vadd.xlane.f32.xlu0 %v33_v8  ;;  %40 = vadd.xlane.f32.xlu1 %v39_v9 }
  0x92   :  { %v32_v10 = vpop.xlane.xlu0 %31  ;;  %v38_v11 = vpop.xlane.xlu1 %37 }
  0x93   :  { %v43_v12 = vmul.f32 0.03125, %v32_v10  ;;  %v45_v13 = vmul.f32 0.03125, %v38_v11 }
  0x95   :  { %v47_v14 = vsub.f32 %v258_v2, %v43_v12  ;;  %v49_v15 = vsub.f32 %v262_v3, %v45_v13 }
  0x96   :  { %v35_v16 = vpop.xlane.xlu0 %34  ;;  %v41_v17 = vpop.xlane.xlu1 %40 }
  0x97   :  { %v44_v18 = vmul.f32 0.03125, %v35_v16  ;;  %v46_v19 = vmul.f32 0.03125, %v41_v17  ;;  %v51_v20 = vmul.f32 %v47_v14, %v47_v14  ;;  %v53_v21 = vmul.f32 %v49_v15, %v49_v15 }
  0x99   :  { %v48_v22 = vsub.f32 %v259_v4, %v44_v18  ;;  %v50_v23 = vsub.f32 %v263_v5, %v46_v19  ;;  %v55_v24 = vsel %vm29_vm0, %v51_v20, 0.0  ;;  %v61_v25 = vsel %vm29_vm0, %v53_v21, 0.0 }
  0x9a   :  { %56 = vadd.xlane.f32.xlu0 %v55_v24 }
  0x9b   :  { %v52_v26 = vmul.f32 %v48_v22, %v48_v22  ;;  %v54_v27 = vmul.f32 %v50_v23, %v50_v23 }
  0x9d   :  { %v58_v28 = vsel %vm29_vm0, %v52_v26, 0.0  ;;  %v64_v29 = vsel %vm29_vm0, %v54_v27, 0.0 }
  0x9e   :  { %62 = vadd.xlane.f32.xlu0 %v61_v25  ;;  %59 = vadd.xlane.f32.xlu1 %v58_v28 }
  0xa2   :  { %65 = vadd.xlane.f32.xlu1 %v64_v29 }
 0x127   :  { %v57_v32 = vpop.xlane.xlu0 %56 }
 0x128   :  { %v67_v33 = vmul.f32 0.03125, %v57_v32 }
 0x12a   :  { %v71_v34 = vadd.f32 1e-05, %v67_v33 }
 0x12b   :  { %v60_v35 = vpop.xlane.xlu1 %59  ;;  %v63_v36 = vpop.xlane.xlu0 %62 }
 0x12c   :  { %290 = vrsqrt.f32 %v71_v34  ;;  %v68_v37 = vmul.f32 0.03125, %v60_v35  ;;  %v69_v38 = vmul.f32 0.03125, %v63_v36 }
 0x12e   :  { %v72_v39 = vadd.f32 1e-05, %v68_v37  ;;  %v73_v40 = vadd.f32 1e-05, %v69_v38 }
 0x12f   :  { %v66_v41 = vpop.xlane.xlu1 %65 }
 0x130   :  { %292 = vrsqrt.f32 %v72_v39  ;;  %v70_v42 = vmul.f32 0.03125, %v66_v41 }
 0x131   :  { %294 = vrsqrt.f32 %v73_v40 }
 0x132   :  { %v74_v43 = vadd.f32 1e-05, %v70_v42 }
 0x134   :  { %296 = vrsqrt.f32 %v74_v43 }
 0x136   :  { %v291_v44 = vpop.eup %290 }
 0x137   :  { %v79_v45 = vmul.f32 %v291_v44, %v47_v14 }
 0x139   :  { %v90_v50 = vmul.f32 %v237_v46, %v79_v45 }
 0x13a   :  { %v293_v47 = vpop.eup %292 }
 0x13b   :  { %v295_v48 = vpop.eup %294  ;;  %v80_v49 = vmul.f32 %v293_v47, %v48_v22  ;;  %v101_v56 = vadd.f32 %v238_v52, %v90_v50 }
 0x13c   :  { %v81_v51 = vmul.f32 %v295_v48, %v49_v15 }
 0x13d   :  { %v91_v53 = vmul.f32 %v237_v46, %v80_v49 }
 0x13e   :  { %v297_v54 = vpop.eup %296  ;;  %v92_v58 = vmul.f32 %v237_v46, %v81_v51 }
 0x13f   :  { %v82_v55 = vmul.f32 %v297_v54, %v50_v23  ;;  %v102_v57 = vadd.f32 %v238_v52, %v91_v53 }
 0x140   :  { %v103_v61 = vadd.f32 %v238_v52, %v92_v58 }
 0x141   :  { %v105_v59 = vpack.c.bf16 %v102_v57, %v101_v56  ;;  %v93_v60 = vmul.f32 %v237_v46, %v82_v55 }
 0x143   :  { %284 = vmatprep.mubr.msk.bf16.mxu0 %vm29_vm0, %v105_v59  ;;  %v104_v62 = vadd.f32 %v238_v52, %v93_v60 }
 0x145   :  { %v106_v63 = vpack.c.bf16 %v104_v62, %v103_v61 }
 0x147   :  { %285 = vmatmul.mubr.msk.bf16.vlgmr.msra.gmra.mrb[0].mxu0 %vm29_vm0, %v106_v63 }
 0x21a   :  { %v286_v1 = vpop.f32.mrb[0].mxu0 }
 0x21b   :  { %v179_v2 = vadd.f32 %v286_v1, %v239_v0  ;;  %v170_v3 = vpop.f32.mrb[1].mxu0 }
 0x21c   :  { %v171_v4 = vadd.f32 %v239_v0, %v170_v3  ;;  %v287_v5 = vpop.f32.mrb[2].mxu0 }
 0x21d   :  { %v246_v6 = vmul.f32 -1.442695, %v179_v2  ;;  %v182_v7 = vadd.f32 %v287_v5, %v239_v0  ;;  %v173_v8 = vpop.f32.mrb[3].mxu0 }
 0x21e   :  { %v244_v9 = vmul.f32 -1.442695, %v171_v4  ;;  %v174_v10 = vadd.f32 %v239_v0, %v173_v8 }
 0x21f   :  { %298 = vpow2.f32 %v246_v6  ;;  %v247_v11 = vmul.f32 -1.442695, %v182_v7 }
 0x220   :  { %300 = vpow2.f32 %v244_v9  ;;  %v245_v12 = vmul.f32 -1.442695, %v174_v10 }
 0x221   :  { %302 = vpow2.f32 %v247_v11 }
 0x222   :  { %304 = vpow2.f32 %v245_v12 }
 0x229   :  { %v299_v13 = vpop.eup %298 }
 0x22a   :  { %v301_v14 = vpop.eup %300  ;;  %v199_v15 = vadd.f32 1.0, %v299_v13 }
 0x22b   :  { %v303_v16 = vpop.eup %302  ;;  %v197_v17 = vadd.f32 1.0, %v301_v14 }
 0x22c   :  { %v305_v18 = vpop.eup %304  ;;  %306 = vrcp.f32 %v199_v15  ;;  %v200_v19 = vadd.f32 1.0, %v303_v16 }
 0x22d   :  { %308 = vrcp.f32 %v197_v17  ;;  %v198_v20 = vadd.f32 1.0, %v305_v18 }
 0x22e   :  { %310 = vrcp.f32 %v200_v19 }
 0x22f   :  { %312 = vrcp.f32 %v198_v20 }
 0x236   :  { %v307_v21 = vpop.eup %306 }
 0x237   :  { %v309_v22 = vpop.eup %308  ;;  %v211_v25 = vmul.f32 %v307_v21, %v179_v2 }
 0x238   :  { %v311_v23 = vpop.eup %310  ;;  %v209_v27 = vmul.f32 %v309_v22, %v171_v4 }
 0x239   :  { %v313_v24 = vpop.eup %312  ;;  %v212_v26 = vmul.f32 %v311_v23, %v182_v7 }
 0x23a   :  { %v210_v28 = vmul.f32 %v313_v24, %v174_v10 }
 0x23b   :  { %v272_v29 = vpack.c.bf16 %v212_v26, %v211_v25 }
 0x23c   :  { %v267_v30 = vpack.c.bf16 %v210_v28, %v209_v27 }
 0x23d   :  { %275 = vst [vmem:[%s386_s5 + $0x8] sm:$0xff] %v272_v29  }
 0x23e   :  { %268 = vst [vmem:[%s386_s5] sm:$0xff] %v267_v30  }

// kernel: conformer_encoder.31
= control target key start
LH: loop header
LB: loop body
LE: loop exit
PB: predicated region body
PF: predicated region fallthrough
CT: control target
= control target key end

     0   :  { %vm186_vm0 = vcmask 257024   ;;  %s339_s1 = inlined_call_operand.vmem [shape: bf16[128,32], index: 1, kind: input, shape index: {}]   ;;  %s340_s0 = inlined_call_operand.vmem [shape: bf16[32,128], index: 0, kind: input, shape index: {}]   ;;  %s341_s2 = inlined_call_operand.vmem [shape: f32[1,32], index: 2, kind: input, shape index: {}]   ;;  %s342_s3 = inlined_call_operand.vmem [shape: bf16[32,32], index: 3, kind: input, shape index: {}]   ;;  %s343_s4 = inlined_call_operand.vmem [shape: bf16[32,32], index: 4, kind: output, shape index: {}]  }
   0x1   :  { %v253_v0 = vld [vmem:[%s339_s1] sm:$0xff]   ;;  %v254_v1 = vld [vmem:[%s339_s1 + $0x8] sm:$0xff]   ;;  %v255_v2 = vld [vmem:[%s339_s1 + $0x10] sm:$0xff]  }
   0x2   :  { %233 = vmatprep.subr.bf16.mxu0 %v253_v0  ;;  %v256_v3 = vld [vmem:[%s339_s1 + $0x18] sm:$0xff]   ;;  %v261_v4 = vld [vmem:[%s340_s0] sm:$0xff]   ;;  %v258_v6 = vld [vmem:[%s339_s1 + $0x28] sm:$0xff]  }
   0x3   :  { %234 = vmatpush3.bf16.msra.mxu0 %v253_v0  ;;  %249 = vmatprep.mubr.bf16.mxu0 %v261_v4  ;;  %v257_v5 = vld [vmem:[%s339_s1 + $0x20] sm:$0xff]   ;;  %v259_v7 = vld [vmem:[%s339_s1 + $0x30] sm:$0xff]   ;;  %v260_v8 = vld [vmem:[%s339_s1 + $0x38] sm:$0xff]  }
   0x4   :  { %235 = vmatprep.subr.bf16.mxu0 %v254_v1  ;;  %v262_v9 = vld [vmem:[%s340_s0 + $0x8] sm:$0xff]   ;;  %v195_v10 = vld [vmem:[%s341_s2] ss:$0 sm:$0xff] }
   0x5   :  { %v222_v11 = vld [vmem:[%s342_s3 + $0x8] sm:$0xff]   ;;  %v215_v12 = vld [vmem:[%s342_s3] sm:$0xff]  }
   0x6   :  { %v220_v15 = vunpack.c.l.bf16 %v222_v11  ;;  %v216_v18 = vunpack.c.l.bf16 %v215_v12  ;;  %v221_v22 = vunpack.c.h.bf16 %v222_v11  ;;  %v217_v26 = vunpack.c.h.bf16 %v215_v12 }
   0x7   :  { %236 = vmatpush3.bf16.msra.mxu0 %v254_v1 }
   0x8   :  { %237 = vmatprep.subr.bf16.mxu0 %v255_v2 }
   0xb   :  { %238 = vmatpush3.bf16.msra.mxu0 %v255_v2 }
   0xc   :  { %239 = vmatprep.subr.bf16.mxu0 %v256_v3 }
   0xf   :  { %240 = vmatpush3.bf16.msra.mxu0 %v256_v3 }
  0x10   :  { %241 = vmatprep.subr.bf16.mxu0 %v257_v5 }
  0x13   :  { %242 = vmatpush3.bf16.msra.mxu0 %v257_v5 }
  0x14   :  { %243 = vmatprep.subr.bf16.mxu0 %v258_v6 }
  0x17   :  { %244 = vmatpush3.bf16.msra.mxu0 %v258_v6 }
  0x18   :  { %245 = vmatprep.subr.bf16.mxu0 %v259_v7 }
  0x1b   :  { %246 = vmatpush3.bf16.msra.mxu0 %v259_v7 }
  0x1c   :  { %247 = vmatprep.subr.bf16.mxu0 %v260_v8 }
  0x1f   :  { %248 = vmatpush3.bf16.msra.mxu0 %v260_v8 }
  0x22   :  { %250 = vmatmul.mubr.bf16.vlgmr.msra.gmra.mrb[0].mxu0 %v262_v9 }
  0xf5   :  { %v251_v13 = vpop.f32.mrb[0].mxu0 }
  0xf6   :  { %v148_v14 = vadd.f32 %v251_v13, %v195_v10  ;;  %v139_v16 = vpop.f32.mrb[1].mxu0 }
  0xf7   :  { %v140_v17 = vadd.f32 %v195_v10, %v139_v16  ;;  %v252_v19 = vpop.f32.mrb[2].mxu0 }
  0xf8   :  { %v164_v20 = vmul.f32 0.5, %v148_v14  ;;  %v151_v21 = vadd.f32 %v252_v19, %v195_v10  ;;  %v142_v23 = vpop.f32.mrb[3].mxu0 }
  0xf9   :  { %v162_v24 = vmul.f32 0.5, %v140_v17  ;;  %v143_v25 = vadd.f32 %v195_v10, %v142_v23 }
  0xfa   :  { %v168_v27 = vadd.f32 %v220_v15, %v164_v20  ;;  %v165_v28 = vmul.f32 0.5, %v151_v21 }
  0xfb   :  { %v166_v29 = vadd.f32 %v216_v18, %v162_v24  ;;  %v163_v30 = vmul.f32 0.5, %v143_v25 }
  0xfc   :  { %v212_v31 = vpack.c.bf16 %v168_v27, %v168_v27  ;;  %v169_v32 = vadd.f32 %v221_v22, %v165_v28 }
  0xfd   :  { %v210_v33 = vpack.c.bf16 %v166_v29, %v166_v29  ;;  %v167_v34 = vadd.f32 %v217_v26, %v163_v30 }
  0xfe   :  { %189 = vst.msk [vmem:[%s343_s4 + $0x8] sm:$0xf] %vm186_vm0, %v212_v31  ;;  %v213_v35 = vpack.c.bf16 %v169_v32, %v169_v32 }
  0xff   :  { %187 = vst.msk [vmem:[%s343_s4] sm:$0xf] %vm186_vm0, %v210_v33  ;;  %v211_v36 = vpack.c.bf16 %v167_v34, %v167_v34 }
 0x100   :  { %190 = vst.msk [vmem:[%s343_s4 + $0xc] sm:$0xf] %vm186_vm0, %v213_v35 }
 0x101   :  { %188 = vst.msk [vmem:[%s343_s4 + $0x4] sm:$0xf] %vm186_vm0, %v211_v36 }

// kernel: conformer_encoder.32
= control target key start
LH: loop header
LB: loop body
LE: loop exit
PB: predicated region body
PF: predicated region fallthrough
CT: control target
= control target key end

     0   :  { %vm29_vm0 = vcmask 261120   ;;  %vm201_vm1 = vcmask 781312   ;;  %s329_s0 = inlined_call_operand.vmem [shape: bf16[32,32], index: 0, kind: input, shape index: {}]   ;;  %s330_s1 = inlined_call_operand.vmem [shape: bf16[32,96], index: 1, kind: input, shape index: {}]   ;;  %s331_s3 = inlined_call_operand.vmem [shape: f32[1,32], index: 3, kind: input, shape index: {}]   ;;  %s332_s4 = inlined_call_operand.vmem [shape: f32[1,32], index: 4, kind: input, shape index: {}]   ;;  %s333_s2 = inlined_call_operand.vmem [shape: f32[1,96], index: 2, kind: input, shape index: {}]   ;;  %s334_s5 = inlined_call_operand.vmem [shape: bf16[32,96], index: 5, kind: output, shape index: {}]  }
   0x1   :  { %v226_v0 = vld [vmem:[%s329_s0] sm:$0xff]   ;;  %v233_v1 = vld [vmem:[%s329_s0 + $0x8] sm:$0xff]  }
   0x2   :  { %v227_v2 = vunpack.c.l.bf16 %v226_v0  ;;  %v231_v3 = vunpack.c.l.bf16 %v233_v1  ;;  %v228_v4 = vunpack.c.h.bf16 %v226_v0  ;;  %v232_v5 = vunpack.c.h.bf16 %v233_v1  ;;  %v246_v30 = vld [vmem:[%s330_s1] sm:$0xff]   ;;  %v247_v31 = vld [vmem:[%s330_s1 + $0x8] sm:$0xff]  }
   0x3   :  { %238 = vmatprep.subr.bf16.mxu0 %v246_v30  ;;  %v210_v46 = vld [vmem:[%s331_s3] ss:$0 sm:$0xff] }
   0x4   :  { %v30_v6 = vsel %vm29_vm0, %v227_v2, 0.0  ;;  %v36_v7 = vsel %vm29_vm0, %v231_v3, 0.0  ;;  %v33_v8 = vsel %vm29_vm0, %v228_v4, 0.0  ;;  %v39_v9 = vsel %vm29_vm0, %v232_v5, 0.0  ;;  %239 = vmatpush3.bf16.msra.mxu0 %v246_v30  ;;  %v211_v52 = vld [vmem:[%s332_s4] ss:$0 sm:$0xff] }
   0x5   :  { %31 = vadd.xlane.f32.xlu0 %v30_v6  ;;  %37 = vadd.xlane.f32.xlu1 %v36_v7  ;;  %v212_v0 = vld [vmem:[%s333_s2] ss:$0 sm:$0xff] }
   0x6   :  { %240 = vmatprep.subr.bf16.mxu0 %v247_v31 }
   0x8   :  { %241 = vmatpush3.bf16.msra.mxu0 %v247_v31 }
   0x9   :  { %34 = vadd.xlane.f32.xlu0 %v33_v8  ;;  %40 = vadd.xlane.f32.xlu1 %v39_v9 }
  0x92   :  { %v32_v10 = vpop.xlane.xlu0 %31  ;;  %v38_v11 = vpop.xlane.xlu1 %37 }
  0x93   :  { %v43_v12 = vmul.f32 0.03125, %v32_v10  ;;  %v45_v13 = vmul.f32 0.03125, %v38_v11 }
  0x95   :  { %v47_v14 = vsub.f32 %v227_v2, %v43_v12  ;;  %v49_v15 = vsub.f32 %v231_v3, %v45_v13 }
  0x96   :  { %v35_v16 = vpop.xlane.xlu0 %34  ;;  %v41_v17 = vpop.xlane.xlu1 %40 }
  0x97   :  { %v44_v18 = vmul.f32 0.03125, %v35_v16  ;;  %v46_v19 = vmul.f32 0.03125, %v41_v17  ;;  %v51_v20 = vmul.f32 %v47_v14, %v47_v14  ;;  %v53_v21 = vmul.f32 %v49_v15, %v49_v15 }
  0x99   :  { %v48_v22 = vsub.f32 %v228_v4, %v44_v18  ;;  %v50_v23 = vsub.f32 %v232_v5, %v46_v19  ;;  %v55_v24 = vsel %vm29_vm0, %v51_v20, 0.0  ;;  %v61_v25 = vsel %vm29_vm0, %v53_v21, 0.0 }
  0x9a   :  { %56 = vadd.xlane.f32.xlu0 %v55_v24 }
  0x9b   :  { %v52_v26 = vmul.f32 %v48_v22, %v48_v22  ;;  %v54_v27 = vmul.f32 %v50_v23, %v50_v23 }
  0x9d   :  { %v58_v28 = vsel %vm29_vm0, %v52_v26, 0.0  ;;  %v64_v29 = vsel %vm29_vm0, %v54_v27, 0.0 }
  0x9e   :  { %62 = vadd.xlane.f32.xlu0 %v61_v25  ;;  %59 = vadd.xlane.f32.xlu1 %v58_v28 }
  0xa2   :  { %65 = vadd.xlane.f32.xlu1 %v64_v29 }
 0x127   :  { %v57_v32 = vpop.xlane.xlu0 %56 }
 0x128   :  { %v67_v33 = vmul.f32 0.03125, %v57_v32 }
 0x12a   :  { %v71_v34 = vadd.f32 1e-05, %v67_v33 }
 0x12b   :  { %v60_v35 = vpop.xlane.xlu1 %59  ;;  %v63_v36 = vpop.xlane.xlu0 %62 }
 0x12c   :  { %248 = vrsqrt.f32 %v71_v34  ;;  %v68_v37 = vmul.f32 0.03125, %v60_v35  ;;  %v69_v38 = vmul.f32 0.03125, %v63_v36 }
 0x12e   :  { %v72_v39 = vadd.f32 1e-05, %v68_v37  ;;  %v73_v40 = vadd.f32 1e-05, %v69_v38 }
 0x12f   :  { %v66_v41 = vpop.xlane.xlu1 %65 }
 0x130   :  { %250 = vrsqrt.f32 %v72_v39  ;;  %v70_v42 = vmul.f32 0.03125, %v66_v41 }
 0x131   :  { %252 = vrsqrt.f32 %v73_v40 }
 0x132   :  { %v74_v43 = vadd.f32 1e-05, %v70_v42 }
 0x134   :  { %254 = vrsqrt.f32 %v74_v43 }
 0x136   :  { %v249_v44 = vpop.eup %248 }
 0x137   :  { %v79_v45 = vmul.f32 %v249_v44, %v47_v14 }
 0x139   :  { %v90_v50 = vmul.f32 %v210_v46, %v79_v45 }
 0x13a   :  { %v251_v47 = vpop.eup %250 }
 0x13b   :  { %v253_v48 = vpop.eup %252  ;;  %v80_v49 = vmul.f32 %v251_v47, %v48_v22  ;;  %v101_v56 = vadd.f32 %v211_v52, %v90_v50 }
 0x13c   :  { %v81_v51 = vmul.f32 %v253_v48, %v49_v15 }
 0x13d   :  { %v91_v53 = vmul.f32 %v210_v46, %v80_v49 }
 0x13e   :  { %v255_v54 = vpop.eup %254  ;;  %v92_v58 = vmul.f32 %v210_v46, %v81_v51 }
 0x13f   :  { %v82_v55 = vmul.f32 %v255_v54, %v50_v23  ;;  %v102_v57 = vadd.f32 %v211_v52, %v91_v53 }
 0x140   :  { %v103_v61 = vadd.f32 %v211_v52, %v92_v58 }
 0x141   :  { %v105_v59 = vpack.c.bf16 %v102_v57, %v101_v56  ;;  %v93_v60 = vmul.f32 %v210_v46, %v82_v55 }
 0x143   :  { %242 = vmatprep.mubr.msk.bf16.mxu0 %vm29_vm0, %v105_v59  ;;  %v104_v62 = vadd.f32 %v211_v52, %v93_v60 }
 0x145   :  { %v106_v63 = vpack.c.bf16 %v104_v62, %v103_v61 }
 0x147   :  { %243 = vmatmul.mubr.msk.bf16.vlgmr.msra.gmra.mrb[0].mxu0 %vm29_vm0, %v106_v63 }
 0x21a   :  { %v244_v1 = vpop.f32.mrb[0].mxu0 }
 0x21b   :  { %v179_v2 = vadd.f32 %v244_v1, %v212_v0  ;;  %v170_v3 = vpop.f32.mrb[1].mxu0 }
 0x21c   :  { %v171_v4 = vadd.f32 %v212_v0, %v170_v3  ;;  %v245_v5 = vpop.f32.mrb[2].mxu0 }
 0x21d   :  { %v223_v6 = vpack.c.bf16 %v179_v2, %v179_v2  ;;  %v182_v7 = vadd.f32 %v245_v5, %v212_v0  ;;  %v173_v8 = vpop.f32.mrb[3].mxu0 }
 0x21e   :  { %v221_v9 = vpack.c.bf16 %v171_v4, %v171_v4  ;;  %v174_v10 = vadd.f32 %v212_v0, %v173_v8 }
 0x21f   :  { %204 = vst.msk [vmem:[%s334_s5 + $0x8] sm:$0xf] %vm201_vm1, %v223_v6  ;;  %v224_v11 = vpack.c.bf16 %v182_v7, %v182_v7 }
 0x220   :  { %202 = vst.msk [vmem:[%s334_s5] sm:$0xf] %vm201_vm1, %v221_v9  ;;  %v222_v12 = vpack.c.bf16 %v174_v10, %v174_v10 }
 0x221   :  { %205 = vst.msk [vmem:[%s334_s5 + $0xc] sm:$0xf] %vm201_vm1, %v224_v11 }
 0x222   :  { %203 = vst.msk [vmem:[%s334_s5 + $0x4] sm:$0xf] %vm201_vm1, %v222_v12 }

// kernel: conformer_encoder.33
= control target key start
LH: loop header
LB: loop body
LE: loop exit
PB: predicated region body
PF: predicated region fallthrough
CT: control target
= control target key end

     0   :  { %v124_v0 = vmov 0.0   ;;  %vm125_vm0 = vmmov 0   ;;  %vm41_vm1 = vcmask 261120   ;;  %vm94_vm2 = vcmask 257024   ;;  %s167_s1 = inlined_call_operand.vmem [shape: bf16[32,32], index: 1, kind: input, shape index: {}]   ;;  %s168_s0 = inlined_call_operand.vmem [shape: f32[16,32], index: 0, kind: input, shape index: {}]   ;;  %s169_s2 = inlined_call_operand.vmem [shape: f32[1,32], index: 2, kind: input, shape index: {}]   ;;  %s170_s3 = inlined_call_operand.vmem [shape: bf16[16,32], index: 3, kind: output, shape index: {}]  }
   0x1   :  { %112 = vmatprep.subr.bf16.mxu0 %v124_v0  ;;  %v122_v1 = vld [vmem:[%s167_s1] sm:$0xff]   ;;  %116 = vmatprep.mubr.msk.bf16.mxu0 %vm125_vm0, %v124_v0  ;;  %v123_v2 = vld [vmem:[%s167_s1 + $0x8] sm:$0xff]  }
   0x2   :  { %113 = vmatpush3.bf16.msra.mxu0 %v122_v1  ;;  %v15_v3 = vld [vmem:[%s168_s0] sm:$0xff]  ;;  %v16_v4 = vld [vmem:[%s168_s0 + $0x8] sm:$0xff] }
   0x3   :  { %114 = vmatprep.subr.bf16.mxu0 %v124_v0  ;;  %v17_v5 = vpack.c.bf16 %v16_v4, %v15_v3  ;;  %v101_v6 = vld [vmem:[%s169_s2] ss:$0 sm:$0xff] }
   0x6   :  { %115 = vmatpush3.bf16.msra.mxu0 %v123_v2 }
   0x9   :  { %117 = vmatmul.mubr.msk.bf16.vlgmr.msra.gmra.mrb[0].mxu0 %vm41_vm1, %v17_v5 }
  0xdc   :  { %v79_v7 = vpop.f32.mrb[0].mxu0 }
  0xdd   :  { %v80_v8 = vadd.f32 %v101_v6, %v79_v7  ;;  %v118_v9 = vpop.f32.mrb[1].mxu0 }
  0xde   :  { %v82_v10 = vpop.f32.mrb[2].mxu0 }
  0xdf   :  { %v107_v11 = vpack.c.bf16 %v80_v8, %v80_v8  ;;  %v83_v12 = vadd.f32 %v101_v6, %v82_v10  ;;  %v119_v13 = vpop.f32.mrb[3].mxu0 }
  0xe1   :  { %95 = vst.msk [vmem:[%s170_s3] sm:$0xf] %vm94_vm2, %v107_v11  ;;  %v108_v14 = vpack.c.bf16 %v83_v12, %v83_v12 }
  0xe3   :  { %96 = vst.msk [vmem:[%s170_s3 + $0x4] sm:$0xf] %vm94_vm2, %v108_v14 }

// kernel: conformer_encoder.34
= control target key start
LH: loop header
LB: loop body
LE: loop exit
PB: predicated region body
PF: predicated region fallthrough
CT: control target
= control target key end

     0   :  { %s1102_s18 = smov 0   ;;  %s1104_s19 = smov 0   ;;  %s1216_s0 = inlined_call_operand.vmem [shape: bf16[2,4,16,8], index: 0, kind: input, shape index: {}]   ;;  %s1217_s1 = inlined_call_operand.vmem [shape: bf16[2,4,16,8], index: 1, kind: input, shape index: {}]   ;;  %s1218_s2 = inlined_call_operand.vmem [shape: bf16[2,4,16,8], index: 2, kind: input, shape index: {}]   ;;  %s1219_s3 = inlined_call_operand.vmem [shape: bf16[2,4,16,8], index: 3, kind: input, shape index: {}]   ;;  %s1220_s4 = inlined_call_operand.vmem [shape: bf16[4,16,8], index: 4, kind: input, shape index: {}]   ;;  %s1221_s5 = inlined_call_operand.vmem [shape: bf16[2,4,16,8], index: 5, kind: output, shape index: {}]  }
   0x1   :  { %s1106_s20 = smov 0   ;;  %s1108_s21 = smov 0  }
   0x2   :  { %s1110_s22 = smov 0  }
   0x3 LB: > { %s24_s23 = sadd.s32 1, %s1052_s20  ;;  %s27_s24 = sadd.s32 1, %s1056_s21  ;;  %s1060_s22 = sphi %s1110_s22, %s15_s22   ;;  %s1056_s21 = sphi %s1108_s21, %s1225_s21   ;;  %s1052_s20 = sphi %s1106_s20, %s1224_s20   ;;  %s1048_s19 = sphi %s1104_s19, %s1223_s19   ;;  %s1044_s18 = sphi %s1102_s18, %s1222_s18  }
   0x4   : > { %p25_p0 = scmp.ge.s32.totalorder %s24_s23, 4  ;;  %p902_p1 = scmp.ge.s32.totalorder %s1060_s22, 1 }
   0x5   : > { %p265_p2 = scmp.lt.s32.totalorder %s1060_s22, 9 }
   0x6   : > { %s1227_s23 = smov (%p25_p0, %s24_s23), 0  ;;  %s1229_s24 = smov (!%p25_p0, %s27_s24), %s1056_s21 }
   0x7   : > { %p266_p3 = pnand %p902_p1, %p265_p2  ;;  %p29_p4 = scmp.ge.s32.totalorder %s1229_s24, 2 }
   0x8   : > { %p333_p5 = scmp.lt.s32.totalorder (!%p266_p3), %s1048_s19, 1  ;;  %p335_p6 = scmp.lt.s32.totalorder (!%p266_p3), %s1044_s18, 3  ;;  %v1062_v0 = vmov (!%p266_p3), 0.0   ;;  %vm1063_vm0 = vmmov (!%p266_p3), 0   ;;  %vm404_vm1 = vcmask (!%p266_p3), 64512   ;;  %v452_v8 = vlaneseq (!%p266_p3) }
   0x9   : > { %s1231_s24 = smov (%p29_p4, %s1229_s24), 0  ;;  %269 = sbr.rel (%p266_p3) target bundleno = 1380 (0x564), region = 40 }
   0xa   : > { %941 = vmatprep.subr.bf16.mxu0 (!%p266_p3), %v1062_v0  ;;  %943 = vmatprep.mubr.msk.bf16.mxu0 (!%p266_p3), %vm1063_vm0, %v1062_v0  ;;  %s1064_s11 = smov (!%p266_p3), 113   ;;  %s1065_s12 = smov (!%p266_p3), 1   ;;  %v1151_v9 = vshrl.u32 (!%p266_p3), %v452_v8, 7  ;;  %vm475_vm3 = vcmask (!%p266_p3), 7168   ;;  %vm498_vm5 = vcmask (!%p266_p3), 15360   ;;  %vm521_vm8 = vcmask (!%p266_p3), 31744  }
   0xb   : > { %947 = vmatprep.subr.bf16.mxu1 (!%p266_p3), %v1062_v0  ;;  %949 = vmatprep.mubr.msk.bf16.mxu1 (!%p266_p3), %vm1063_vm0, %v1062_v0  ;;  %s1066_s13 = smov (!%p266_p3), 2   ;;  %s1067_s14 = smov (!%p266_p3), 114   ;;  %v456_v54 = vand.u32 (!%p266_p3), 127, %v452_v8  ;;  %vm566_vm11 = vcmask (!%p266_p3), 1046528  }
   0xc   : > { %v1154_v10 = vadd.s32 (!%p266_p3), 8, %v1151_v9  ;;  %v457_v14 = vand.u32 (!%p266_p3), 1, %v1151_v9  ;;  %v480_v22 = vand.u32 (!%p266_p3), 2, %v1151_v9  ;;  %v503_v35 = vand.u32 (!%p266_p3), 4, %v1151_v9  ;;  %s1071_s29 = smov (!%p266_p3), 120  }
   0xd   : > { %v576_v55 = vadd.s32 (!%p266_p3), 1, %v1151_v9  ;;  %vm574_vm14 = vcmp.le.s32.totalorder (!%p266_p3), %v456_v54, %v1151_v9 }
   0xe   : > { %v458_v12 = vand.u32 (!%p266_p3), 1, %v1154_v10  ;;  %vm459_vm4 = vcmp.ne.s32.totalorder (!%p266_p3), %v457_v14, 0  ;;  %v481_v21 = vand.u32 (!%p266_p3), 2, %v1154_v10  ;;  %vm482_vm7 = vcmp.ne.s32.totalorder (!%p266_p3), %v480_v22, 0 }
   0xf   : > { %v504_v34 = vand.u32 (!%p266_p3), 4, %v1154_v10  ;;  %vm505_vm10 = vcmp.ne.s32.totalorder (!%p266_p3), %v503_v35, 0  ;;  %v577_v56 = vadd.s32 (!%p266_p3), 1, %v1154_v10  ;;  %vm578_vm12 = vcmp.eq.s32.totalorder (!%p266_p3), %v456_v54, %v576_v55 }
  0x10   : > { %s1233_s19 = smov (!%p333_p5, %s1048_s19), 1  ;;  %s1235_s18 = smov (!%p335_p6, %s1044_s18), 3  ;;  %vm460_vm2 = vcmp.ne.s32.totalorder %v458_v12, 0  ;;  %vm483_vm6 = vcmp.ne.s32.totalorder %v481_v21, 0  ;;  %vm575_vm15 = vcmp.le.s32.totalorder %v456_v54, %v1154_v10 }
  0x11   : > { %s904_s25 = sshll.u32 %s1233_s19, 3  ;;  %s903_s26 = sshll.u32 %s1235_s18, 1  ;;  %vm506_vm9 = vcmp.ne.s32.totalorder %v504_v34, 0  ;;  %vm579_vm13 = vcmp.eq.s32.totalorder %v456_v54, %v577_v56 }
  0x12   : > { %s932_s27 = sshll.u32 %s1235_s18, 3  ;;  %s339_s28 = sadd.s32 %s904_s25, %s903_s26 }
  0x13   : > { %s373_s6 = scalar_lea.vmem %s1220_s4, %s932_s27  ;;  %s1137_s7 = sshll.u32 %s339_s28, 2 }
  0x14   : > { %v1009_v1 = vld [vmem:[%s373_s6] sm:$0xff]   ;;  %s350_s10 = scalar_lea.vmem %s1217_s1, %s1137_s7  ;;  %s359_s17 = scalar_lea.vmem %s1218_s2, %s1137_s7 }
  0x15   : > { %v409_v2 = vsel %vm404_vm1, %v1009_v1, 0  ;;  %v1010_v3 = vld [vmem:[%s350_s10] sm:$0xff]   ;;  %s341_s25 = scalar_lea.vmem %s1216_s0, %s1137_s7  ;;  %s1068_s26 = smov 4  }
  0x16   : > { %942 = vmatpush3.bf16.xpose.msra.mxu0 %v409_v2  ;;  %v1011_v26 = vld [vmem:[%s359_s17] sm:$0xff]   ;;  %s1069_s27 = smov 116   ;;  %s1070_s28 = smov 8  }
  0x17   : > { %953 = vmatprep.subr.bf16.mxu0 %v1062_v0  ;;  %v598_v28 = vsel %vm404_vm1, %v1011_v26, 0  ;;  %v1012_v33 = vld [vmem:[%s341_s25] sm:$0xff]   ;;  %s368_s8 = scalar_lea.vmem %s1219_s3, %s1137_s7 }
  0x18   : > { %948 = vmatpush3.bf16.xpose.msra.mxu1 %v598_v28 }
  0x1d   : > { %944 = vmatmul.mubr.msk.bf16.vlgmr.msra.gmra.mrb[0].mxu0 %vm404_vm1, %v1010_v3 }
  0x1e   : > { %955 = vmatprep.mubr.msk.bf16.mxu0 %vm1063_vm0, %v1062_v0  ;;  %vm643_vm0 = vcmask 130048  }
  0x1f   : > { %950 = vmatmul.mubr.msk.bf16.vlgmr.msra.gmra.mrb[0].mxu1 %vm404_vm1, %v1012_v33 }
  0xf0   : > { %v445_v4 = vpop.f32.mrb[0].mxu0 }
  0xf1   : > { %463 = vrot.lane.b32.xlu1 %v445_v4, %s1064_s11  ;;  %v945_v5 = vpop.f32.mrb[1].mxu0 }
  0xf2   : > { %v448_v6 = vpop.f32.mrb[2].mxu0  ;;  %v634_v44 = vpop.f32.mrb[0].mxu1 }
  0xf3   : > { %465 = vrot.lane.b32.xlu0 %v448_v6, %s1064_s11  ;;  %v946_v7 = vpop.f32.mrb[3].mxu0  ;;  %v951_v45 = vpop.f32.mrb[1].mxu1 }
  0xf4   : > { %v637_v46 = vpop.f32.mrb[2].mxu1 }
  0xf5   : > { %469 = vrot.lane.b32.xlu1 %v445_v4, %s1065_s12  ;;  %v952_v47 = vpop.f32.mrb[3].mxu1 }
  0xf7   : > { %471 = vrot.lane.b32.xlu0 %v448_v6, %s1065_s12 }
 0x163   : > { %v464_v11 = vpop.permute.xlu1 %463 }
 0x165   : > { %v466_v13 = vpop.permute.xlu0 %465 }
 0x167   : > { %v470_v15 = vpop.permute.xlu1 %469 }
 0x168   : > { %v476_v19 = vsel %vm475_vm3, %v464_v11, %v470_v15 }
 0x169   : > { %v472_v16 = vpop.permute.xlu0 %471  ;;  %v478_v20 = vsel %vm459_vm4, %v476_v19, %v445_v4 }
 0x16a   : > { %v477_v17 = vsel %vm475_vm3, %v466_v13, %v472_v16 }
 0x16b   : > { %v479_v18 = vsel %vm460_vm2, %v477_v17, %v448_v6 }
 0x16c   : > { %494 = vrot.lane.b32.xlu1 %v479_v18, %s1066_s13  ;;  %488 = vrot.lane.b32.xlu0 %v479_v18, %s1067_s14 }
 0x170   : > { %492 = vrot.lane.b32.xlu1 %v478_v20, %s1066_s13  ;;  %486 = vrot.lane.b32.xlu0 %v478_v20, %s1067_s14 }
 0x1de   : > { %v495_v23 = vpop.permute.xlu1 %494  ;;  %v489_v24 = vpop.permute.xlu0 %488 }
 0x1df   : > { %v500_v25 = vsel %vm498_vm5, %v489_v24, %v495_v23 }
 0x1e0   : > { %v502_v27 = vsel %vm483_vm6, %v500_v25, %v479_v18 }
 0x1e1   : > { %517 = vrot.lane.b32.xlu1 %v502_v27, %s1068_s26  ;;  %511 = vrot.lane.b32.xlu0 %v502_v27, %s1069_s27 }
 0x1e2   : > { %v493_v29 = vpop.permute.xlu1 %492  ;;  %v487_v30 = vpop.permute.xlu0 %486 }
 0x1e3   : > { %v499_v31 = vsel %vm498_vm5, %v487_v30, %v493_v29 }
 0x1e4   : > { %v501_v32 = vsel %vm482_vm7, %v499_v31, %v478_v20  ;;  %v1013_v20 = vld [vmem:[%s368_s8] sm:$0xff]  }
 0x1e5   : > { %515 = vrot.lane.b32.xlu1 %v501_v32, %s1068_s26  ;;  %509 = vrot.lane.b32.xlu0 %v501_v32, %s1069_s27 }
 0x1e6   : > { %954 = vmatpush3.bf16.msra.mxu0 %v1013_v20 }
 0x253   : > { %v518_v36 = vpop.permute.xlu1 %517  ;;  %v512_v37 = vpop.permute.xlu0 %511 }
 0x254   : > { %v523_v38 = vsel %vm521_vm8, %v512_v37, %v518_v36 }
 0x255   : > { %v525_v39 = vsel %vm506_vm9, %v523_v38, %v502_v27 }
 0x256   : > { %540 = vrot.lane.b32.xlu1 %v525_v39, %s1070_s28  ;;  %534 = vrot.lane.b32.xlu0 %v525_v39, %s1071_s29 }
 0x257   : > { %v516_v40 = vpop.permute.xlu1 %515  ;;  %v510_v41 = vpop.permute.xlu0 %509 }
 0x258   : > { %v522_v42 = vsel %vm521_vm8, %v510_v41, %v516_v40 }
 0x259   : > { %v524_v43 = vsel %vm505_vm10, %v522_v42, %v501_v32 }
 0x25a   : > { %550 = vrot.lane.b32.xlu0 %v524_v43, %s1064_s11 }
 0x25e   : > { %556 = vrot.lane.b32.xlu0 %v524_v43, %s1065_s12 }
 0x2c8   : > { %v541_v48 = vpop.permute.xlu1 %540  ;;  %v535_v49 = vpop.permute.xlu0 %534 }
 0x2c9   : > { %v545_v50 = vsel %vm404_vm1, %v535_v49, %v541_v48  ;;  %vm725_vm1 = vcmask 60416  }
 0x2ca   : > { %552 = vrot.lane.b32.xlu1 %v545_v50, %s1064_s11  ;;  %s382_s11 = scalar_lea.vmem %s1221_s5, %s1137_s7 }
 0x2cc   : > { %v551_v51 = vpop.permute.xlu0 %550 }
 0x2ce   : > { %558 = vrot.lane.b32.xlu1 %v545_v50, %s1065_s12 }
 0x2d0   : > { %v557_v52 = vpop.permute.xlu0 %556 }
 0x2d1   : > { %v562_v57 = vsel %vm475_vm3, %v551_v51, %v557_v52 }
 0x2d2   : > { %v567_v60 = vrot.slane %v562_v57, 1 }
 0x33c   : > { %v553_v53 = vpop.permute.xlu1 %552 }
 0x340   : > { %v559_v58 = vpop.permute.xlu1 %558 }
 0x341   : > { %v563_v59 = vsel %vm475_vm3, %v553_v53, %v559_v58 }
 0x342   : > { %v568_v61 = vrot.slane %v563_v59, 1 }
 0x344   : > { %v569_v62 = vsel %vm566_vm11, %v567_v60, %v568_v61  ;;  %v573_v63 = vsel %vm566_vm11, %v568_v61, %v567_v60 }
 0x345   : > { %v580_v0 = vsel %vm578_vm12, 0.0, %v569_v62  ;;  %v581_v1 = vsel %vm579_vm13, 0.0, %v573_v63 }
 0x346   : > { %v582_v2 = vsel %vm574_vm14, %v562_v57, %v580_v0  ;;  %v583_v3 = vsel %vm575_vm15, %v563_v59, %v581_v1 }
 0x347   : > { %v635_v4 = vadd.f32 %v634_v44, %v582_v2  ;;  %v638_v5 = vadd.f32 %v637_v46, %v583_v3 }
 0x349   : > { %v641_v6 = vmul.f32 0.17677669, %v635_v4  ;;  %v642_v7 = vmul.f32 0.17677669, %v638_v5 }
 0x34b   : > { %v644_v8 = vsel %vm643_vm0, %v641_v6, -inf  ;;  %v647_v11 = vsel %vm643_vm0, %v642_v7, -inf }
 0x34c   : > { %645 = vmax.xlane.f32.xlu0 %v644_v8  ;;  %648 = vmax.xlane.f32.xlu1 %v647_v11 }
 0x3d9   : > { %v646_v9 = vpop.xlane.xlu0 %645  ;;  %v649_v10 = vpop.xlane.xlu1 %648 }
 0x3da   : > { %v650_v12 = vsub.f32 %v641_v6, %v646_v9  ;;  %v651_v13 = vsub.f32 %v642_v7, %v649_v10 }
 0x3dc   : > { %v652_v14 = vmul.f32 1.442695, %v650_v12  ;;  %v654_v15 = vmul.f32 1.442695, %v651_v13 }
 0x3de   : > { %1014 = vpow2.f32 %v652_v14 }
 0x3df   : > { %1016 = vpow2.f32 %v654_v15 }
 0x3e8   : > { %v1015_v16 = vpop.eup %1014 }
 0x3e9   : > { %v656_v17 = vsel %vm643_vm0, %v1015_v16, 0.0  ;;  %v1017_v18 = vpop.eup %1016 }
 0x3ea   : > { %657 = vadd.xlane.f32.xlu0 %v656_v17  ;;  %v659_v19 = vsel %vm643_vm0, %v1017_v18, 0.0 }
 0x3ee   : > { %660 = vadd.xlane.f32.xlu0 %v659_v19 }
 0x477   : > { %v658_v21 = vpop.xlane.xlu0 %657 }
 0x478   : > { %1018 = vrcp.f32 %v658_v21 }
 0x47b   : > { %v661_v22 = vpop.xlane.xlu0 %660 }
 0x47c   : > { %1020 = vrcp.f32 %v661_v22 }
 0x482   : > { %v1019_v23 = vpop.eup %1018 }
 0x483   : > { %v664_v25 = vmul.f32 %v1019_v23, %v1015_v16 }
 0x486   : > { %v1021_v24 = vpop.eup %1020 }
 0x487   : > { %v665_v26 = vmul.f32 %v1021_v24, %v1017_v18 }
 0x489   : > { %v666_v27 = vpack.c.bf16 %v665_v26, %v664_v25 }
 0x48b   : > { %956 = vmatmul.mubr.msk.bf16.vlgmr.msra.gmra.mrb[4].mxu0 %vm643_vm0, %v666_v27 }
 0x55e   : > { %v710_v28 = vpop.f32.mrb[4].mxu0 }
 0x55f   : > { %v933_v29 = vpack.c.bf16 %v710_v28, %v710_v28  ;;  %v957_v30 = vpop.f32.mrb[5].mxu0 }
 0x560   : > { %v713_v31 = vpop.f32.mrb[6].mxu0 }
 0x561   : > { %726 = vst.msk [vmem:[%s382_s11] sm:$0xf] %vm725_vm1, %v933_v29  ;;  %v934_v32 = vpack.c.bf16 %v713_v31, %v713_v31  ;;  %v958_v33 = vpop.f32.mrb[7].mxu0 }
 0x563   : > { %727 = vst.msk [vmem:[%s382_s11 + $0x4] sm:$0xf] %vm725_vm1, %v934_v32 }
 0x564 PF: > { %s15_s22 = sadd.s32 1, %s1060_s22   ;;  %s1222_s18 = smov %s1052_s20 }
 0x565   : > { %p12_p7 = scmp.ge.s32.totalorder %s15_s22, 10   ;;  %s1223_s19 = smov %s1056_s21 }
 0x566   : > { %s1224_s20 = smov %s1227_s23  ;;  %s1225_s21 = smov %s1231_s24 }
 0x567   :  { %14 = sbr.rel (!%p12_p7) target bundleno = 3 (0x3), region = 82 }

// kernel: conformer_encoder.35
= control target key start
LH: loop header
LB: loop body
LE: loop exit
PB: predicated region body
PF: predicated region fallthrough
CT: control target
= control target key end

     0   :  { %vm55_vm0 = vcmask 261120   ;;  %vm139_vm1 = vcmask 257024   ;;  %s246_s1 = inlined_call_operand.vmem [shape: bf16[32,32], index: 1, kind: input, shape index: {}]   ;;  %s247_s0 = inlined_call_operand.vmem [shape: bf16[32,32], index: 0, kind: input, shape index: {}]   ;;  %s248_s3 = inlined_call_operand.vmem [shape: bf16[32,32], index: 3, kind: input, shape index: {}]   ;;  %s249_s2 = inlined_call_operand.vmem [shape: f32[1,32], index: 2, kind: input, shape index: {}]   ;;  %s250_s4 = inlined_call_operand.vmem [shape: bf16[32,32], index: 4, kind: output, shape index: {}]  }
   0x1   :  { %v184_v0 = vld [vmem:[%s246_s1] sm:$0xff]   ;;  %v185_v1 = vld [vmem:[%s246_s1 + $0x8] sm:$0xff]  }
   0x2   :  { %176 = vmatprep.subr.bf16.mxu0 %v184_v0  ;;  %v186_v2 = vld [vmem:[%s247_s0] sm:$0xff]   ;;  %v187_v3 = vld [vmem:[%s247_s0 + $0x8] sm:$0xff]  }
   0x3   :  { %177 = vmatpush3.bf16.msra.mxu0 %v184_v0  ;;  %180 = vmatprep.mubr.msk.bf16.mxu0 %vm55_vm0, %v186_v2  ;;  %v171_v4 = vld [vmem:[%s248_s3 + $0x8] sm:$0xff]   ;;  %v164_v5 = vld [vmem:[%s248_s3] sm:$0xff]  }
   0x4   :  { %178 = vmatprep.subr.bf16.mxu0 %v185_v1  ;;  %v148_v6 = vld [vmem:[%s249_s2] ss:$0 sm:$0xff]  ;;  %v169_v7 = vunpack.c.l.bf16 %v171_v4  ;;  %v165_v9 = vunpack.c.l.bf16 %v164_v5  ;;  %v170_v12 = vunpack.c.h.bf16 %v171_v4  ;;  %v166_v15 = vunpack.c.h.bf16 %v164_v5 }
   0x7   :  { %179 = vmatpush3.bf16.msra.mxu0 %v185_v1 }
   0xa   :  { %181 = vmatmul.mubr.msk.bf16.vlgmr.msra.gmra.mrb[0].mxu0 %vm55_vm0, %v187_v3 }
  0xdd   :  { %v182_v8 = vpop.f32.mrb[0].mxu0 }
  0xde   :  { %v105_v10 = vadd.f32 %v182_v8, %v148_v6  ;;  %v96_v11 = vpop.f32.mrb[1].mxu0 }
  0xdf   :  { %v97_v13 = vadd.f32 %v148_v6, %v96_v11  ;;  %v183_v14 = vpop.f32.mrb[2].mxu0 }
  0xe0   :  { %v121_v16 = vadd.f32 %v169_v7, %v105_v10  ;;  %v108_v17 = vadd.f32 %v183_v14, %v148_v6  ;;  %v99_v18 = vpop.f32.mrb[3].mxu0 }
  0xe1   :  { %v119_v19 = vadd.f32 %v165_v9, %v97_v13  ;;  %v100_v20 = vadd.f32 %v148_v6, %v99_v18 }
  0xe2   :  { %v161_v21 = vpack.c.bf16 %v121_v16, %v121_v16  ;;  %v122_v22 = vadd.f32 %v170_v12, %v108_v17 }
  0xe3   :  { %v159_v23 = vpack.c.bf16 %v119_v19, %v119_v19  ;;  %v120_v24 = vadd.f32 %v166_v15, %v100_v20 }
  0xe4   :  { %142 = vst.msk [vmem:[%s250_s4 + $0x8] sm:$0xf] %vm139_vm1, %v161_v21  ;;  %v162_v25 = vpack.c.bf16 %v122_v22, %v122_v22 }
  0xe5   :  { %140 = vst.msk [vmem:[%s250_s4] sm:$0xf] %vm139_vm1, %v159_v23  ;;  %v160_v26 = vpack.c.bf16 %v120_v24, %v120_v24 }
  0xe6   :  { %143 = vst.msk [vmem:[%s250_s4 + $0xc] sm:$0xf] %vm139_vm1, %v162_v25 }
  0xe7   :  { %141 = vst.msk [vmem:[%s250_s4 + $0x4] sm:$0xf] %vm139_vm1, %v160_v26 }

// kernel: conformer_encoder.36
= control target key start
LH: loop header
LB: loop body
LE: loop exit
PB: predicated region body
PF: predicated region fallthrough
CT: control target
= control target key end

     0   :  { %vm29_vm0 = vcmask 261120   ;;  %vm245_vm1 = vcmask 257024   ;;  %s395_s0 = inlined_call_operand.vmem [shape: bf16[32,32], index: 0, kind: input, shape index: {}]   ;;  %s396_s1 = inlined_call_operand.vmem [shape: bf16[32,64], index: 1, kind: input, shape index: {}]   ;;  %s397_s3 = inlined_call_operand.vmem [shape: f32[1,32], index: 3, kind: input, shape index: {}]   ;;  %s398_s4 = inlined_call_operand.vmem [shape: f32[1,32], index: 4, kind: input, shape index: {}]   ;;  %s399_s2 = inlined_call_operand.vmem [shape: f32[1,64], index: 2, kind: input, shape index: {}]   ;;  %s400_s5 = inlined_call_operand.vmem [shape: bf16[32,32], index: 5, kind: output, shape index: {}]  }
   0x1   :  { %v274_v0 = vld [vmem:[%s395_s0] sm:$0xff]   ;;  %v281_v1 = vld [vmem:[%s395_s0 + $0x8] sm:$0xff]  }
   0x2   :  { %v275_v2 = vunpack.c.l.bf16 %v274_v0  ;;  %v279_v3 = vunpack.c.l.bf16 %v281_v1  ;;  %v276_v4 = vunpack.c.h.bf16 %v274_v0  ;;  %v280_v5 = vunpack.c.h.bf16 %v281_v1  ;;  %v295_v30 = vld [vmem:[%s396_s1] sm:$0xff]   ;;  %v296_v31 = vld [vmem:[%s396_s1 + $0x8] sm:$0xff]  }
   0x3   :  { %286 = vmatprep.subr.bf16.mxu0 %v295_v30  ;;  %v254_v46 = vld [vmem:[%s397_s3] ss:$0 sm:$0xff] }
   0x4   :  { %v30_v6 = vsel %vm29_vm0, %v275_v2, 0.0  ;;  %v36_v7 = vsel %vm29_vm0, %v279_v3, 0.0  ;;  %v33_v8 = vsel %vm29_vm0, %v276_v4, 0.0  ;;  %v39_v9 = vsel %vm29_vm0, %v280_v5, 0.0  ;;  %287 = vmatpush3.bf16.msra.mxu0 %v295_v30  ;;  %v255_v52 = vld [vmem:[%s398_s4] ss:$0 sm:$0xff] }
   0x5   :  { %31 = vadd.xlane.f32.xlu0 %v30_v6  ;;  %37 = vadd.xlane.f32.xlu1 %v36_v7  ;;  %v256_v0 = vld [vmem:[%s399_s2] ss:$0 sm:$0xff]  ;;  %s321_s2 = smov 96  }
   0x6   :  { %288 = vmatprep.subr.bf16.mxu0 %v296_v31 }
   0x8   :  { %289 = vmatpush3.bf16.msra.mxu0 %v296_v31 }
   0x9   :  { %34 = vadd.xlane.f32.xlu0 %v33_v8  ;;  %40 = vadd.xlane.f32.xlu1 %v39_v9 }
  0x92   :  { %v32_v10 = vpop.xlane.xlu0 %31  ;;  %v38_v11 = vpop.xlane.xlu1 %37 }
  0x93   :  { %v43_v12 = vmul.f32 0.03125, %v32_v10  ;;  %v45_v13 = vmul.f32 0.03125, %v38_v11 }
  0x95   :  { %v47_v14 = vsub.f32 %v275_v2, %v43_v12  ;;  %v49_v15 = vsub.f32 %v279_v3, %v45_v13 }
  0x96   :  { %v35_v16 = vpop.xlane.xlu0 %34  ;;  %v41_v17 = vpop.xlane.xlu1 %40 }
  0x97   :  { %v44_v18 = vmul.f32 0.03125, %v35_v16  ;;  %v46_v19 = vmul.f32 0.03125, %v41_v17  ;;  %v51_v20 = vmul.f32 %v47_v14, %v47_v14  ;;  %v53_v21 = vmul.f32 %v49_v15, %v49_v15 }
  0x99   :  { %v48_v22 = vsub.f32 %v276_v4, %v44_v18  ;;  %v50_v23 = vsub.f32 %v280_v5, %v46_v19  ;;  %v55_v24 = vsel %vm29_vm0, %v51_v20, 0.0  ;;  %v61_v25 = vsel %vm29_vm0, %v53_v21, 0.0 }
  0x9a   :  { %56 = vadd.xlane.f32.xlu0 %v55_v24 }
  0x9b   :  { %v52_v26 = vmul.f32 %v48_v22, %v48_v22  ;;  %v54_v27 = vmul.f32 %v50_v23, %v50_v23 }
  0x9d   :  { %v58_v28 = vsel %vm29_vm0, %v52_v26, 0.0  ;;  %v64_v29 = vsel %vm29_vm0, %v54_v27, 0.0 }
  0x9e   :  { %62 = vadd.xlane.f32.xlu0 %v61_v25  ;;  %59 = vadd.xlane.f32.xlu1 %v58_v28 }
  0xa2   :  { %65 = vadd.xlane.f32.xlu1 %v64_v29 }
 0x127   :  { %v57_v32 = vpop.xlane.xlu0 %56 }
 0x128   :  { %v67_v33 = vmul.f32 0.03125, %v57_v32 }
 0x12a   :  { %v71_v34 = vadd.f32 1e-05, %v67_v33 }
 0x12b   :  { %v60_v35 = vpop.xlane.xlu1 %59  ;;  %v63_v36 = vpop.xlane.xlu0 %62 }
 0x12c   :  { %297 = vrsqrt.f32 %v71_v34  ;;  %v68_v37 = vmul.f32 0.03125, %v60_v35  ;;  %v69_v38 = vmul.f32 0.03125, %v63_v36 }
 0x12e   :  { %v72_v39 = vadd.f32 1e-05, %v68_v37  ;;  %v73_v40 = vadd.f32 1e-05, %v69_v38 }
 0x12f   :  { %v66_v41 = vpop.xlane.xlu1 %65 }
 0x130   :  { %299 = vrsqrt.f32 %v72_v39  ;;  %v70_v42 = vmul.f32 0.03125, %v66_v41 }
 0x131   :  { %301 = vrsqrt.f32 %v73_v40 }
 0x132   :  { %v74_v43 = vadd.f32 1e-05, %v70_v42 }
 0x134   :  { %303 = vrsqrt.f32 %v74_v43 }
 0x136   :  { %v298_v44 = vpop.eup %297 }
 0x137   :  { %v79_v45 = vmul.f32 %v298_v44, %v47_v14 }
 0x139   :  { %v90_v50 = vmul.f32 %v254_v46, %v79_v45 }
 0x13a   :  { %v300_v47 = vpop.eup %299 }
 0x13b   :  { %v302_v48 = vpop.eup %301  ;;  %v80_v49 = vmul.f32 %v300_v47, %v48_v22  ;;  %v101_v56 = vadd.f32 %v255_v52, %v90_v50 }
 0x13c   :  { %v81_v51 = vmul.f32 %v302_v48, %v49_v15 }
 0x13d   :  { %v91_v53 = vmul.f32 %v254_v46, %v80_v49 }
 0x13e   :  { %v304_v54 = vpop.eup %303  ;;  %v92_v58 = vmul.f32 %v254_v46, %v81_v51 }
 0x13f   :  { %v82_v55 = vmul.f32 %v304_v54, %v50_v23  ;;  %v102_v57 = vadd.f32 %v255_v52, %v91_v53 }
 0x140   :  { %v103_v61 = vadd.f32 %v255_v52, %v92_v58 }
 0x141   :  { %v105_v59 = vpack.c.bf16 %v102_v57, %v101_v56  ;;  %v93_v60 = vmul.f32 %v254_v46, %v82_v55 }
 0x143   :  { %290 = vmatprep.mubr.msk.bf16.mxu0 %vm29_vm0, %v105_v59  ;;  %v104_v62 = vadd.f32 %v255_v52, %v93_v60 }
 0x145   :  { %v106_v63 = vpack.c.bf16 %v104_v62, %v103_v61 }
 0x147   :  { %291 = vmatmul.mubr.msk.bf16.vlgmr.msra.gmra.mrb[0].mxu0 %vm29_vm0, %v106_v63 }
 0x21a   :  { %v292_v1 = vpop.f32.mrb[0].mxu0 }
 0x21b   :  { %v179_v2 = vadd.f32 %v292_v1, %v256_v0  ;;  %v170_v3 = vpop.f32.mrb[1].mxu0 }
 0x21c   :  { %v171_v4 = vadd.f32 %v256_v0, %v170_v3  ;;  %v293_v5 = vpop.f32.mrb[2].mxu0 }
 0x21d   :  { %v263_v6 = vmul.f32 -1.442695, %v179_v2  ;;  %v182_v7 = vadd.f32 %v293_v5, %v256_v0  ;;  %v173_v8 = vpop.f32.mrb[3].mxu0 }
 0x21e   :  { %v261_v9 = vmul.f32 -1.442695, %v171_v4  ;;  %v174_v10 = vadd.f32 %v256_v0, %v173_v8 }
 0x21f   :  { %305 = vpow2.f32 %v263_v6  ;;  %v264_v11 = vmul.f32 -1.442695, %v182_v7 }
 0x220   :  { %307 = vpow2.f32 %v261_v9  ;;  %v262_v12 = vmul.f32 -1.442695, %v174_v10 }
 0x222   :  { %309 = vpow2.f32 %v262_v12 }
 0x223   :  { %311 = vpow2.f32 %v264_v11 }
 0x229   :  { %v306_v13 = vpop.eup %305 }
 0x22a   :  { %v308_v14 = vpop.eup %307  ;;  %v199_v15 = vadd.f32 1.0, %v306_v13 }
 0x22b   :  { %v197_v16 = vadd.f32 1.0, %v308_v14 }
 0x22c   :  { %v310_v17 = vpop.eup %309  ;;  %313 = vrcp.f32 %v199_v15 }
 0x22d   :  { %v312_v18 = vpop.eup %311  ;;  %315 = vrcp.f32 %v197_v16  ;;  %v198_v19 = vadd.f32 1.0, %v310_v17 }
 0x22e   :  { %v200_v20 = vadd.f32 1.0, %v312_v18 }
 0x22f   :  { %317 = vrcp.f32 %v198_v19 }
 0x230   :  { %319 = vrcp.f32 %v200_v20 }
 0x236   :  { %v314_v21 = vpop.eup %313 }
 0x237   :  { %v316_v22 = vpop.eup %315  ;;  %217 = vrot.lane.b32.xlu1 %v314_v21, %s321_s2 }
 0x238   :  { %213 = vrot.lane.b32.xlu0 %v316_v22, %s321_s2 }
 0x239   :  { %v318_v23 = vpop.eup %317 }
 0x23a   :  { %v320_v24 = vpop.eup %319 }
 0x23b   :  { %215 = vrot.lane.b32.xlu1 %v318_v23, %s321_s2 }
 0x23f   :  { %219 = vrot.lane.b32.xlu1 %v320_v24, %s321_s2 }
 0x2a9   :  { %v218_v25 = vpop.permute.xlu1 %217 }
 0x2aa   :  { %v227_v26 = vmul.f32 %v218_v25, %v179_v2  ;;  %v214_v27 = vpop.permute.xlu0 %213 }
 0x2ab   :  { %v225_v28 = vmul.f32 %v214_v27, %v171_v4 }
 0x2ac   :  { %v271_v29 = vpack.c.bf16 %v227_v26, %v227_v26 }
 0x2ad   :  { %v269_v30 = vpack.c.bf16 %v225_v28, %v225_v28  ;;  %v216_v31 = vpop.permute.xlu1 %215 }
 0x2ae   :  { %248 = vst.msk [vmem:[%s400_s5 + $0x8] sm:$0xf] %vm245_vm1, %v271_v29  ;;  %v226_v32 = vmul.f32 %v216_v31, %v174_v10 }
 0x2af   :  { %246 = vst.msk [vmem:[%s400_s5] sm:$0xf] %vm245_vm1, %v269_v30 }
 0x2b0   :  { %v270_v33 = vpack.c.bf16 %v226_v32, %v226_v32 }
 0x2b1   :  { %v220_v34 = vpop.permute.xlu1 %219 }
 0x2b2   :  { %247 = vst.msk [vmem:[%s400_s5 + $0x4] sm:$0xf] %vm245_vm1, %v270_v33  ;;  %v228_v35 = vmul.f32 %v220_v34, %v182_v7 }
 0x2b4   :  { %v272_v36 = vpack.c.bf16 %v228_v35, %v228_v35 }
 0x2b6   :  { %249 = vst.msk [vmem:[%s400_s5 + $0xc] sm:$0xf] %vm245_vm1, %v272_v36 }

// kernel: conformer_encoder.37
= control target key start
LH: loop header
LB: loop body
LE: loop exit
PB: predicated region body
PF: predicated region fallthrough
CT: control target
= control target key end

     0   :  { %s536_s15 = smov 0   ;;  %s627_s0 = inlined_call_operand.vmem [shape: bf16[2,16,32], index: 0, kind: input, shape index: {}]   ;;  %s628_s1 = inlined_call_operand.vmem [shape: f32[7,32], index: 1, kind: input, shape index: {}]   ;;  %s629_s2 = inlined_call_operand.vmem [shape: f32[1,32], index: 2, kind: input, shape index: {}]   ;;  %s630_s3 = inlined_call_operand.vmem [shape: f32[1,32], index: 3, kind: input, shape index: {}]   ;;  %s631_s4 = inlined_call_operand.vmem [shape: bf16[2,16,32], index: 4, kind: output, shape index: {}]  }
   0x1 LB: > { %s462_s16 = sadd.s32 4294967295, %s509_s15   ;;  %p466_p0 = scmp.ge.s32.totalorder %s509_s15, 1  ;;  %s509_s15 = sphi %s536_s15, %s14_s15  }
   0x2   : > { %p162_p1 = scmp.lt.s32.totalorder %s509_s15, 3 }
   0x4   : > { %p163_p2 = pnand %p466_p0, %p162_p1 }
   0x5   : > { %p188_p3 = scmp.lt.s32.totalorder (!%p163_p2), %s462_s16, 1  ;;  %v202_v0 = vlaneseq (!%p163_p2)  ;;  %v205_v2 = vld [vmem:[%s628_s1] sm:$0x7f] (!%p163_p2)  ;;  %vm404_vm12 = vcmask (!%p163_p2), 257024  }
   0x6   : > { %166 = sbr.rel (%p163_p2) target bundleno = 76 (0x4c), region = 36 }
   0x7   : > { %v546_v1 = vshrl.u32 (!%p163_p2), %v202_v0, 7 }
   0x9   : > { %vm208_vm0 = vcmp.lt.s32.totalorder (!%p163_p2), %v546_v1, 3  ;;  %vm211_vm1 = vcmp.ge.s32.totalorder (!%p163_p2), %v546_v1, 3  ;;  %v225_v3 = vsub.s32 (!%p163_p2), 0, %v546_v1  ;;  %vm233_vm2 = vcmp.lt.s32.totalorder (!%p163_p2), %v546_v1, 2 }
   0xa   : > { %vm236_vm3 = vcmp.ge.s32.totalorder (!%p163_p2), %v546_v1, 2  ;;  %v248_v4 = vsub.s32 (!%p163_p2), 1, %v546_v1  ;;  %vm256_vm4 = vcmp.lt.s32.totalorder (!%p163_p2), %v546_v1, 1  ;;  %vm259_vm5 = vcmp.ge.s32.totalorder (!%p163_p2), %v546_v1, 1 }
   0xb   : > { %v226_v6 = vrot.slane (!%p163_p2), %v205_v2, %v225_v3  ;;  %v271_v7 = vsub.s32 (!%p163_p2), 2, %v546_v1  ;;  %v289_v8 = vsub.s32 (!%p163_p2), 3, %v546_v1  ;;  %vm297_vm6 = vcmp.lt.s32.totalorder (!%p163_p2), %v546_v1, 7 }
   0xc   : > { %v249_v11 = vrot.slane (!%p163_p2), %v205_v2, %v248_v4  ;;  %v312_v14 = vsub.s32 (!%p163_p2), 4, %v546_v1  ;;  %vm320_vm7 = vcmp.lt.s32.totalorder (!%p163_p2), %v546_v1, 6  ;;  %v335_v22 = vsub.s32 (!%p163_p2), 5, %v546_v1 }
   0xd   : > { %s633_s16 = smov (!%p188_p3, %s462_s16), 1  ;;  %v272_v12 = vrot.slane %v205_v2, %v271_v7  ;;  %v290_v13 = vrot.slane %v205_v2, %v289_v8  ;;  %vm343_vm8 = vcmp.lt.s32.totalorder %v546_v1, 5  ;;  %v358_v43 = vsub.s32 6, %v546_v1 }
   0xe   : > { %s479_s19 = sshll.u32 %s633_s16, 3  ;;  %v313_v34 = vrot.slane %v205_v2, %v312_v14  ;;  %v336_v38 = vrot.slane %v205_v2, %v335_v22  ;;  %v204_v44 = vadd.s32 8, %v546_v1 }
   0xf   : > { %s192_s22 = scalar_lea.vmem %s627_s0, %s479_s19  ;;  %v359_v51 = vrot.slane %v205_v2, %v358_v43  ;;  %s197_s29 = scalar_lea.vmem %s631_s4, %s479_s19 }
  0x10   : > { %v484_v5 = vld [vmem:[%s192_s22] sm:$0xff]   ;;  %vm301_vm9 = vcmp.lt.s32.totalorder %v204_v44, 15  ;;  %vm324_vm10 = vcmp.lt.s32.totalorder %v204_v44, 14  ;;  %vm347_vm11 = vcmp.lt.s32.totalorder %v204_v44, 13 }
  0x11   : > { %v567_v9 = vunpack.c.l.bf16 %v484_v5  ;;  %v486_v10 = vunpack.c.h.bf16 %v484_v5 }
  0x13   : > { %v206_v15 = vrot.slane %v567_v9, 5  ;;  %v207_v16 = vrot.slane %v486_v10, 5  ;;  %v231_v17 = vrot.slane %v567_v9, 6  ;;  %v232_v18 = vrot.slane %v486_v10, 6 }
  0x14   : > { %v254_v19 = vrot.slane %v567_v9, 7  ;;  %v255_v20 = vrot.slane %v486_v10, 7  ;;  %v295_v21 = vrot.slane %v567_v9, 1  ;;  %v291_v25 = vmul.f32 %v567_v9, %v290_v13 }
  0x15   : > { %v210_v23 = vsel %vm208_vm0, %v207_v16, %v206_v15  ;;  %v235_v24 = vsel %vm233_vm2, %v232_v18, %v231_v17  ;;  %v296_v26 = vrot.slane %v486_v10, 1  ;;  %v318_v30 = vrot.slane %v567_v9, 2 }
  0x16   : > { %v221_v27 = vsel %vm211_vm1, %v210_v23, 0.0  ;;  %v244_v28 = vsel %vm236_vm3, %v235_v24, 0.0  ;;  %v258_v29 = vsel %vm256_vm4, %v255_v20, %v254_v19  ;;  %v319_v37 = vrot.slane %v486_v10, 2 }
  0x17   : > { %v227_v31 = vmul.f32 %v226_v6, %v221_v27  ;;  %v250_v32 = vmul.f32 %v249_v11, %v244_v28  ;;  %v267_v33 = vsel %vm259_vm5, %v258_v29, 0.0  ;;  %v298_v36 = vsel %vm297_vm6, %v295_v21, %v296_v26 }
  0x18   : > { %v273_v35 = vmul.f32 %v272_v12, %v267_v33  ;;  %v341_v40 = vrot.slane %v567_v9, 3  ;;  %v342_v41 = vrot.slane %v486_v10, 3  ;;  %v321_v42 = vsel %vm320_vm7, %v318_v30, %v319_v37 }
  0x19   : > { %v252_v39 = vadd.f32 %v250_v32, %v227_v31  ;;  %v209_v45 = vsel %vm208_vm0, %v206_v15, %v207_v16  ;;  %v314_v47 = vmul.f32 %v313_v34, %v298_v36  ;;  %v337_v48 = vmul.f32 %v336_v38, %v321_v42 }
  0x1a   : > { %v228_v49 = vmul.f32 %v226_v6, %v209_v45  ;;  %v344_v50 = vsel %vm343_vm8, %v341_v40, %v342_v41  ;;  %v234_v52 = vsel %vm233_vm2, %v231_v17, %v232_v18  ;;  %v257_v53 = vsel %vm256_vm4, %v254_v19, %v255_v20  ;;  %v471_v6 = vld [vmem:[%s629_s2] ss:$0 sm:$0xff] }
  0x1b   : > { %v275_v46 = vadd.f32 %v273_v35, %v252_v39  ;;  %v251_v55 = vmul.f32 %v249_v11, %v234_v52  ;;  %v274_v56 = vmul.f32 %v272_v12, %v257_v53  ;;  %v299_v57 = vsel %vm297_vm6, %v296_v26, %v295_v21  ;;  %v472_v11 = vld [vmem:[%s630_s3] ss:$0 sm:$0xff] }
  0x1c   : > { %v292_v58 = vmul.f32 %v486_v10, %v290_v13  ;;  %v322_v59 = vsel %vm320_vm7, %v319_v37, %v318_v30  ;;  %v360_v61 = vmul.f32 %v359_v51, %v344_v50  ;;  %v309_v63 = vsel %vm301_vm9, %v299_v57, 0.0 }
  0x1d   : > { %v293_v54 = vadd.f32 %v291_v25, %v275_v46  ;;  %v253_v62 = vadd.f32 %v251_v55, %v228_v49  ;;  %v332_v0 = vsel %vm324_vm10, %v322_v59, 0.0  ;;  %v345_v2 = vsel %vm343_vm8, %v342_v41, %v341_v40 }
  0x1e   : > { %v315_v5 = vmul.f32 %v313_v34, %v309_v63  ;;  %v355_v7 = vsel %vm347_vm11, %v345_v2, 0.0  ;;  %v338_v10 = vmul.f32 %v336_v38, %v332_v0 }
  0x1f   : > { %v316_v60 = vadd.f32 %v314_v47, %v293_v54  ;;  %v276_v4 = vadd.f32 %v274_v56, %v253_v62  ;;  %v361_v1 = vmul.f32 %v359_v51, %v355_v7 }
  0x21   : > { %v339_v3 = vadd.f32 %v337_v48, %v316_v60  ;;  %v294_v9 = vadd.f32 %v292_v58, %v276_v4 }
  0x23   : > { %v362_v8 = vadd.f32 %v360_v61, %v339_v3  ;;  %v317_v13 = vadd.f32 %v315_v5, %v294_v9 }
  0x25   : > { %v371_v12 = vmul.f32 %v471_v6, %v362_v8  ;;  %v340_v15 = vadd.f32 %v338_v10, %v317_v13 }
  0x27   : > { %v380_v14 = vadd.f32 %v472_v11, %v371_v12  ;;  %v363_v17 = vadd.f32 %v361_v1, %v340_v15 }
  0x29   : > { %v473_v16 = vmul.f32 -1.442695, %v380_v14  ;;  %v372_v18 = vmul.f32 %v471_v6, %v363_v17 }
  0x2b   : > { %495 = vpow2.f32 %v473_v16  ;;  %v381_v19 = vadd.f32 %v472_v11, %v372_v18 }
  0x2d   : > { %v474_v20 = vmul.f32 -1.442695, %v381_v19 }
  0x2f   : > { %497 = vpow2.f32 %v474_v20 }
  0x35   : > { %v496_v21 = vpop.eup %495 }
  0x36   : > { %v388_v22 = vadd.f32 1.0, %v496_v21 }
  0x38   : > { %499 = vrcp.f32 %v388_v22 }
  0x39   : > { %v498_v23 = vpop.eup %497 }
  0x3a   : > { %v389_v24 = vadd.f32 1.0, %v498_v23 }
  0x3c   : > { %501 = vrcp.f32 %v389_v24 }
  0x42   : > { %v500_v25 = vpop.eup %499 }
  0x43   : > { %v394_v26 = vmul.f32 %v500_v25, %v380_v14 }
  0x45   : > { %v481_v27 = vpack.c.bf16 %v394_v26, %v394_v26 }
  0x46   : > { %v502_v28 = vpop.eup %501 }
  0x47   : > { %405 = vst.msk [vmem:[%s197_s29] sm:$0xf] %vm404_vm12, %v481_v27  ;;  %v395_v29 = vmul.f32 %v502_v28, %v381_v19 }
  0x49   : > { %v482_v30 = vpack.c.bf16 %v395_v29, %v395_v29 }
  0x4b   : > { %406 = vst.msk [vmem:[%s197_s29 + $0x4] sm:$0xf] %vm404_vm12, %v482_v30 }
  0x4c PF: > { %s14_s15 = sadd.s32 1, %s509_s15  }
  0x4d   : > { %p11_p4 = scmp.ge.s32.totalorder %s14_s15, 4  }
  0x4f   :  { %13 = sbr.rel (!%p11_p4) target bundleno = 1 (0x1), region = 66 }

// kernel: conformer_encoder.41
= control target key start
LH: loop header
LB: loop body
LE: loop exit
PB: predicated region body
PF: predicated region fallthrough
CT: control target
= control target key end

     0   :  { %vm22_vm0 = vcmask 261120   ;;  %vm114_vm1 = vcmask 257024   ;;  %s206_s0 = inlined_call_operand.vmem [shape: bf16[32,32], index: 0, kind: input, shape index: {}]   ;;  %s207_s1 = inlined_call_operand.vmem [shape: f32[1,32], index: 1, kind: input, shape index: {}]   ;;  %s208_s2 = inlined_call_operand.vmem [shape: f32[1,32], index: 2, kind: input, shape index: {}]   ;;  %s209_s3 = inlined_call_operand.vmem [shape: bf16[32,32], index: 3, kind: output, shape index: {}]  }
   0x1   :  { %v134_v0 = vld [vmem:[%s206_s0] sm:$0xff]   ;;  %v141_v1 = vld [vmem:[%s206_s0 + $0x8] sm:$0xff]  }
   0x2   :  { %v135_v2 = vunpack.c.l.bf16 %v134_v0  ;;  %v139_v3 = vunpack.c.l.bf16 %v141_v1  ;;  %v136_v4 = vunpack.c.h.bf16 %v134_v0  ;;  %v140_v5 = vunpack.c.h.bf16 %v141_v1  ;;  %v123_v43 = vld [vmem:[%s207_s1] ss:$0 sm:$0xff] }
   0x3   :  { %v124_v45 = vld [vmem:[%s208_s2] ss:$0 sm:$0xff] }
   0x4   :  { %v23_v6 = vsel %vm22_vm0, %v135_v2, 0.0  ;;  %v29_v7 = vsel %vm22_vm0, %v139_v3, 0.0  ;;  %v26_v8 = vsel %vm22_vm0, %v136_v4, 0.0  ;;  %v32_v9 = vsel %vm22_vm0, %v140_v5, 0.0 }
   0x5   :  { %24 = vadd.xlane.f32.xlu0 %v23_v6  ;;  %30 = vadd.xlane.f32.xlu1 %v29_v7 }
   0x9   :  { %27 = vadd.xlane.f32.xlu0 %v26_v8  ;;  %33 = vadd.xlane.f32.xlu1 %v32_v9 }
  0x92   :  { %v25_v10 = vpop.xlane.xlu0 %24  ;;  %v31_v11 = vpop.xlane.xlu1 %30 }
  0x93   :  { %v36_v12 = vmul.f32 0.03125, %v25_v10  ;;  %v38_v13 = vmul.f32 0.03125, %v31_v11 }
  0x95   :  { %v40_v14 = vsub.f32 %v135_v2, %v36_v12  ;;  %v42_v15 = vsub.f32 %v139_v3, %v38_v13 }
  0x96   :  { %v28_v16 = vpop.xlane.xlu0 %27  ;;  %v34_v17 = vpop.xlane.xlu1 %33 }
  0x97   :  { %v37_v18 = vmul.f32 0.03125, %v28_v16  ;;  %v39_v19 = vmul.f32 0.03125, %v34_v17  ;;  %v44_v20 = vmul.f32 %v40_v14, %v40_v14  ;;  %v46_v21 = vmul.f32 %v42_v15, %v42_v15 }
  0x99   :  { %v41_v22 = vsub.f32 %v136_v4, %v37_v18  ;;  %v43_v23 = vsub.f32 %v140_v5, %v39_v19  ;;  %v48_v24 = vsel %vm22_vm0, %v44_v20, 0.0  ;;  %v54_v25 = vsel %vm22_vm0, %v46_v21, 0.0 }
  0x9a   :  { %49 = vadd.xlane.f32.xlu0 %v48_v24 }
  0x9b   :  { %v45_v26 = vmul.f32 %v41_v22, %v41_v22  ;;  %v47_v27 = vmul.f32 %v43_v23, %v43_v23 }
  0x9d   :  { %v51_v28 = vsel %vm22_vm0, %v45_v26, 0.0  ;;  %v57_v29 = vsel %vm22_vm0, %v47_v27, 0.0 }
  0x9e   :  { %55 = vadd.xlane.f32.xlu0 %v54_v25  ;;  %52 = vadd.xlane.f32.xlu1 %v51_v28 }
  0xa2   :  { %58 = vadd.xlane.f32.xlu1 %v57_v29 }
 0x127   :  { %v50_v30 = vpop.xlane.xlu0 %49 }
 0x128   :  { %v60_v31 = vmul.f32 0.03125, %v50_v30 }
 0x12a   :  { %v64_v32 = vadd.f32 1e-05, %v60_v31 }
 0x12b   :  { %v53_v33 = vpop.xlane.xlu1 %52  ;;  %v56_v34 = vpop.xlane.xlu0 %55 }
 0x12c   :  { %142 = vrsqrt.f32 %v64_v32  ;;  %v61_v35 = vmul.f32 0.03125, %v53_v33  ;;  %v62_v36 = vmul.f32 0.03125, %v56_v34 }
 0x12e   :  { %v65_v37 = vadd.f32 1e-05, %v61_v35  ;;  %v66_v38 = vadd.f32 1e-05, %v62_v36 }
 0x12f   :  { %v59_v39 = vpop.xlane.xlu1 %58 }
 0x130   :  { %144 = vrsqrt.f32 %v65_v37  ;;  %v63_v40 = vmul.f32 0.03125, %v59_v39 }
 0x131   :  { %146 = vrsqrt.f32 %v66_v38 }
 0x132   :  { %v67_v41 = vadd.f32 1e-05, %v63_v40 }
 0x134   :  { %148 = vrsqrt.f32 %v67_v41 }
 0x136   :  { %v143_v42 = vpop.eup %142 }
 0x137   :  { %v72_v44 = vmul.f32 %v143_v42, %v40_v14 }
 0x139   :  { %v83_v46 = vmul.f32 %v123_v43, %v72_v44 }
 0x13a   :  { %v145_v47 = vpop.eup %144 }
 0x13b   :  { %v147_v48 = vpop.eup %146  ;;  %v94_v49 = vadd.f32 %v124_v45, %v83_v46  ;;  %v73_v50 = vmul.f32 %v145_v47, %v41_v22 }
 0x13c   :  { %v74_v51 = vmul.f32 %v147_v48, %v42_v15 }
 0x13d   :  { %v129_v52 = vpack.c.bf16 %v94_v49, %v94_v49  ;;  %v84_v53 = vmul.f32 %v123_v43, %v73_v50 }
 0x13e   :  { %v149_v54 = vpop.eup %148  ;;  %v85_v55 = vmul.f32 %v123_v43, %v74_v51 }
 0x13f   :  { %115 = vst.msk [vmem:[%s209_s3] sm:$0xf] %vm114_vm1, %v129_v52  ;;  %v95_v56 = vadd.f32 %v124_v45, %v84_v53  ;;  %v75_v57 = vmul.f32 %v149_v54, %v43_v23 }
 0x140   :  { %v96_v58 = vadd.f32 %v124_v45, %v85_v55 }
 0x141   :  { %v130_v59 = vpack.c.bf16 %v95_v56, %v95_v56  ;;  %v86_v60 = vmul.f32 %v123_v43, %v75_v57 }
 0x142   :  { %v131_v61 = vpack.c.bf16 %v96_v58, %v96_v58 }
 0x143   :  { %116 = vst.msk [vmem:[%s209_s3 + $0x4] sm:$0xf] %vm114_vm1, %v130_v59  ;;  %v97_v62 = vadd.f32 %v124_v45, %v86_v60 }
 0x144   :  { %117 = vst.msk [vmem:[%s209_s3 + $0x8] sm:$0xf] %vm114_vm1, %v131_v61 }
 0x145   :  { %v132_v63 = vpack.c.bf16 %v97_v62, %v97_v62 }
 0x147   :  { %118 = vst.msk [vmem:[%s209_s3 + $0xc] sm:$0xf] %vm114_vm1, %v132_v63 }

// kernel: conformer_encoder.53
= control target key start
LH: loop header
LB: loop body
LE: loop exit
PB: predicated region body
PF: predicated region fallthrough
CT: control target
= control target key end

     0   :  { %vm23_vm0 = vcmask 261120   ;;  %s224_s0 = inlined_call_operand.vmem [shape: bf16[32,32], index: 0, kind: input, shape index: {}]   ;;  %s225_s1 = inlined_call_operand.vmem [shape: f32[1,32], index: 1, kind: input, shape index: {}]   ;;  %s226_s2 = inlined_call_operand.vmem [shape: f32[1,32], index: 2, kind: input, shape index: {}]   ;;  %s227_s3 = inlined_call_operand.hbm [shape: f32[32,32], index: 3, kind: output, shape index: {}]  }
   0x1   :  { %v122_v0 = vld [vmem:[%s224_s0] sm:$0xff]   ;;  %v129_v1 = vld [vmem:[%s224_s0 + $0x8] sm:$0xff]  }
   0x2   :  { %8 = vsyncpa [#allocation3], 0  ;;  %v123_v2 = vunpack.c.l.bf16 %v122_v0  ;;  %v127_v3 = vunpack.c.l.bf16 %v129_v1  ;;  %v124_v4 = vunpack.c.h.bf16 %v122_v0  ;;  %v128_v5 = vunpack.c.h.bf16 %v129_v1  ;;  %v119_v43 = vld [vmem:[%s225_s1] ss:$0 sm:$0xff]  ;;  %s165_s1 = smov [#allocation2]  }
   0x3   :  { %v120_v45 = vld [vmem:[%s226_s2] ss:$0 sm:$0xff]  ;;  %s108_s19 = sshll.u32 %s165_s1, 4  ;;  %s109_s19 = int_to_ptr.vmem [resolvable:$true] %s108_s19 }
   0x4   :  { %v24_v6 = vsel %vm23_vm0, %v123_v2, 0.0  ;;  %v30_v7 = vsel %vm23_vm0, %v127_v3, 0.0  ;;  %v27_v8 = vsel %vm23_vm0, %v124_v4, 0.0  ;;  %v33_v9 = vsel %vm23_vm0, %v128_v5, 0.0  ;;  %s141_s2 = scalar_lea.vmem %s109_s19, 512  ;;  %p146_p1 = scmp.lt.s32.totalorder %s109_s19, %s109_s19 }
   0x5   :  { %25 = vadd.xlane.f32.xlu0 %v24_v6  ;;  %31 = vadd.xlane.f32.xlu1 %v30_v7  ;;  %p142_p0 = scmp.ne.s32.totalorder %s109_s19, %s141_s2  ;;  %p147_p2 = scmp.lt.s32.totalorder %s141_s2, %s141_s2 }
   0x7   :  { %p148_p3 = por %p147_p2, %p146_p1 }
   0x9   :  { %28 = vadd.xlane.f32.xlu0 %v27_v8  ;;  %34 = vadd.xlane.f32.xlu1 %v33_v9  ;;  %p149_p4 = pnand %p148_p3, %p142_p0 }
  0x92   :  { %v26_v10 = vpop.xlane.xlu0 %25  ;;  %v32_v11 = vpop.xlane.xlu1 %31 }
  0x93   :  { %v37_v12 = vmul.f32 0.03125, %v26_v10  ;;  %v39_v13 = vmul.f32 0.03125, %v32_v11 }
  0x95   :  { %v41_v14 = vsub.f32 %v123_v2, %v37_v12  ;;  %v43_v15 = vsub.f32 %v127_v3, %v39_v13 }
  0x96   :  { %v29_v16 = vpop.xlane.xlu0 %28  ;;  %v35_v17 = vpop.xlane.xlu1 %34 }
  0x97   :  { %v38_v18 = vmul.f32 0.03125, %v29_v16  ;;  %v40_v19 = vmul.f32 0.03125, %v35_v17  ;;  %v45_v20 = vmul.f32 %v41_v14, %v41_v14  ;;  %v47_v21 = vmul.f32 %v43_v15, %v43_v15 }
  0x99   :  { %v42_v22 = vsub.f32 %v124_v4, %v38_v18  ;;  %v44_v23 = vsub.f32 %v128_v5, %v40_v19  ;;  %v49_v24 = vsel %vm23_vm0, %v45_v20, 0.0  ;;  %v55_v25 = vsel %vm23_vm0, %v47_v21, 0.0 }
  0x9a   :  { %50 = vadd.xlane.f32.xlu0 %v49_v24 }
  0x9b   :  { %v46_v26 = vmul.f32 %v42_v22, %v42_v22  ;;  %v48_v27 = vmul.f32 %v44_v23, %v44_v23 }
  0x9d   :  { %v52_v28 = vsel %vm23_vm0, %v46_v26, 0.0  ;;  %v58_v29 = vsel %vm23_vm0, %v48_v27, 0.0 }
  0x9e   :  { %56 = vadd.xlane.f32.xlu0 %v55_v25  ;;  %53 = vadd.xlane.f32.xlu1 %v52_v28 }
  0xa2   :  { %59 = vadd.xlane.f32.xlu1 %v58_v29 }
 0x127   :  { %v51_v30 = vpop.xlane.xlu0 %50 }
 0x128   :  { %v61_v31 = vmul.f32 0.03125, %v51_v30 }
 0x12a   :  { %v65_v32 = vadd.f32 1e-05, %v61_v31 }
 0x12b   :  { %v54_v33 = vpop.xlane.xlu1 %53  ;;  %v57_v34 = vpop.xlane.xlu0 %56 }
 0x12c   :  { %133 = vrsqrt.f32 %v65_v32  ;;  %v62_v35 = vmul.f32 0.03125, %v54_v33  ;;  %v63_v36 = vmul.f32 0.03125, %v57_v34 }
 0x12e   :  { %v66_v37 = vadd.f32 1e-05, %v62_v35  ;;  %v67_v38 = vadd.f32 1e-05, %v63_v36 }
 0x12f   :  { %v60_v39 = vpop.xlane.xlu1 %59 }
 0x130   :  { %135 = vrsqrt.f32 %v66_v37  ;;  %v64_v40 = vmul.f32 0.03125, %v60_v39 }
 0x131   :  { %137 = vrsqrt.f32 %v67_v38 }
 0x132   :  { %v68_v41 = vadd.f32 1e-05, %v64_v40 }
 0x134   :  { %139 = vrsqrt.f32 %v68_v41 }
 0x136   :  { %v134_v42 = vpop.eup %133 }
 0x137   :  { %v73_v44 = vmul.f32 %v134_v42, %v41_v14 }
 0x139   :  { %v84_v46 = vmul.f32 %v119_v43, %v73_v44 }
 0x13a   :  { %v136_v47 = vpop.eup %135 }
 0x13b   :  { %v138_v48 = vpop.eup %137  ;;  %v95_v49 = vadd.f32 %v120_v45, %v84_v46  ;;  %v74_v50 = vmul.f32 %v136_v47, %v42_v22 }
 0x13c   :  { %v75_v51 = vmul.f32 %v138_v48, %v43_v15 }
 0x13d   :  { %99 = vst.msk [vmem:[#allocation2] sm:$0xff] %vm23_vm0, %v95_v49  ;;  %v85_v52 = vmul.f32 %v119_v43, %v74_v50 }
 0x13e   :  { %v140_v53 = vpop.eup %139  ;;  %v86_v54 = vmul.f32 %v119_v43, %v75_v51 }
 0x13f   :  { %v96_v55 = vadd.f32 %v120_v45, %v85_v52  ;;  %v76_v56 = vmul.f32 %v140_v53, %v44_v23 }
 0x140   :  { %v97_v57 = vadd.f32 %v120_v45, %v86_v54 }
 0x141   :  { %100 = vst.msk [vmem:[#allocation2 + $0x8] sm:$0xff] %vm23_vm0, %v96_v55  ;;  %v87_v58 = vmul.f32 %v119_v43, %v76_v56 }
 0x142   :  { %101 = vst.msk [vmem:[#allocation2 + $0x10] sm:$0xff] %vm23_vm0, %v97_v57 }
 0x143   :  { %v98_v59 = vadd.f32 %v120_v45, %v87_v58 }
 0x145   :  { %102 = vst.msk [vmem:[#allocation2 + $0x18] sm:$0xff] %vm23_vm0, %v98_v59 }
 0x146   :  { %152 = shalt.err (!%p149_p4)
}
 0x147   :  { %s153_s22 = scalar_lea.hbm %s227_s3, 512 }
 0x148   :  { %p154_p5 = scmp.ne.s32.totalorder %s227_s3, %s153_s22  ;;  %p157_p6 = scmp.lt.u32.totalorder %s153_s22, %s227_s3 }
 0x14a   :  { %p159_p7 = pnand %p157_p6, %p154_p5 }
 0x14c   :  { %162 = shalt.err (!%p159_p7)
}
 0x14d   :  { %s166_s27 = smov 128   ;;  %s167_s28 = smov 8  }
 0x14e   :  { %114 = dma.vmem_to_hbm [thread:$0]  %s109_s19, 512, %s227_s3, [#allocation3], %s166_s27, %s166_s27, %s167_s28  }
 0x14f   :  { %163 = dma.done.wait [#allocation3], 512  }
 0x150   :  { %164 = vsyncadd [#allocation3], 4294966784 }
 0x151   :  { %118 = vsyncpa [#allocation3], 1 }

</bundles_post_ra>
